<compile_context>
chip_gen: v5e
topology: v5e:2x2
jax: 0.10.0
libtpu: 0.0.40
codegen_flags: <defaults>
</compile_context>

<pallas_src>
import functools

import jax
import jax.numpy as jnp
import numpy as np
from jax import lax
from jax.experimental import pallas as pl
from jax.experimental.pallas import tpu as pltpu


def _default_mxu_min_k():
    # v5e has a 128-deep MXU (K>=32 already worthwhile); v6e/v7x are 256-deep,
    # where small-K matmuls are badly under-filled and the unrolled VPU MAC wins.
    try:
        kind = jax.devices()[0].device_kind.lower()
    except Exception:
        return 32
    return 32 if "v5" in kind else 64


def _snake(x, a, inv_a):
    # SnakeActivation: x + (1/a) * sin(a*x)^2  (1/a precomputed on the host).
    s = jnp.sin(a * x)
    return x + inv_a * (s * s)


def _depthwise_conv(x, w, b, tap_mask, taps, HW):
    # Depthwise KHxKW conv (zero pad) over the flattened (R, HW) layout.
    # Each tap = one in-register lane rotation of the whole image (XLU slot)
    # times a precomputed edge-validity mask.
    #   x: (R, HW)   w: (R, KH*KW)   b: (R, 1)   tap_mask: (KH*KW, HW)
    acc = None
    for t, (off, full) in enumerate(taps):
        shifted = x if off == 0 else pltpu.roll(x, (-off) % HW, axis=1)
        if not full:
            shifted = shifted * tap_mask[t:t + 1, :]
        term = shifted * w[:, t:t + 1]
        acc = term if acc is None else acc + term
    return acc + b


def _pointwise_conv(w, acts, b, use_mxu):
    # Fused 1x1 conv(s) in the packed layout: out = sum_i W_i @ acts[i] + b,
    # with the W_i stored concatenated along the contraction axis of `w`.
    if use_mxu:
        act = acts[0] if len(acts) == 1 else jnp.concatenate(acts, axis=0)
        return jnp.dot(w, act.astype(w.dtype),
                       preferred_element_type=jnp.float32) + b
    # Tiny contraction dims: unrolled VPU MAC, all-f32.
    acc = None
    col = 0
    for act in acts:
        k_dim = act.shape[0]
        for k in range(k_dim):
            term = w[:, col + k:col + k + 1] * act[k:k + 1, :]
            acc = term if acc is None else acc + term
        col += k_dim
    return acc + b


def _resblock_kernel(x_ref, mask_ref, vin_ref, vmid_ref, vout_ref,
                     dw1w_ref, dw2w_ref, pw1w_ref, pw2pw_ref, o_ref,
                     *, HW, taps, use_mxu1, use_mxu2):
    x = x_ref[...]                      # (Nb*C_in, HW), batch packed on sublanes
    tap_mask = mask_ref[...]            # (KH*KW, HW)

    a1     = vin_ref[:, 0:1]
    inv_a1 = vin_ref[:, 1:2]
    dw1_b  = vin_ref[:, 2:3]
    pw1_b  = vmid_ref[:, 0:1]
    bn_sc  = vmid_ref[:, 1:2]
    bn_sh  = vmid_ref[:, 2:3]
    a2     = vmid_ref[:, 3:4]
    inv_a2 = vmid_ref[:, 4:5]
    dw2_b  = vmid_ref[:, 5:6]
    out_b  = vout_ref[...]              # (Nb*C_out, 1): pw2 bias + proj bias

    # ---- convs branch ----
    h = _snake(x, a1, inv_a1)                                            # Snake #1
    h = _depthwise_conv(h, dw1w_ref[...], dw1_b, tap_mask, taps, HW)     # dw conv #1
    h = _pointwise_conv(pw1w_ref[...], [h], pw1_b, use_mxu1)             # 1x1 conv #1
    h = h * bn_sc + bn_sh                                                # BatchNorm (eval)
    h = _snake(h, a2, inv_a2)                                            # Snake #2
    h = _depthwise_conv(h, dw2w_ref[...], dw2_b, tap_mask, taps, HW)     # dw conv #2
    # Dropout(p=0.0) is the identity.

    # ---- fused: 1x1 conv #2 + residual 1x1 projection (single contraction) ----
    o_ref[...] = _pointwise_conv(pw2pw_ref[...], [h, x], out_b,
                                 use_mxu2).astype(o_ref.dtype)


def resblock_pallas(x_nchw, params, *, frequency_indepence=False, mxu_min_k=None):
    """ResBlock forward. x_nchw: (N, C_in, H, W) float32 -> (N, C_out, H, W)."""
    KH, KW = (1, 3) if frequency_indepence else (3, 3)
    PH, PW = (0, 1) if frequency_indepence else (1, 1)
    if mxu_min_k is None:
        mxu_min_k = _default_mxu_min_k()

    x = x_nchw.astype(jnp.float32)
    N, C_in, H, W = x.shape
    HW = H * W
    C_mid = params["pw1_w"].shape[0]
    C_out = params["pw2_w"].shape[0]

    # --- batch blocking / sublane packing -----------------------------------
    # Fold Nb batch elements onto the sublane axis so small channel counts do
    # not leave f32 vregs half empty and one grid step has real work.
    desired = 1 if C_in >= 8 else min(N, max(1, 8 // C_in))
    Nb = 1
    for d in range(desired, 0, -1):
        if N % d == 0:
            Nb = d
            break
    n_blocks = N // Nb
    # The (8,128) block rule only binds when an axis is actually tiled.
    if n_blocks > 1 and ((Nb * C_in) % 8 != 0 or (Nb * C_out) % 8 != 0
                         or HW % 128 != 0):
        Nb, n_blocks = N, 1

    R_in, R_mid, R_out = Nb * C_in, Nb * C_mid, Nb * C_out
    use_mxu1 = R_in >= mxu_min_k
    use_mxu2 = (R_mid + R_in) >= mxu_min_k
    mxu_dtype = jnp.bfloat16

    # NCHW -> (N*C, H*W): contiguous reshape only (no transpose / HBM traffic).
    x_flat = x.reshape(N * C_in, HW)

    # --- trace-time tap table: lane-roll offset + edge-validity masks --------
    r = np.arange(HW) // W
    c = np.arange(HW) % W
    taps, mask_rows = [], []
    for kh in range(KH):
        for kw in range(KW):
            dh, dw = kh - PH, kw - PW
            valid = ((r + dh >= 0) & (r + dh < H) & (c + dw >= 0) & (c + dw < W))
            taps.append((dh * W + dw, bool(valid.all())))
            mask_rows.append(valid.astype(np.float32))
    taps = tuple(taps)
    tap_mask = jnp.asarray(np.stack(mask_rows, axis=0))       # (KH*KW, HW) f32

    # --- host-side parameter packing (consolidated operands, batch-tiled) ----
    f32 = jnp.float32

    def tile_rows(v):                                          # (C,k)->(Nb*C,k)
        v = jnp.asarray(v, f32)
        return v if Nb == 1 else jnp.tile(v, (Nb, 1))

    a1 = tile_rows(params["a1"])
    a2 = tile_rows(params["a2"])
    vec_in = jnp.concatenate([a1, 1.0 / a1, tile_rows(params["dw1_b"])], axis=1)
    vec_mid = jnp.concatenate(
        [tile_rows(params["pw1_b"]), tile_rows(params["bn_scale"]),
         tile_rows(params["bn_shift"]), a2, 1.0 / a2,
         tile_rows(params["dw2_b"])], axis=1)
    vec_out = tile_rows(params["pw2_b"]) + tile_rows(params["proj_b"])

    dw1_w = tile_rows(params["dw1_w"])                         # (R_in, KH*KW)
    dw2_w = tile_rows(params["dw2_w"])                         # (R_mid, KH*KW)

    def block_diag(w):                                         # kron(I_Nb, w)
        w = jnp.asarray(w, f32)
        return w if Nb == 1 else jnp.kron(jnp.eye(Nb, dtype=f32), w)

    pw1_w = block_diag(params["pw1_w"])                        # (R_mid, R_in)
    pw2p_w = jnp.concatenate([block_diag(params["pw2_w"]),
                              block_diag(params["proj_w"])], axis=1)
    # Pre-cast MXU operands to bf16 on the host (halves weight DMA bytes,
    # removes per-step casts); the f32 VPU-MAC path keeps f32 weights.
    if use_mxu1:
        pw1_w = pw1_w.astype(mxu_dtype)
    if use_mxu2:
        pw2p_w = pw2p_w.astype(mxu_dtype)

    param_arrays = [vec_in, vec_mid, vec_out, dw1_w, dw2_w, pw1_w, pw2p_w]

    def full_spec(arr):
        nd = arr.ndim
        return pl.BlockSpec(arr.shape, lambda i, _nd=nd: (0,) * _nd)

    kernel = functools.partial(_resblock_kernel, HW=HW, taps=taps,
                               use_mxu1=use_mxu1, use_mxu2=use_mxu2)

    n_taps = KH * KW
    flops = int(N * HW * (
        2 * n_taps * (C_in + C_mid)                              # depthwise convs
        + 2 * Nb * (C_in * C_mid + (C_mid + C_in) * C_out)       # packed 1x1 convs
        + 8 * (C_in + C_mid) + C_out))                           # snake/BN/residual
    transcendentals = int(N * HW * (C_in + C_mid))
    bytes_accessed = int(4 * (N * HW * (C_in + C_out) + int(tap_mask.size))
                         + sum(int(p.size) * p.dtype.itemsize
                               for p in param_arrays))

    out = pl.pallas_call(
        kernel,
        out_shape=jax.ShapeDtypeStruct((N * C_out, HW), jnp.float32),
        grid_spec=pltpu.PrefetchScalarGridSpec(
            num_scalar_prefetch=0,
            grid=(n_blocks,),
            in_specs=[pl.BlockSpec((R_in, HW), lambda i: (i, 0)),
                      full_spec(tap_mask)]
                     + [full_spec(p) for p in param_arrays],
            out_specs=pl.BlockSpec((R_out, HW), lambda i: (i, 0)),
        ),
        compiler_params=pltpu.CompilerParams(dimension_semantics=("parallel",)),
        cost_estimate=pl.CostEstimate(flops=flops,
                                      transcendentals=transcendentals,
                                      bytes_accessed=bytes_accessed),
    )(x_flat, tap_mask, *param_arrays)

    return out.reshape(N, C_out, H, W)


def init_params(key, C_in, C_out, KH, KW, C_mid=None):
    if C_mid is None:
        C_mid = C_out
    ks = jax.random.split(key, 16)

    def nrm(k, shape, scale=0.3):
        return (scale * jax.random.normal(k, shape)).astype(jnp.float32)

    eps = 1e-5
    bn_gamma = 1.0 + 0.1 * jax.random.normal(ks[6], (C_mid, 1))
    bn_beta = 0.1 * jax.random.normal(ks[7], (C_mid, 1))
    bn_mean = 0.1 * jax.random.normal(ks[8], (C_mid, 1))
    bn_var = 1.0 + 0.1 * jax.random.uniform(ks[9], (C_mid, 1))
    inv_std = bn_gamma / jnp.sqrt(bn_var + eps)

    return {
        # Snake `a` (torch shape (1,C,1,1)) -> stored (C, 1), strictly positive
        "a1": (0.3 + 0.2 * jax.random.uniform(ks[0], (C_in, 1))).astype(jnp.float32),
        "a2": (0.3 + 0.2 * jax.random.uniform(ks[1], (C_mid, 1))).astype(jnp.float32),
        # depthwise weights: torch (C,1,KH,KW) -> stored (C, KH*KW)
        "dw1_w": nrm(ks[2], (C_in, KH * KW)),
        "dw1_b": nrm(ks[3], (C_in, 1), 0.1),
        # pointwise 1x1 weights: torch (Cout,Cin,1,1) -> stored (Cout, Cin)
        "pw1_w": nrm(ks[4], (C_mid, C_in)),
        "pw1_b": nrm(ks[5], (C_mid, 1), 0.1),
        "bn_scale": inv_std.astype(jnp.float32),
        "bn_shift": (bn_beta - bn_mean * inv_std).astype(jnp.float32),
        "dw2_w": nrm(ks[10], (C_mid, KH * KW)),
        "dw2_b": nrm(ks[11], (C_mid, 1), 0.1),
        "pw2_w": nrm(ks[12], (C_out, C_mid)),
        "pw2_b": nrm(ks[13], (C_out, 1), 0.1),
        "proj_w": nrm(ks[14], (C_out, C_in)),
        "proj_b": nrm(ks[15], (C_out, 1), 0.1),
    }


def resblock_ref(x_nchw, params, *, frequency_indepence=False):
    # Pure-JAX reference (NCHW) for correctness checking.
    KH, KW = (1, 3) if frequency_indepence else (3, 3)
    PH, PW = (0, 1) if frequency_indepence else (1, 1)
    x = x_nchw.astype(jnp.float32)

    def snake(v, a):
        a4 = a.reshape(1, -1, 1, 1)
        return v + (1.0 / a4) * jnp.sin(a4 * v) ** 2

    def dwconv(v, w, b):
        C = v.shape[1]
        w4 = w.reshape(C, 1, KH, KW)
        y = lax.conv_general_dilated(
            v, w4, (1, 1), [(PH, PH), (PW, PW)],
            dimension_numbers=("NCHW", "OIHW", "NCHW"),
            feature_group_count=C, precision=lax.Precision.HIGHEST)
        return y + b.reshape(1, C, 1, 1)

    def pwconv(v, w, b):
        return (jnp.einsum("nchw,dc->ndhw", v, w,
                           precision=lax.Precision.HIGHEST)
                + b.reshape(1, -1, 1, 1))

    h = snake(x, params["a1"])
    h = dwconv(h, params["dw1_w"], params["dw1_b"])
    h = pwconv(h, params["pw1_w"], params["pw1_b"])
    h = (h * params["bn_scale"].reshape(1, -1, 1, 1)
         + params["bn_shift"].reshape(1, -1, 1, 1))
    h = snake(h, params["a2"])
    h = dwconv(h, params["dw2_w"], params["dw2_b"])
    h = pwconv(h, params["pw2_w"], params["pw2_b"])
    proj = pwconv(x, params["proj_w"], params["proj_b"])
    return proj + h


if __name__ == "__main__":
    key = jax.random.PRNGKey(0)
    k_x, k_p = jax.random.split(key)

    N, C_in, C_out, H, W = 2, 4, 8, 16, 16
    frequency_indepence = False
    KH, KW = (1, 3) if frequency_indepence else (3, 3)

    x = jax.random.normal(k_x, (N, C_in, H, W), dtype=jnp.float32)
    params = init_params(k_p, C_in, C_out, KH, KW)

    out = resblock_pallas(x, params, frequency_indepence=frequency_indepence)
    out = jax.block_until_ready(out)

    ref = jax.block_until_ready(
        resblock_ref(x, params, frequency_indepence=frequency_indepence))

    assert out.shape == (N, C_out, H, W)
    np.testing.assert_allclose(np.asarray(out), np.asarray(ref),
                               rtol=5e-3, atol=5e-3)
    print("KERNEL_OK")
</pallas_src>

<mosaic_0001>
module attributes {stable_mosaic.version = 11 : i64} {
  func.func @_resblock_kernel(%arg0: i32, %arg1: memref<8x256xf32, #tpu.memory_space<vmem>>, %arg2: memref<9x256xf32, #tpu.memory_space<vmem>>, %arg3: memref<8x3xf32, #tpu.memory_space<vmem>>, %arg4: memref<16x6xf32, #tpu.memory_space<vmem>>, %arg5: memref<16x1xf32, #tpu.memory_space<vmem>>, %arg6: memref<8x9xf32, #tpu.memory_space<vmem>>, %arg7: memref<16x9xf32, #tpu.memory_space<vmem>>, %arg8: memref<16x8xf32, #tpu.memory_space<vmem>>, %arg9: memref<16x24xf32, #tpu.memory_space<vmem>>, %arg10: memref<16x256xf32, #tpu.memory_space<vmem>>) attributes {dimension_semantics = [#tpu.dimension_semantics<parallel>], iteration_bounds = array<i64: 1>, scalar_prefetch = 0 : i64, scratch_operands = 0 : i64, tpu.core_type = #tpu.core_type<tc>, window_params = [{transform_indices = @transform_0, window_bounds = array<i64: 8, 256>}, {pipeline_mode = #tpu.pipeline_mode<synchronous>, transform_indices = @transform_1, window_bounds = array<i64: 9, 256>}, {pipeline_mode = #tpu.pipeline_mode<synchronous>, transform_indices = @transform_2, window_bounds = array<i64: 8, 3>}, {pipeline_mode = #tpu.pipeline_mode<synchronous>, transform_indices = @transform_3, window_bounds = array<i64: 16, 6>}, {pipeline_mode = #tpu.pipeline_mode<synchronous>, transform_indices = @transform_4, window_bounds = array<i64: 16, 1>}, {pipeline_mode = #tpu.pipeline_mode<synchronous>, transform_indices = @transform_5, window_bounds = array<i64: 8, 9>}, {pipeline_mode = #tpu.pipeline_mode<synchronous>, transform_indices = @transform_6, window_bounds = array<i64: 16, 9>}, {pipeline_mode = #tpu.pipeline_mode<synchronous>, transform_indices = @transform_7, window_bounds = array<i64: 16, 8>}, {pipeline_mode = #tpu.pipeline_mode<synchronous>, transform_indices = @transform_8, window_bounds = array<i64: 16, 24>}, {transform_indices = @transform_9, window_bounds = array<i64: 16, 256>}]} {
    %c0 = arith.constant 0 : index
    %c0_0 = arith.constant 0 : index
    %0 = vector.load %arg1[%c0, %c0_0] : memref<8x256xf32, #tpu.memory_space<vmem>>, vector<8x256xf32>
    %c0_1 = arith.constant 0 : index
    %c0_2 = arith.constant 0 : index
    %1 = vector.load %arg2[%c0_1, %c0_2] : memref<9x256xf32, #tpu.memory_space<vmem>>, vector<9x256xf32>
    %c0_3 = arith.constant 0 : index
    %c0_4 = arith.constant 0 : index
    %2 = vector.load %arg3[%c0_3, %c0_4] : memref<8x3xf32, #tpu.memory_space<vmem>>, vector<8x1xf32>
    %c0_5 = arith.constant 0 : index
    %c1 = arith.constant 1 : index
    %3 = vector.load %arg3[%c0_5, %c1] : memref<8x3xf32, #tpu.memory_space<vmem>>, vector<8x1xf32>
    %c0_6 = arith.constant 0 : index
    %c2 = arith.constant 2 : index
    %4 = vector.load %arg3[%c0_6, %c2] : memref<8x3xf32, #tpu.memory_space<vmem>>, vector<8x1xf32>
    %c0_7 = arith.constant 0 : index
    %c0_8 = arith.constant 0 : index
    %5 = vector.load %arg4[%c0_7, %c0_8] : memref<16x6xf32, #tpu.memory_space<vmem>>, vector<16x1xf32>
    %c0_9 = arith.constant 0 : index
    %c1_10 = arith.constant 1 : index
    %6 = vector.load %arg4[%c0_9, %c1_10] : memref<16x6xf32, #tpu.memory_space<vmem>>, vector<16x1xf32>
    %c0_11 = arith.constant 0 : index
    %c2_12 = arith.constant 2 : index
    %7 = vector.load %arg4[%c0_11, %c2_12] : memref<16x6xf32, #tpu.memory_space<vmem>>, vector<16x1xf32>
    %c0_13 = arith.constant 0 : index
    %c3 = arith.constant 3 : index
    %8 = vector.load %arg4[%c0_13, %c3] : memref<16x6xf32, #tpu.memory_space<vmem>>, vector<16x1xf32>
    %c0_14 = arith.constant 0 : index
    %c4 = arith.constant 4 : index
    %9 = vector.load %arg4[%c0_14, %c4] : memref<16x6xf32, #tpu.memory_space<vmem>>, vector<16x1xf32>
    %c0_15 = arith.constant 0 : index
    %c5 = arith.constant 5 : index
    %10 = vector.load %arg4[%c0_15, %c5] : memref<16x6xf32, #tpu.memory_space<vmem>>, vector<16x1xf32>
    %c0_16 = arith.constant 0 : index
    %c0_17 = arith.constant 0 : index
    %11 = vector.load %arg5[%c0_16, %c0_17] : memref<16x1xf32, #tpu.memory_space<vmem>>, vector<16x1xf32>
    %12 = vector.broadcast %2 : vector<8x1xf32> to vector<8x256xf32>
    %13 = arith.mulf %12, %0 : vector<8x256xf32>
    %14 = math.sin %13 : vector<8x256xf32>
    %15 = arith.mulf %14, %14 : vector<8x256xf32>
    %16 = vector.broadcast %3 : vector<8x1xf32> to vector<8x256xf32>
    %17 = arith.mulf %16, %15 : vector<8x256xf32>
    %18 = arith.addf %0, %17 : vector<8x256xf32>
    %c0_18 = arith.constant 0 : index
    %c0_19 = arith.constant 0 : index
    %19 = vector.load %arg6[%c0_18, %c0_19] : memref<8x9xf32, #tpu.memory_space<vmem>>, vector<8x9xf32>
    %c17_i32 = arith.constant 17 : i32
    %20 = tpu.dynamic_rotate %18 by %c17_i32 dim 1 : vector<8x256xf32>, i32 -> vector<8x256xf32>
    %21 = vector.extract_strided_slice %1 {offsets = [0, 0], sizes = [1, 256], strides = [1, 1]} : vector<9x256xf32> to vector<1x256xf32>
    %22 = vector.broadcast %21 : vector<1x256xf32> to vector<8x256xf32>
    %23 = arith.mulf %20, %22 : vector<8x256xf32>
    %24 = vector.extract_strided_slice %19 {offsets = [0, 0], sizes = [8, 1], strides = [1, 1]} : vector<8x9xf32> to vector<8x1xf32>
    %25 = vector.broadcast %24 : vector<8x1xf32> to vector<8x256xf32>
    %26 = arith.mulf %23, %25 : vector<8x256xf32>
    %c16_i32 = arith.constant 16 : i32
    %27 = tpu.dynamic_rotate %18 by %c16_i32 dim 1 : vector<8x256xf32>, i32 -> vector<8x256xf32>
    %28 = vector.extract_strided_slice %1 {offsets = [1, 0], sizes = [1, 256], strides = [1, 1]} : vector<9x256xf32> to vector<1x256xf32>
    %29 = vector.broadcast %28 : vector<1x256xf32> to vector<8x256xf32>
    %30 = arith.mulf %27, %29 : vector<8x256xf32>
    %31 = vector.extract_strided_slice %19 {offsets = [0, 1], sizes = [8, 1], strides = [1, 1]} : vector<8x9xf32> to vector<8x1xf32>
    %32 = vector.broadcast %31 : vector<8x1xf32> to vector<8x256xf32>
    %33 = arith.mulf %30, %32 : vector<8x256xf32>
    %34 = arith.addf %26, %33 : vector<8x256xf32>
    %c15_i32 = arith.constant 15 : i32
    %35 = tpu.dynamic_rotate %18 by %c15_i32 dim 1 : vector<8x256xf32>, i32 -> vector<8x256xf32>
    %36 = vector.extract_strided_slice %1 {offsets = [2, 0], sizes = [1, 256], strides = [1, 1]} : vector<9x256xf32> to vector<1x256xf32>
    %37 = vector.broadcast %36 : vector<1x256xf32> to vector<8x256xf32>
    %38 = arith.mulf %35, %37 : vector<8x256xf32>
    %39 = vector.extract_strided_slice %19 {offsets = [0, 2], sizes = [8, 1], strides = [1, 1]} : vector<8x9xf32> to vector<8x1xf32>
    %40 = vector.broadcast %39 : vector<8x1xf32> to vector<8x256xf32>
    %41 = arith.mulf %38, %40 : vector<8x256xf32>
    %42 = arith.addf %34, %41 : vector<8x256xf32>
    %c1_i32 = arith.constant 1 : i32
    %43 = tpu.dynamic_rotate %18 by %c1_i32 dim 1 : vector<8x256xf32>, i32 -> vector<8x256xf32>
    %44 = vector.extract_strided_slice %1 {offsets = [3, 0], sizes = [1, 256], strides = [1, 1]} : vector<9x256xf32> to vector<1x256xf32>
    %45 = vector.broadcast %44 : vector<1x256xf32> to vector<8x256xf32>
    %46 = arith.mulf %43, %45 : vector<8x256xf32>
    %47 = vector.extract_strided_slice %19 {offsets = [0, 3], sizes = [8, 1], strides = [1, 1]} : vector<8x9xf32> to vector<8x1xf32>
    %48 = vector.broadcast %47 : vector<8x1xf32> to vector<8x256xf32>
    %49 = arith.mulf %46, %48 : vector<8x256xf32>
    %50 = arith.addf %42, %49 : vector<8x256xf32>
    %51 = vector.extract_strided_slice %19 {offsets = [0, 4], sizes = [8, 1], strides = [1, 1]} : vector<8x9xf32> to vector<8x1xf32>
    %52 = vector.broadcast %51 : vector<8x1xf32> to vector<8x256xf32>
    %53 = arith.mulf %18, %52 : vector<8x256xf32>
    %54 = arith.addf %50, %53 : vector<8x256xf32>
    %c255_i32 = arith.constant 255 : i32
    %55 = tpu.dynamic_rotate %18 by %c255_i32 dim 1 : vector<8x256xf32>, i32 -> vector<8x256xf32>
    %56 = vector.extract_strided_slice %1 {offsets = [5, 0], sizes = [1, 256], strides = [1, 1]} : vector<9x256xf32> to vector<1x256xf32>
    %57 = vector.broadcast %56 : vector<1x256xf32> to vector<8x256xf32>
    %58 = arith.mulf %55, %57 : vector<8x256xf32>
    %59 = vector.extract_strided_slice %19 {offsets = [0, 5], sizes = [8, 1], strides = [1, 1]} : vector<8x9xf32> to vector<8x1xf32>
    %60 = vector.broadcast %59 : vector<8x1xf32> to vector<8x256xf32>
    %61 = arith.mulf %58, %60 : vector<8x256xf32>
    %62 = arith.addf %54, %61 : vector<8x256xf32>
    %c241_i32 = arith.constant 241 : i32
    %63 = tpu.dynamic_rotate %18 by %c241_i32 dim 1 : vector<8x256xf32>, i32 -> vector<8x256xf32>
    %64 = vector.extract_strided_slice %1 {offsets = [6, 0], sizes = [1, 256], strides = [1, 1]} : vector<9x256xf32> to vector<1x256xf32>
    %65 = vector.broadcast %64 : vector<1x256xf32> to vector<8x256xf32>
    %66 = arith.mulf %63, %65 : vector<8x256xf32>
    %67 = vector.extract_strided_slice %19 {offsets = [0, 6], sizes = [8, 1], strides = [1, 1]} : vector<8x9xf32> to vector<8x1xf32>
    %68 = vector.broadcast %67 : vector<8x1xf32> to vector<8x256xf32>
    %69 = arith.mulf %66, %68 : vector<8x256xf32>
    %70 = arith.addf %62, %69 : vector<8x256xf32>
    %c240_i32 = arith.constant 240 : i32
    %71 = tpu.dynamic_rotate %18 by %c240_i32 dim 1 : vector<8x256xf32>, i32 -> vector<8x256xf32>
    %72 = vector.extract_strided_slice %1 {offsets = [7, 0], sizes = [1, 256], strides = [1, 1]} : vector<9x256xf32> to vector<1x256xf32>
    %73 = vector.broadcast %72 : vector<1x256xf32> to vector<8x256xf32>
    %74 = arith.mulf %71, %73 : vector<8x256xf32>
    %75 = vector.extract_strided_slice %19 {offsets = [0, 7], sizes = [8, 1], strides = [1, 1]} : vector<8x9xf32> to vector<8x1xf32>
    %76 = vector.broadcast %75 : vector<8x1xf32> to vector<8x256xf32>
    %77 = arith.mulf %74, %76 : vector<8x256xf32>
    %78 = arith.addf %70, %77 : vector<8x256xf32>
    %c239_i32 = arith.constant 239 : i32
    %79 = tpu.dynamic_rotate %18 by %c239_i32 dim 1 : vector<8x256xf32>, i32 -> vector<8x256xf32>
    %80 = vector.extract_strided_slice %1 {offsets = [8, 0], sizes = [1, 256], strides = [1, 1]} : vector<9x256xf32> to vector<1x256xf32>
    %81 = vector.broadcast %80 : vector<1x256xf32> to vector<8x256xf32>
    %82 = arith.mulf %79, %81 : vector<8x256xf32>
    %83 = vector.extract_strided_slice %19 {offsets = [0, 8], sizes = [8, 1], strides = [1, 1]} : vector<8x9xf32> to vector<8x1xf32>
    %84 = vector.broadcast %83 : vector<8x1xf32> to vector<8x256xf32>
    %85 = arith.mulf %82, %84 : vector<8x256xf32>
    %86 = arith.addf %78, %85 : vector<8x256xf32>
    %87 = vector.broadcast %4 : vector<8x1xf32> to vector<8x256xf32>
    %88 = arith.addf %86, %87 : vector<8x256xf32>
    %c0_20 = arith.constant 0 : index
    %c0_21 = arith.constant 0 : index
    %89 = vector.load %arg8[%c0_20, %c0_21] : memref<16x8xf32, #tpu.memory_space<vmem>>, vector<16x8xf32>
    %90 = vector.extract_strided_slice %89 {offsets = [0, 0], sizes = [16, 1], strides = [1, 1]} : vector<16x8xf32> to vector<16x1xf32>
    %91 = vector.extract_strided_slice %88 {offsets = [0, 0], sizes = [1, 256], strides = [1, 1]} : vector<8x256xf32> to vector<1x256xf32>
    %92 = vector.broadcast %90 : vector<16x1xf32> to vector<16x256xf32>
    %93 = vector.broadcast %91 : vector<1x256xf32> to vector<16x256xf32>
    %94 = arith.mulf %92, %93 : vector<16x256xf32>
    %95 = vector.extract_strided_slice %89 {offsets = [0, 1], sizes = [16, 1], strides = [1, 1]} : vector<16x8xf32> to vector<16x1xf32>
    %96 = vector.extract_strided_slice %88 {offsets = [1, 0], sizes = [1, 256], strides = [1, 1]} : vector<8x256xf32> to vector<1x256xf32>
    %97 = vector.broadcast %95 : vector<16x1xf32> to vector<16x256xf32>
    %98 = vector.broadcast %96 : vector<1x256xf32> to vector<16x256xf32>
    %99 = arith.mulf %97, %98 : vector<16x256xf32>
    %100 = arith.addf %94, %99 : vector<16x256xf32>
    %101 = vector.extract_strided_slice %89 {offsets = [0, 2], sizes = [16, 1], strides = [1, 1]} : vector<16x8xf32> to vector<16x1xf32>
    %102 = vector.extract_strided_slice %88 {offsets = [2, 0], sizes = [1, 256], strides = [1, 1]} : vector<8x256xf32> to vector<1x256xf32>
    %103 = vector.broadcast %101 : vector<16x1xf32> to vector<16x256xf32>
    %104 = vector.broadcast %102 : vector<1x256xf32> to vector<16x256xf32>
    %105 = arith.mulf %103, %104 : vector<16x256xf32>
    %106 = arith.addf %100, %105 : vector<16x256xf32>
    %107 = vector.extract_strided_slice %89 {offsets = [0, 3], sizes = [16, 1], strides = [1, 1]} : vector<16x8xf32> to vector<16x1xf32>
    %108 = vector.extract_strided_slice %88 {offsets = [3, 0], sizes = [1, 256], strides = [1, 1]} : vector<8x256xf32> to vector<1x256xf32>
    %109 = vector.broadcast %107 : vector<16x1xf32> to vector<16x256xf32>
    %110 = vector.broadcast %108 : vector<1x256xf32> to vector<16x256xf32>
    %111 = arith.mulf %109, %110 : vector<16x256xf32>
    %112 = arith.addf %106, %111 : vector<16x256xf32>
    %113 = vector.extract_strided_slice %89 {offsets = [0, 4], sizes = [16, 1], strides = [1, 1]} : vector<16x8xf32> to vector<16x1xf32>
    %114 = vector.extract_strided_slice %88 {offsets = [4, 0], sizes = [1, 256], strides = [1, 1]} : vector<8x256xf32> to vector<1x256xf32>
    %115 = vector.broadcast %113 : vector<16x1xf32> to vector<16x256xf32>
    %116 = vector.broadcast %114 : vector<1x256xf32> to vector<16x256xf32>
    %117 = arith.mulf %115, %116 : vector<16x256xf32>
    %118 = arith.addf %112, %117 : vector<16x256xf32>
    %119 = vector.extract_strided_slice %89 {offsets = [0, 5], sizes = [16, 1], strides = [1, 1]} : vector<16x8xf32> to vector<16x1xf32>
    %120 = vector.extract_strided_slice %88 {offsets = [5, 0], sizes = [1, 256], strides = [1, 1]} : vector<8x256xf32> to vector<1x256xf32>
    %121 = vector.broadcast %119 : vector<16x1xf32> to vector<16x256xf32>
    %122 = vector.broadcast %120 : vector<1x256xf32> to vector<16x256xf32>
    %123 = arith.mulf %121, %122 : vector<16x256xf32>
    %124 = arith.addf %118, %123 : vector<16x256xf32>
    %125 = vector.extract_strided_slice %89 {offsets = [0, 6], sizes = [16, 1], strides = [1, 1]} : vector<16x8xf32> to vector<16x1xf32>
    %126 = vector.extract_strided_slice %88 {offsets = [6, 0], sizes = [1, 256], strides = [1, 1]} : vector<8x256xf32> to vector<1x256xf32>
    %127 = vector.broadcast %125 : vector<16x1xf32> to vector<16x256xf32>
    %128 = vector.broadcast %126 : vector<1x256xf32> to vector<16x256xf32>
    %129 = arith.mulf %127, %128 : vector<16x256xf32>
    %130 = arith.addf %124, %129 : vector<16x256xf32>
    %131 = vector.extract_strided_slice %89 {offsets = [0, 7], sizes = [16, 1], strides = [1, 1]} : vector<16x8xf32> to vector<16x1xf32>
    %132 = vector.extract_strided_slice %88 {offsets = [7, 0], sizes = [1, 256], strides = [1, 1]} : vector<8x256xf32> to vector<1x256xf32>
    %133 = vector.broadcast %131 : vector<16x1xf32> to vector<16x256xf32>
    %134 = vector.broadcast %132 : vector<1x256xf32> to vector<16x256xf32>
    %135 = arith.mulf %133, %134 : vector<16x256xf32>
    %136 = arith.addf %130, %135 : vector<16x256xf32>
    %137 = vector.broadcast %5 : vector<16x1xf32> to vector<16x256xf32>
    %138 = arith.addf %136, %137 : vector<16x256xf32>
    %139 = vector.broadcast %6 : vector<16x1xf32> to vector<16x256xf32>
    %140 = arith.mulf %138, %139 : vector<16x256xf32>
    %141 = vector.broadcast %7 : vector<16x1xf32> to vector<16x256xf32>
    %142 = arith.addf %140, %141 : vector<16x256xf32>
    %143 = vector.broadcast %8 : vector<16x1xf32> to vector<16x256xf32>
    %144 = arith.mulf %143, %142 : vector<16x256xf32>
    %145 = math.sin %144 : vector<16x256xf32>
    %146 = arith.mulf %145, %145 : vector<16x256xf32>
    %147 = vector.broadcast %9 : vector<16x1xf32> to vector<16x256xf32>
    %148 = arith.mulf %147, %146 : vector<16x256xf32>
    %149 = arith.addf %142, %148 : vector<16x256xf32>
    %c0_22 = arith.constant 0 : index
    %c0_23 = arith.constant 0 : index
    %150 = vector.load %arg7[%c0_22, %c0_23] : memref<16x9xf32, #tpu.memory_space<vmem>>, vector<16x9xf32>
    %c17_i32_24 = arith.constant 17 : i32
    %151 = tpu.dynamic_rotate %149 by %c17_i32_24 dim 1 : vector<16x256xf32>, i32 -> vector<16x256xf32>
    %152 = vector.extract_strided_slice %1 {offsets = [0, 0], sizes = [1, 256], strides = [1, 1]} : vector<9x256xf32> to vector<1x256xf32>
    %153 = vector.broadcast %152 : vector<1x256xf32> to vector<16x256xf32>
    %154 = arith.mulf %151, %153 : vector<16x256xf32>
    %155 = vector.extract_strided_slice %150 {offsets = [0, 0], sizes = [16, 1], strides = [1, 1]} : vector<16x9xf32> to vector<16x1xf32>
    %156 = vector.broadcast %155 : vector<16x1xf32> to vector<16x256xf32>
    %157 = arith.mulf %154, %156 : vector<16x256xf32>
    %c16_i32_25 = arith.constant 16 : i32
    %158 = tpu.dynamic_rotate %149 by %c16_i32_25 dim 1 : vector<16x256xf32>, i32 -> vector<16x256xf32>
    %159 = vector.extract_strided_slice %1 {offsets = [1, 0], sizes = [1, 256], strides = [1, 1]} : vector<9x256xf32> to vector<1x256xf32>
    %160 = vector.broadcast %159 : vector<1x256xf32> to vector<16x256xf32>
    %161 = arith.mulf %158, %160 : vector<16x256xf32>
    %162 = vector.extract_strided_slice %150 {offsets = [0, 1], sizes = [16, 1], strides = [1, 1]} : vector<16x9xf32> to vector<16x1xf32>
    %163 = vector.broadcast %162 : vector<16x1xf32> to vector<16x256xf32>
    %164 = arith.mulf %161, %163 : vector<16x256xf32>
    %165 = arith.addf %157, %164 : vector<16x256xf32>
    %c15_i32_26 = arith.constant 15 : i32
    %166 = tpu.dynamic_rotate %149 by %c15_i32_26 dim 1 : vector<16x256xf32>, i32 -> vector<16x256xf32>
    %167 = vector.extract_strided_slice %1 {offsets = [2, 0], sizes = [1, 256], strides = [1, 1]} : vector<9x256xf32> to vector<1x256xf32>
    %168 = vector.broadcast %167 : vector<1x256xf32> to vector<16x256xf32>
    %169 = arith.mulf %166, %168 : vector<16x256xf32>
    %170 = vector.extract_strided_slice %150 {offsets = [0, 2], sizes = [16, 1], strides = [1, 1]} : vector<16x9xf32> to vector<16x1xf32>
    %171 = vector.broadcast %170 : vector<16x1xf32> to vector<16x256xf32>
    %172 = arith.mulf %169, %171 : vector<16x256xf32>
    %173 = arith.addf %165, %172 : vector<16x256xf32>
    %c1_i32_27 = arith.constant 1 : i32
    %174 = tpu.dynamic_rotate %149 by %c1_i32_27 dim 1 : vector<16x256xf32>, i32 -> vector<16x256xf32>
    %175 = vector.extract_strided_slice %1 {offsets = [3, 0], sizes = [1, 256], strides = [1, 1]} : vector<9x256xf32> to vector<1x256xf32>
    %176 = vector.broadcast %175 : vector<1x256xf32> to vector<16x256xf32>
    %177 = arith.mulf %174, %176 : vector<16x256xf32>
    %178 = vector.extract_strided_slice %150 {offsets = [0, 3], sizes = [16, 1], strides = [1, 1]} : vector<16x9xf32> to vector<16x1xf32>
    %179 = vector.broadcast %178 : vector<16x1xf32> to vector<16x256xf32>
    %180 = arith.mulf %177, %179 : vector<16x256xf32>
    %181 = arith.addf %173, %180 : vector<16x256xf32>
    %182 = vector.extract_strided_slice %150 {offsets = [0, 4], sizes = [16, 1], strides = [1, 1]} : vector<16x9xf32> to vector<16x1xf32>
    %183 = vector.broadcast %182 : vector<16x1xf32> to vector<16x256xf32>
    %184 = arith.mulf %149, %183 : vector<16x256xf32>
    %185 = arith.addf %181, %184 : vector<16x256xf32>
    %c255_i32_28 = arith.constant 255 : i32
    %186 = tpu.dynamic_rotate %149 by %c255_i32_28 dim 1 : vector<16x256xf32>, i32 -> vector<16x256xf32>
    %187 = vector.extract_strided_slice %1 {offsets = [5, 0], sizes = [1, 256], strides = [1, 1]} : vector<9x256xf32> to vector<1x256xf32>
    %188 = vector.broadcast %187 : vector<1x256xf32> to vector<16x256xf32>
    %189 = arith.mulf %186, %188 : vector<16x256xf32>
    %190 = vector.extract_strided_slice %150 {offsets = [0, 5], sizes = [16, 1], strides = [1, 1]} : vector<16x9xf32> to vector<16x1xf32>
    %191 = vector.broadcast %190 : vector<16x1xf32> to vector<16x256xf32>
    %192 = arith.mulf %189, %191 : vector<16x256xf32>
    %193 = arith.addf %185, %192 : vector<16x256xf32>
    %c241_i32_29 = arith.constant 241 : i32
    %194 = tpu.dynamic_rotate %149 by %c241_i32_29 dim 1 : vector<16x256xf32>, i32 -> vector<16x256xf32>
    %195 = vector.extract_strided_slice %1 {offsets = [6, 0], sizes = [1, 256], strides = [1, 1]} : vector<9x256xf32> to vector<1x256xf32>
    %196 = vector.broadcast %195 : vector<1x256xf32> to vector<16x256xf32>
    %197 = arith.mulf %194, %196 : vector<16x256xf32>
    %198 = vector.extract_strided_slice %150 {offsets = [0, 6], sizes = [16, 1], strides = [1, 1]} : vector<16x9xf32> to vector<16x1xf32>
    %199 = vector.broadcast %198 : vector<16x1xf32> to vector<16x256xf32>
    %200 = arith.mulf %197, %199 : vector<16x256xf32>
    %201 = arith.addf %193, %200 : vector<16x256xf32>
    %c240_i32_30 = arith.constant 240 : i32
    %202 = tpu.dynamic_rotate %149 by %c240_i32_30 dim 1 : vector<16x256xf32>, i32 -> vector<16x256xf32>
    %203 = vector.extract_strided_slice %1 {offsets = [7, 0], sizes = [1, 256], strides = [1, 1]} : vector<9x256xf32> to vector<1x256xf32>
    %204 = vector.broadcast %203 : vector<1x256xf32> to vector<16x256xf32>
    %205 = arith.mulf %202, %204 : vector<16x256xf32>
    %206 = vector.extract_strided_slice %150 {offsets = [0, 7], sizes = [16, 1], strides = [1, 1]} : vector<16x9xf32> to vector<16x1xf32>
    %207 = vector.broadcast %206 : vector<16x1xf32> to vector<16x256xf32>
    %208 = arith.mulf %205, %207 : vector<16x256xf32>
    %209 = arith.addf %201, %208 : vector<16x256xf32>
    %c239_i32_31 = arith.constant 239 : i32
    %210 = tpu.dynamic_rotate %149 by %c239_i32_31 dim 1 : vector<16x256xf32>, i32 -> vector<16x256xf32>
    %211 = vector.extract_strided_slice %1 {offsets = [8, 0], sizes = [1, 256], strides = [1, 1]} : vector<9x256xf32> to vector<1x256xf32>
    %212 = vector.broadcast %211 : vector<1x256xf32> to vector<16x256xf32>
    %213 = arith.mulf %210, %212 : vector<16x256xf32>
    %214 = vector.extract_strided_slice %150 {offsets = [0, 8], sizes = [16, 1], strides = [1, 1]} : vector<16x9xf32> to vector<16x1xf32>
    %215 = vector.broadcast %214 : vector<16x1xf32> to vector<16x256xf32>
    %216 = arith.mulf %213, %215 : vector<16x256xf32>
    %217 = arith.addf %209, %216 : vector<16x256xf32>
    %218 = vector.broadcast %10 : vector<16x1xf32> to vector<16x256xf32>
    %219 = arith.addf %217, %218 : vector<16x256xf32>
    %c0_32 = arith.constant 0 : index
    %c0_33 = arith.constant 0 : index
    %220 = vector.load %arg9[%c0_32, %c0_33] : memref<16x24xf32, #tpu.memory_space<vmem>>, vector<16x24xf32>
    %221 = vector.extract_strided_slice %220 {offsets = [0, 0], sizes = [16, 1], strides = [1, 1]} : vector<16x24xf32> to vector<16x1xf32>
    %222 = vector.extract_strided_slice %219 {offsets = [0, 0], sizes = [1, 256], strides = [1, 1]} : vector<16x256xf32> to vector<1x256xf32>
    %223 = vector.broadcast %221 : vector<16x1xf32> to vector<16x256xf32>
    %224 = vector.broadcast %222 : vector<1x256xf32> to vector<16x256xf32>
    %225 = arith.mulf %223, %224 : vector<16x256xf32>
    %226 = vector.extract_strided_slice %220 {offsets = [0, 1], sizes = [16, 1], strides = [1, 1]} : vector<16x24xf32> to vector<16x1xf32>
    %227 = vector.extract_strided_slice %219 {offsets = [1, 0], sizes = [1, 256], strides = [1, 1]} : vector<16x256xf32> to vector<1x256xf32>
    %228 = vector.broadcast %226 : vector<16x1xf32> to vector<16x256xf32>
    %229 = vector.broadcast %227 : vector<1x256xf32> to vector<16x256xf32>
    %230 = arith.mulf %228, %229 : vector<16x256xf32>
    %231 = arith.addf %225, %230 : vector<16x256xf32>
    %232 = vector.extract_strided_slice %220 {offsets = [0, 2], sizes = [16, 1], strides = [1, 1]} : vector<16x24xf32> to vector<16x1xf32>
    %233 = vector.extract_strided_slice %219 {offsets = [2, 0], sizes = [1, 256], strides = [1, 1]} : vector<16x256xf32> to vector<1x256xf32>
    %234 = vector.broadcast %232 : vector<16x1xf32> to vector<16x256xf32>
    %235 = vector.broadcast %233 : vector<1x256xf32> to vector<16x256xf32>
    %236 = arith.mulf %234, %235 : vector<16x256xf32>
    %237 = arith.addf %231, %236 : vector<16x256xf32>
    %238 = vector.extract_strided_slice %220 {offsets = [0, 3], sizes = [16, 1], strides = [1, 1]} : vector<16x24xf32> to vector<16x1xf32>
    %239 = vector.extract_strided_slice %219 {offsets = [3, 0], sizes = [1, 256], strides = [1, 1]} : vector<16x256xf32> to vector<1x256xf32>
    %240 = vector.broadcast %238 : vector<16x1xf32> to vector<16x256xf32>
    %241 = vector.broadcast %239 : vector<1x256xf32> to vector<16x256xf32>
    %242 = arith.mulf %240, %241 : vector<16x256xf32>
    %243 = arith.addf %237, %242 : vector<16x256xf32>
    %244 = vector.extract_strided_slice %220 {offsets = [0, 4], sizes = [16, 1], strides = [1, 1]} : vector<16x24xf32> to vector<16x1xf32>
    %245 = vector.extract_strided_slice %219 {offsets = [4, 0], sizes = [1, 256], strides = [1, 1]} : vector<16x256xf32> to vector<1x256xf32>
    %246 = vector.broadcast %244 : vector<16x1xf32> to vector<16x256xf32>
    %247 = vector.broadcast %245 : vector<1x256xf32> to vector<16x256xf32>
    %248 = arith.mulf %246, %247 : vector<16x256xf32>
    %249 = arith.addf %243, %248 : vector<16x256xf32>
    %250 = vector.extract_strided_slice %220 {offsets = [0, 5], sizes = [16, 1], strides = [1, 1]} : vector<16x24xf32> to vector<16x1xf32>
    %251 = vector.extract_strided_slice %219 {offsets = [5, 0], sizes = [1, 256], strides = [1, 1]} : vector<16x256xf32> to vector<1x256xf32>
    %252 = vector.broadcast %250 : vector<16x1xf32> to vector<16x256xf32>
    %253 = vector.broadcast %251 : vector<1x256xf32> to vector<16x256xf32>
    %254 = arith.mulf %252, %253 : vector<16x256xf32>
    %255 = arith.addf %249, %254 : vector<16x256xf32>
    %256 = vector.extract_strided_slice %220 {offsets = [0, 6], sizes = [16, 1], strides = [1, 1]} : vector<16x24xf32> to vector<16x1xf32>
    %257 = vector.extract_strided_slice %219 {offsets = [6, 0], sizes = [1, 256], strides = [1, 1]} : vector<16x256xf32> to vector<1x256xf32>
    %258 = vector.broadcast %256 : vector<16x1xf32> to vector<16x256xf32>
    %259 = vector.broadcast %257 : vector<1x256xf32> to vector<16x256xf32>
    %260 = arith.mulf %258, %259 : vector<16x256xf32>
    %261 = arith.addf %255, %260 : vector<16x256xf32>
    %262 = vector.extract_strided_slice %220 {offsets = [0, 7], sizes = [16, 1], strides = [1, 1]} : vector<16x24xf32> to vector<16x1xf32>
    %263 = vector.extract_strided_slice %219 {offsets = [7, 0], sizes = [1, 256], strides = [1, 1]} : vector<16x256xf32> to vector<1x256xf32>
    %264 = vector.broadcast %262 : vector<16x1xf32> to vector<16x256xf32>
    %265 = vector.broadcast %263 : vector<1x256xf32> to vector<16x256xf32>
    %266 = arith.mulf %264, %265 : vector<16x256xf32>
    %267 = arith.addf %261, %266 : vector<16x256xf32>
    %268 = vector.extract_strided_slice %220 {offsets = [0, 8], sizes = [16, 1], strides = [1, 1]} : vector<16x24xf32> to vector<16x1xf32>
    %269 = vector.extract_strided_slice %219 {offsets = [8, 0], sizes = [1, 256], strides = [1, 1]} : vector<16x256xf32> to vector<1x256xf32>
    %270 = vector.broadcast %268 : vector<16x1xf32> to vector<16x256xf32>
    %271 = vector.broadcast %269 : vector<1x256xf32> to vector<16x256xf32>
    %272 = arith.mulf %270, %271 : vector<16x256xf32>
    %273 = arith.addf %267, %272 : vector<16x256xf32>
    %274 = vector.extract_strided_slice %220 {offsets = [0, 9], sizes = [16, 1], strides = [1, 1]} : vector<16x24xf32> to vector<16x1xf32>
    %275 = vector.extract_strided_slice %219 {offsets = [9, 0], sizes = [1, 256], strides = [1, 1]} : vector<16x256xf32> to vector<1x256xf32>
    %276 = vector.broadcast %274 : vector<16x1xf32> to vector<16x256xf32>
    %277 = vector.broadcast %275 : vector<1x256xf32> to vector<16x256xf32>
    %278 = arith.mulf %276, %277 : vector<16x256xf32>
    %279 = arith.addf %273, %278 : vector<16x256xf32>
    %280 = vector.extract_strided_slice %220 {offsets = [0, 10], sizes = [16, 1], strides = [1, 1]} : vector<16x24xf32> to vector<16x1xf32>
    %281 = vector.extract_strided_slice %219 {offsets = [10, 0], sizes = [1, 256], strides = [1, 1]} : vector<16x256xf32> to vector<1x256xf32>
    %282 = vector.broadcast %280 : vector<16x1xf32> to vector<16x256xf32>
    %283 = vector.broadcast %281 : vector<1x256xf32> to vector<16x256xf32>
    %284 = arith.mulf %282, %283 : vector<16x256xf32>
    %285 = arith.addf %279, %284 : vector<16x256xf32>
    %286 = vector.extract_strided_slice %220 {offsets = [0, 11], sizes = [16, 1], strides = [1, 1]} : vector<16x24xf32> to vector<16x1xf32>
    %287 = vector.extract_strided_slice %219 {offsets = [11, 0], sizes = [1, 256], strides = [1, 1]} : vector<16x256xf32> to vector<1x256xf32>
    %288 = vector.broadcast %286 : vector<16x1xf32> to vector<16x256xf32>
    %289 = vector.broadcast %287 : vector<1x256xf32> to vector<16x256xf32>
    %290 = arith.mulf %288, %289 : vector<16x256xf32>
    %291 = arith.addf %285, %290 : vector<16x256xf32>
    %292 = vector.extract_strided_slice %220 {offsets = [0, 12], sizes = [16, 1], strides = [1, 1]} : vector<16x24xf32> to vector<16x1xf32>
    %293 = vector.extract_strided_slice %219 {offsets = [12, 0], sizes = [1, 256], strides = [1, 1]} : vector<16x256xf32> to vector<1x256xf32>
    %294 = vector.broadcast %292 : vector<16x1xf32> to vector<16x256xf32>
    %295 = vector.broadcast %293 : vector<1x256xf32> to vector<16x256xf32>
    %296 = arith.mulf %294, %295 : vector<16x256xf32>
    %297 = arith.addf %291, %296 : vector<16x256xf32>
    %298 = vector.extract_strided_slice %220 {offsets = [0, 13], sizes = [16, 1], strides = [1, 1]} : vector<16x24xf32> to vector<16x1xf32>
    %299 = vector.extract_strided_slice %219 {offsets = [13, 0], sizes = [1, 256], strides = [1, 1]} : vector<16x256xf32> to vector<1x256xf32>
    %300 = vector.broadcast %298 : vector<16x1xf32> to vector<16x256xf32>
    %301 = vector.broadcast %299 : vector<1x256xf32> to vector<16x256xf32>
    %302 = arith.mulf %300, %301 : vector<16x256xf32>
    %303 = arith.addf %297, %302 : vector<16x256xf32>
    %304 = vector.extract_strided_slice %220 {offsets = [0, 14], sizes = [16, 1], strides = [1, 1]} : vector<16x24xf32> to vector<16x1xf32>
    %305 = vector.extract_strided_slice %219 {offsets = [14, 0], sizes = [1, 256], strides = [1, 1]} : vector<16x256xf32> to vector<1x256xf32>
    %306 = vector.broadcast %304 : vector<16x1xf32> to vector<16x256xf32>
    %307 = vector.broadcast %305 : vector<1x256xf32> to vector<16x256xf32>
    %308 = arith.mulf %306, %307 : vector<16x256xf32>
    %309 = arith.addf %303, %308 : vector<16x256xf32>
    %310 = vector.extract_strided_slice %220 {offsets = [0, 15], sizes = [16, 1], strides = [1, 1]} : vector<16x24xf32> to vector<16x1xf32>
    %311 = vector.extract_strided_slice %219 {offsets = [15, 0], sizes = [1, 256], strides = [1, 1]} : vector<16x256xf32> to vector<1x256xf32>
    %312 = vector.broadcast %310 : vector<16x1xf32> to vector<16x256xf32>
    %313 = vector.broadcast %311 : vector<1x256xf32> to vector<16x256xf32>
    %314 = arith.mulf %312, %313 : vector<16x256xf32>
    %315 = arith.addf %309, %314 : vector<16x256xf32>
    %316 = vector.extract_strided_slice %220 {offsets = [0, 16], sizes = [16, 1], strides = [1, 1]} : vector<16x24xf32> to vector<16x1xf32>
    %317 = vector.extract_strided_slice %0 {offsets = [0, 0], sizes = [1, 256], strides = [1, 1]} : vector<8x256xf32> to vector<1x256xf32>
    %318 = vector.broadcast %316 : vector<16x1xf32> to vector<16x256xf32>
    %319 = vector.broadcast %317 : vector<1x256xf32> to vector<16x256xf32>
    %320 = arith.mulf %318, %319 : vector<16x256xf32>
    %321 = arith.addf %315, %320 : vector<16x256xf32>
    %322 = vector.extract_strided_slice %220 {offsets = [0, 17], sizes = [16, 1], strides = [1, 1]} : vector<16x24xf32> to vector<16x1xf32>
    %323 = vector.extract_strided_slice %0 {offsets = [1, 0], sizes = [1, 256], strides = [1, 1]} : vector<8x256xf32> to vector<1x256xf32>
    %324 = vector.broadcast %322 : vector<16x1xf32> to vector<16x256xf32>
    %325 = vector.broadcast %323 : vector<1x256xf32> to vector<16x256xf32>
    %326 = arith.mulf %324, %325 : vector<16x256xf32>
    %327 = arith.addf %321, %326 : vector<16x256xf32>
    %328 = vector.extract_strided_slice %220 {offsets = [0, 18], sizes = [16, 1], strides = [1, 1]} : vector<16x24xf32> to vector<16x1xf32>
    %329 = vector.extract_strided_slice %0 {offsets = [2, 0], sizes = [1, 256], strides = [1, 1]} : vector<8x256xf32> to vector<1x256xf32>
    %330 = vector.broadcast %328 : vector<16x1xf32> to vector<16x256xf32>
    %331 = vector.broadcast %329 : vector<1x256xf32> to vector<16x256xf32>
    %332 = arith.mulf %330, %331 : vector<16x256xf32>
    %333 = arith.addf %327, %332 : vector<16x256xf32>
    %334 = vector.extract_strided_slice %220 {offsets = [0, 19], sizes = [16, 1], strides = [1, 1]} : vector<16x24xf32> to vector<16x1xf32>
    %335 = vector.extract_strided_slice %0 {offsets = [3, 0], sizes = [1, 256], strides = [1, 1]} : vector<8x256xf32> to vector<1x256xf32>
    %336 = vector.broadcast %334 : vector<16x1xf32> to vector<16x256xf32>
    %337 = vector.broadcast %335 : vector<1x256xf32> to vector<16x256xf32>
    %338 = arith.mulf %336, %337 : vector<16x256xf32>
    %339 = arith.addf %333, %338 : vector<16x256xf32>
    %340 = vector.extract_strided_slice %220 {offsets = [0, 20], sizes = [16, 1], strides = [1, 1]} : vector<16x24xf32> to vector<16x1xf32>
    %341 = vector.extract_strided_slice %0 {offsets = [4, 0], sizes = [1, 256], strides = [1, 1]} : vector<8x256xf32> to vector<1x256xf32>
    %342 = vector.broadcast %340 : vector<16x1xf32> to vector<16x256xf32>
    %343 = vector.broadcast %341 : vector<1x256xf32> to vector<16x256xf32>
    %344 = arith.mulf %342, %343 : vector<16x256xf32>
    %345 = arith.addf %339, %344 : vector<16x256xf32>
    %346 = vector.extract_strided_slice %220 {offsets = [0, 21], sizes = [16, 1], strides = [1, 1]} : vector<16x24xf32> to vector<16x1xf32>
    %347 = vector.extract_strided_slice %0 {offsets = [5, 0], sizes = [1, 256], strides = [1, 1]} : vector<8x256xf32> to vector<1x256xf32>
    %348 = vector.broadcast %346 : vector<16x1xf32> to vector<16x256xf32>
    %349 = vector.broadcast %347 : vector<1x256xf32> to vector<16x256xf32>
    %350 = arith.mulf %348, %349 : vector<16x256xf32>
    %351 = arith.addf %345, %350 : vector<16x256xf32>
    %352 = vector.extract_strided_slice %220 {offsets = [0, 22], sizes = [16, 1], strides = [1, 1]} : vector<16x24xf32> to vector<16x1xf32>
    %353 = vector.extract_strided_slice %0 {offsets = [6, 0], sizes = [1, 256], strides = [1, 1]} : vector<8x256xf32> to vector<1x256xf32>
    %354 = vector.broadcast %352 : vector<16x1xf32> to vector<16x256xf32>
    %355 = vector.broadcast %353 : vector<1x256xf32> to vector<16x256xf32>
    %356 = arith.mulf %354, %355 : vector<16x256xf32>
    %357 = arith.addf %351, %356 : vector<16x256xf32>
    %358 = vector.extract_strided_slice %220 {offsets = [0, 23], sizes = [16, 1], strides = [1, 1]} : vector<16x24xf32> to vector<16x1xf32>
    %359 = vector.extract_strided_slice %0 {offsets = [7, 0], sizes = [1, 256], strides = [1, 1]} : vector<8x256xf32> to vector<1x256xf32>
    %360 = vector.broadcast %358 : vector<16x1xf32> to vector<16x256xf32>
    %361 = vector.broadcast %359 : vector<1x256xf32> to vector<16x256xf32>
    %362 = arith.mulf %360, %361 : vector<16x256xf32>
    %363 = arith.addf %357, %362 : vector<16x256xf32>
    %364 = vector.broadcast %11 : vector<16x1xf32> to vector<16x256xf32>
    %365 = arith.addf %363, %364 : vector<16x256xf32>
    %c0_34 = arith.constant 0 : index
    %c0_35 = arith.constant 0 : index
    %366 = vector.load %arg10[%c0_34, %c0_35] : memref<16x256xf32, #tpu.memory_space<vmem>>, vector<16x256xf32>
    tpu.vector_store %arg10[%c0_34, %c0_35], %365 {strides = array<i32>} : memref<16x256xf32, #tpu.memory_space<vmem>>, vector<16x256xf32>,
    return
  }
  func.func @transform_0(%arg0: i32) -> (i32, i32) {
    %c0_i32 = arith.constant 0 : i32
    %c0_i32_0 = arith.constant 0 : i32
    return %arg0, %c0_i32 : i32, i32
  }
  func.func @transform_1(%arg0: i32) -> (i32, i32) {
    %c0_i32 = arith.constant 0 : i32
    %c0_i32_0 = arith.constant 0 : i32
    %c0_i32_1 = arith.constant 0 : i32
    return %c0_i32, %c0_i32_0 : i32, i32
  }
  func.func @transform_2(%arg0: i32) -> (i32, i32) {
    %c0_i32 = arith.constant 0 : i32
    %c0_i32_0 = arith.constant 0 : i32
    %c0_i32_1 = arith.constant 0 : i32
    return %c0_i32, %c0_i32_0 : i32, i32
  }
  func.func @transform_3(%arg0: i32) -> (i32, i32) {
    %c0_i32 = arith.constant 0 : i32
    %c0_i32_0 = arith.constant 0 : i32
    %c0_i32_1 = arith.constant 0 : i32
    return %c0_i32, %c0_i32_0 : i32, i32
  }
  func.func @transform_4(%arg0: i32) -> (i32, i32) {
    %c0_i32 = arith.constant 0 : i32
    %c0_i32_0 = arith.constant 0 : i32
    %c0_i32_1 = arith.constant 0 : i32
    return %c0_i32, %c0_i32_0 : i32, i32
  }
  func.func @transform_5(%arg0: i32) -> (i32, i32) {
    %c0_i32 = arith.constant 0 : i32
    %c0_i32_0 = arith.constant 0 : i32
    %c0_i32_1 = arith.constant 0 : i32
    return %c0_i32, %c0_i32_0 : i32, i32
  }
  func.func @transform_6(%arg0: i32) -> (i32, i32) {
    %c0_i32 = arith.constant 0 : i32
    %c0_i32_0 = arith.constant 0 : i32
    %c0_i32_1 = arith.constant 0 : i32
    return %c0_i32, %c0_i32_0 : i32, i32
  }
  func.func @transform_7(%arg0: i32) -> (i32, i32) {
    %c0_i32 = arith.constant 0 : i32
    %c0_i32_0 = arith.constant 0 : i32
    %c0_i32_1 = arith.constant 0 : i32
    return %c0_i32, %c0_i32_0 : i32, i32
  }
  func.func @transform_8(%arg0: i32) -> (i32, i32) {
    %c0_i32 = arith.constant 0 : i32
    %c0_i32_0 = arith.constant 0 : i32
    %c0_i32_1 = arith.constant 0 : i32
    return %c0_i32, %c0_i32_0 : i32, i32
  }
  func.func @transform_9(%arg0: i32) -> (i32, i32) {
    %c0_i32 = arith.constant 0 : i32
    %c0_i32_0 = arith.constant 0 : i32
    return %arg0, %c0_i32 : i32, i32
  }
}

</mosaic_0001>

<bundles_post_ra>
// kernel: tpu_custom_call.1
= control target key start
LH: loop header
LB: loop body
LE: loop exit
PB: predicated region body
PF: predicated region fallthrough
CT: control target
= control target key end

     0   :  { %14 = vsyncpa [#allocation3], 0  ;;  %s4433_s0 = inlined_call_operand.vmem [shape: f32[8,256], index: 0, kind: input, shape index: {}]   ;;  %s4434_s1 = inlined_call_operand.vmem [shape: f32[9,256], index: 1, kind: input, shape index: {}]   ;;  %s4435_s2 = inlined_call_operand.vmem [shape: f32[8,3], index: 2, kind: input, shape index: {}]   ;;  %s4436_s3 = inlined_call_operand.vmem [shape: f32[16,6], index: 3, kind: input, shape index: {}]   ;;  %s4437_s4 = inlined_call_operand.vmem [shape: f32[16,1], index: 4, kind: input, shape index: {}]   ;;  %s4438_s5 = inlined_call_operand.hbm [shape: f32[8,9], index: 5, kind: input, shape index: {}]   ;;  %s4439_s6 = inlined_call_operand.vmem [shape: f32[16,9], index: 6, kind: input, shape index: {}]   ;;  %s4440_s7 = inlined_call_operand.vmem [shape: f32[16,8], index: 7, kind: input, shape index: {}]   ;;  %s4441_s8 = inlined_call_operand.vmem [shape: f32[16,24], index: 8, kind: input, shape index: {}]   ;;  %s4442_s9 = inlined_call_operand.hbm [shape: f32[16,256], index: 9, kind: output, shape index: {}]  }
   0x1   :  { %15 = vsyncpa [#allocation4], 0  ;;  %s31_s11 = sshll.u32 %s4438_s5, 4  ;;  %s2362_s12 = smov [#allocation2]   ;;  %s32_s11 = int_to_ptr.hbm [resolvable:$true] %s31_s11 }
   0x2   :  { %s33_s13 = sshll.u32 %s2362_s12, 4  ;;  %s34_s13 = int_to_ptr.vmem [resolvable:$true] %s33_s13 }
   0x3   :  { %36 = dma.hbm_to_vmem [thread:$0]  %s32_s11, 128, %s34_s13, [#allocation3]  }
   0x4   :  { %2358 = dma.done.wait [#allocation3], 128  }
   0x5   :  { %2359 = vsyncadd [#allocation3], 4294967168  ;;  %v4458_v0 = vmov 0   ;;  %v4464_v1 = vmov 5   ;;  %v53_v2 = vld [vmem:[%s4435_s2] sm:$0xff]  ;;  %v4466_v4 = vmov 6  }
   0x6   :  { %2199 = vset.pattern.permute.xlu0 %v4458_v0  ;;  %2206 = vset.pattern.permute.xlu1 %v4464_v1  ;;  %v385_v3 = vld [vmem:[#allocation2] sm:$0xff]  ;;  %v4456_v5 = vmov 1   ;;  %v4462_v6 = vmov 7   ;;  %v4470_v7 = vmov 2   ;;  %v4472_v8 = vmov 4   ;;  %v554_v11 = vld [vmem:[%s4440_s7 + $0x8] sm:$0xff] }
   0x7   :  { %2201 = vset.pattern.permute.xlu2 %v4458_v0  ;;  %60 = vperm.xlu0 %2199, %v53_v2   ;;  %v4453_v9 = vmov 8   ;;  %v4468_v10 = vmov 3   ;;  %v2480_v12 = vld [vmem:[%s4440_s7] sm:$0xff]  ;;  %v2516_v15 = vld [vmem:[%s4433_s0 + $0x8] sm:$0xff]  ;;  %v4460_v41 = vmov 683565275  }
   0x8   :  { %483 = vperm.xlu1 %2206, %v385_v3   ;;  %401 = vperm.xlu2 %2201, %v385_v3   ;;  %v2504_v13 = vld [vmem:[%s4436_s3] sm:$0xff]  ;;  %v2534_v24 = vld [vmem:[%s4436_s3 + $0x8] sm:$0xff]  ;;  %v4451_v43 = vmov 2475754826   ;;  %v4449_v46 = vmov 2131351028  }
   0x9   :  { %v2511_v14 = vld [vmem:[%s4433_s0] sm:$0xff]  ;;  %v4447_v49 = vmov 2102212464   ;;  %v4445_v52 = vmov 920167782   ;;  %s2379_s28 = smov 16  }
   0xa   :  { %v2542_v29 = vld [vmem:[%s4439_s6] sm:$0xff]  ;;  %v4443_v55 = vmov 1326507024   ;;  %s2380_s29 = smov 17   ;;  %s2381_s30 = smov 1  }
   0xb   :  { %s2382_s10 = smov 113   ;;  %s2383_s11 = smov 127  }
   0xc   :  { %s2384_s12 = smov 112   ;;  %s2385_s13 = smov 111  }
   0xd   :  { %s2127_s15 = sshll.u32 %s4442_s9, 4  ;;  %s2401_s2 = smov [#allocation5]   ;;  %s2128_s15 = int_to_ptr.hbm [resolvable:$true] %s2127_s15 }
   0xe   :  { %s2125_s5 = sshll.u32 %s2401_s2, 4  ;;  %s2402_s16 = smov 256   ;;  %s2126_s5 = int_to_ptr.vmem [resolvable:$true] %s2125_s5 }
   0xf   :  { %2200 = vset.pattern.permute.xlu0 %v4456_v5 }
  0x10   :  { %2207 = vset.pattern.permute.xlu1 %v4466_v4  ;;  %2202 = vset.pattern.permute.xlu2 %v4456_v5 }
  0x11   :  { %502 = vperm.xlu1 %2207, %v385_v3   ;;  %418 = vperm.xlu2 %2202, %v385_v3  }
  0x12   :  { %378 = vperm.xlu0 %2200, %v53_v2  }
  0x19   :  { %2208 = vset.pattern.permute.xlu1 %v4462_v6  ;;  %2203 = vset.pattern.permute.xlu2 %v4470_v7 }
  0x1a   :  { %521 = vperm.xlu1 %2208, %v385_v3   ;;  %437 = vperm.xlu2 %2203, %v385_v3  }
  0x1b   :  { %2205 = vset.pattern.permute.xlu0 %v4472_v8 }
  0x1c   :  { %464 = vperm.xlu0 %2205, %v385_v3  }
  0x22   :  { %2209 = vset.pattern.permute.xlu1 %v4453_v9  ;;  %2204 = vset.pattern.permute.xlu2 %v4468_v10 }
  0x23   :  { %540 = vperm.xlu1 %2209, %v385_v3   ;;  %456 = vperm.xlu2 %2204, %v385_v3  }
  0x24   :  { %2223 = vset.pattern.permute.xlu0 %v4462_v6 }
  0x25   :  { %684 = vperm.xlu0 %2223, %v554_v11  }
  0x2b   :  { %2211 = vset.pattern.permute.xlu1 %v4458_v0  ;;  %2210 = vset.pattern.permute.xlu2 %v4470_v7 }
  0x2c   :  { %562 = vperm.xlu1 %2211, %v554_v11   ;;  %548 = vperm.xlu2 %2210, %v53_v2  }
  0x2d   :  { %2224 = vset.pattern.permute.xlu0 %v4470_v7 }
  0x2e   :  { %594 = vperm.xlu0 %2224, %v554_v11  }
  0x34   :  { %2213 = vset.pattern.permute.xlu1 %v4456_v5  ;;  %2212 = vset.pattern.permute.xlu2 %v4456_v5 }
  0x35   :  { %576 = vperm.xlu1 %2213, %v554_v11   ;;  %572 = vperm.xlu2 %2212, %v2480_v12  }
  0x36   :  { %724 = vperm.xlu0 %2224, %v2504_v13  }
  0x3d   :  { %2215 = vset.pattern.permute.xlu1 %v4468_v10  ;;  %2214 = vset.pattern.permute.xlu2 %v4470_v7 }
  0x3e   :  { %608 = vperm.xlu1 %2215, %v2480_v12   ;;  %590 = vperm.xlu2 %2214, %v2480_v12  }
  0x3f   :  { %2229 = vset.pattern.permute.xlu0 %v4458_v0 }
  0x40   :  { %557 = vperm.xlu0 %2229, %v2480_v12  }
  0x46   :  { %2217 = vset.pattern.permute.xlu1 %v4472_v8  ;;  %2216 = vset.pattern.permute.xlu2 %v4468_v10 }
  0x47   :  { %626 = vperm.xlu1 %2217, %v2480_v12   ;;  %612 = vperm.xlu2 %2216, %v554_v11  }
  0x48   :  { %1407 = vperm.xlu0 %2229, %v2542_v29  }
  0x4f   :  { %2219 = vset.pattern.permute.xlu1 %v4464_v1  ;;  %2218 = vset.pattern.permute.xlu2 %v4472_v8 }
  0x50   :  { %648 = vperm.xlu1 %2219, %v554_v11   ;;  %630 = vperm.xlu2 %2218, %v554_v11  }
  0x51   :  { %2234 = vset.pattern.permute.xlu0 %v4464_v1 }
  0x52   :  { %644 = vperm.xlu0 %2234, %v2480_v12  }
  0x58   :  { %2221 = vset.pattern.permute.xlu1 %v4466_v4  ;;  %2220 = vset.pattern.permute.xlu2 %v4466_v4 }
  0x59   :  { %666 = vperm.xlu1 %2221, %v554_v11   ;;  %662 = vperm.xlu2 %2220, %v2480_v12  }
  0x61   :  { %2225 = vset.pattern.permute.xlu1 %v4458_v0  ;;  %2222 = vset.pattern.permute.xlu2 %v4462_v6 }
  0x62   :  { %680 = vperm.xlu2 %2222, %v2480_v12   ;;  %699 = vperm.xlu1 %2225, %v2504_v13   ;;  %v2548_v35 = vpop.permute.xlu2 %401 }
  0x6a   :  { %2226 = vset.pattern.permute.xlu2 %v4458_v0  ;;  %2227 = vset.pattern.permute.xlu1 %v4456_v5 }
  0x6b   :  { %712 = vperm.xlu1 %2227, %v2504_v13   ;;  %704 = vperm.xlu2 %2226, %v2534_v24  }
  0x73   :  { %2230 = vset.pattern.permute.xlu1 %v4470_v7  ;;  %2228 = vset.pattern.permute.xlu2 %v4456_v5 }
  0x74   :  { %728 = vperm.xlu1 %2230, %v2534_v24   ;;  %716 = vperm.xlu2 %2228, %v2534_v24  }
  0x79   :  { %v61_v16 = vpop.permute.xlu0 %60 }
  0x7a   :  { %v2523_v17 = vmul.f32 %v61_v16, %v2511_v14  ;;  %v2526_v18 = vmul.f32 %v61_v16, %v2516_v15 }
  0x7c   :  { %v68_v19 = vand.u32 2139095040, %v2523_v17  ;;  %v223_v20 = vand.u32 2139095040, %v2526_v18  ;;  %v65_v25 = vand.u32 2147483647, %v2523_v17  ;;  %v4455_v30 = vand.u32 2147483647, %v2526_v18  ;;  %2232 = vset.pattern.permute.xlu1 %v4468_v10  ;;  %2231 = vset.pattern.permute.xlu2 %v4468_v10 }
  0x7d   :  { %740 = vperm.xlu1 %2232, %v2534_v24   ;;  %736 = vperm.xlu2 %2231, %v2504_v13  }
  0x7e   :  { %v69_v21 = vshrl.u32 %v68_v19, 23  ;;  %v224_v22 = vshrl.u32 %v223_v20, 23  ;;  %v72_v31 = vand.u32 8388607, %v65_v25  ;;  %v227_v37 = vand.u32 8388607, %v4455_v30  ;;  %v2601_v19 = vpop.permute.xlu1 %483 }
  0x80   :  { %v2140_v23 = vadd.s32 4294967169, %v69_v21  ;;  %v2143_v26 = vadd.s32 4294967169, %v224_v22  ;;  %v73_v39 = vor.u32 8388608, %v72_v31  ;;  %v228_v59 = vor.u32 8388608, %v227_v37  ;;  %v2626_v31 = vld [vmem:[%s4439_s6 + $0x8] sm:$0xff]  ;;  %s2378_s6 = smov 15  }
  0x82   :  { %v75_v27 = vadd.s32 1, %v2140_v23  ;;  %v230_v28 = vadd.s32 1, %v2143_v26  ;;  %v2594_v3 = vshll.u32 %v73_v39, 8  ;;  %v2608_v21 = vshll.u32 %v228_v59, 8 }
  0x84   :  { %vm76_vm0 = vcmp.gt.s32.totalorder %v75_v27, 0  ;;  %vm231_vm1 = vcmp.gt.s32.totalorder %v230_v28, 0 }
  0x85   :  { %v77_v32 = vsel %vm76_vm0, %v75_v27, 0  ;;  %v232_v34 = vsel %vm231_vm1, %v230_v28, 0  ;;  %v2621_v28 = vpop.permute.xlu2 %418  ;;  %2235 = vset.pattern.permute.xlu1 %v4458_v0  ;;  %2233 = vset.pattern.permute.xlu2 %v4472_v8 }
  0x86   :  { %v79_v33 = vand.u32 31, %v77_v32  ;;  %v2554_v38 = vand.u32 31, %v232_v34  ;;  %v2556_v40 = vshrl.u32 %v77_v32, 5  ;;  %v2629_v32 = vand.u32 65535, %v2594_v3  ;;  %1412 = vperm.xlu1 %2235, %v2626_v31   ;;  %1372 = vperm.xlu2 %2233, %v2504_v13  }
  0x88   :  { %v2550_v36 = vsub.s32 32, %v79_v33  ;;  %v82_v42 = vshll.u32 %v4460_v41, %v79_v33  ;;  %v85_v44 = vshll.u32 %v4451_v43, %v79_v33  ;;  %v88_v48 = vshll.u32 %v4449_v46, %v79_v33 }
  0x89   :  { %v91_v51 = vshll.u32 %v4447_v49, %v79_v33  ;;  %v94_v54 = vshll.u32 %v4445_v52, %v79_v33  ;;  %v2582_v60 = vsub.s32 32, %v2554_v38  ;;  %vm97_vm2 = vcmp.lt.s32.totalorder %v2556_v40, 1 }
  0x8a   :  { %v83_v45 = vshrl.u32 %v4451_v43, %v2550_v36  ;;  %v86_v47 = vshrl.u32 %v4449_v46, %v2550_v36  ;;  %v89_v50 = vshrl.u32 %v4447_v49, %v2550_v36  ;;  %v92_v53 = vshrl.u32 %v4445_v52, %v2550_v36 }
  0x8b   :  { %v95_v56 = vshrl.u32 %v4443_v55, %v2550_v36  ;;  %vm100_vm3 = vcmp.lt.s32.totalorder %v2556_v40, 4  ;;  %vm99_vm4 = vcmp.lt.s32.totalorder %v2556_v40, 3  ;;  %vm98_vm5 = vcmp.lt.s32.totalorder %v2556_v40, 2 }
  0x8c   :  { %v2577_v57 = vor.u32 %v86_v47, %v85_v44  ;;  %v2579_v58 = vor.u32 %v89_v50, %v88_v48  ;;  %v2585_v61 = vor.u32 %v83_v45, %v82_v42  ;;  %v93_v62 = vor.u32 %v92_v53, %v91_v51 }
  0x8d   :  { %v96_v63 = vor.u32 %v95_v56, %v94_v54  ;;  %v238_v20 = vshrl.u32 %v4451_v43, %v2582_v60  ;;  %v241_v27 = vshrl.u32 %v4449_v46, %v2582_v60  ;;  %v2632_v33 = vshrl.u32 %v2594_v3, 16 }
  0x8e   :  { %v109_v2 = vsel %vm97_vm2, %v2577_v57, %v2579_v58  ;;  %v106_v11 = vsel %vm100_vm3, %v93_v62, 920167782  ;;  %v105_v22 = vsel %vm97_vm2, %v2585_v61, %v2577_v57  ;;  %v237_v39 = vshll.u32 %v4460_v41, %v2554_v38  ;;  %2236 = vset.pattern.permute.xlu1 %v4456_v5  ;;  %2237 = vset.pattern.permute.xlu2 %v4456_v5 }
  0x8f   :  { %v110_v16 = vsel %vm100_vm3, %v96_v63, 1326507024  ;;  %v107_v23 = vsel %vm99_vm4, %v2579_v58, %v106_v11  ;;  %v2637_v42 = vshrl.u32 %v232_v34, 5  ;;  %v240_v44 = vshll.u32 %v4451_v43, %v2554_v38  ;;  %1436 = vperm.xlu1 %2236, %v2542_v29   ;;  %1440 = vperm.xlu2 %2237, %v2626_v31  }
  0x90   :  { %v111_v12 = vsel %vm99_vm4, %v93_v62, %v110_v16  ;;  %v243_v45 = vshll.u32 %v4449_v46, %v2554_v38  ;;  %v244_v47 = vshrl.u32 %v4447_v49, %v2582_v60  ;;  %v108_v48 = vsel %vm98_vm5, %v105_v22, %v107_v23 }
  0x91   :  { %v112_v26 = vsel %vm98_vm5, %v109_v2, %v111_v12  ;;  %v2651_v34 = vor.u32 %v238_v20, %v237_v39  ;;  %v2654_v53 = vor.u32 %v241_v27, %v240_v44  ;;  %v246_v56 = vshll.u32 %v4447_v49, %v2554_v38  ;;  %v2690_v39 = vpop.permute.xlu1 %502 }
  0x92   :  { %v117_v37 = vshrl.u32 %v112_v26, 16  ;;  %v116_v50 = vand.u32 65535, %v112_v26  ;;  %v2656_v54 = vor.u32 %v244_v47, %v243_v45  ;;  %v247_v59 = vshrl.u32 %v4445_v52, %v2582_v60 }
  0x93   :  { %v249_v62 = vshll.u32 %v4445_v52, %v2554_v38  ;;  %v250_v63 = vshrl.u32 %v4443_v55, %v2582_v60  ;;  %v2668_v2 = vand.u32 65535, %v2608_v21  ;;  %v2671_v11 = vshrl.u32 %v2608_v21, 16 }
  0x94   :  { %v2649_v51 = vmul.u32 %v117_v37, %v2629_v32  ;;  %v81_v16 = vshrl.u32 %v4460_v41, %v2550_v36  ;;  %v139_v20 = vshrl.u32 %v108_v48, 16  ;;  %v248_v22 = vor.u32 %v247_v59, %v246_v56 }
  0x95   :  { %v118_v23 = vmul.u32 %v116_v50, %v2629_v32  ;;  %v251_v26 = vor.u32 %v250_v63, %v249_v62  ;;  %vm252_vm6 = vcmp.lt.s32.totalorder %v2637_v42, 1  ;;  %vm255_vm7 = vcmp.lt.s32.totalorder %v2637_v42, 4 }
  0x96   :  { %v122_v12 = vshll.u32 %v2649_v51, 16  ;;  %vm254_vm8 = vcmp.lt.s32.totalorder %v2637_v42, 3  ;;  %v260_v38 = vsel %vm252_vm6, %v2651_v34, %v2654_v53  ;;  %v261_v36 = vsel %vm255_vm7, %v248_v22, 920167782 }
  0x97   :  { %v264_v27 = vsel %vm252_vm6, %v2654_v53, %v2656_v54  ;;  %vm253_vm9 = vcmp.lt.s32.totalorder %v2637_v42, 2  ;;  %v262_v44 = vsel %vm254_vm8, %v2656_v54, %v261_v36  ;;  %v265_v45 = vsel %vm255_vm7, %v251_v26, 1326507024  ;;  %v2716_v26 = vpop.permute.xlu2 %437  ;;  %2238 = vset.pattern.permute.xlu1 %v4470_v7  ;;  %2239 = vset.pattern.permute.xlu2 %v4470_v7 }
  0x98   :  { %v2699_v47 = vmul.u32 %v116_v50, %v2632_v33  ;;  %v2704_v56 = vsel %vm97_vm2, %v81_v16, %v2585_v61  ;;  %vm2706_vm10 = vc.u32 %v118_v23, %v122_v12  ;;  %v2712_v62 = vsel %vm253_vm9, %v260_v38, %v262_v44  ;;  %1468 = vperm.xlu1 %2238, %v2542_v29  }
  0x99   :  { %v266_v63 = vsel %vm254_vm8, %v248_v22, %v265_v45  ;;  %v128_v50 = vadd.s32 %v122_v12, %v118_v23  ;;  %v138_v36 = vand.u32 65535, %v108_v48  ;;  %v141_v55 = vmul.u32 %v139_v20, %v2629_v32  ;;  %1472 = vperm.xlu2 %2239, %v2626_v31  }
  0x9a   :  { %v267_v61 = vsel %vm253_vm9, %v264_v27, %v266_v63  ;;  %v102_v16 = vsel %vm100_vm3, %v2579_v58, 2102212464  ;;  %v121_v38 = vmul.u32 %v117_v37, %v2632_v33  ;;  %v143_v48 = vmul.u32 %v139_v20, %v2632_v33 }
  0x9b   :  { %v271_v44 = vand.u32 65535, %v267_v61  ;;  %v272_v52 = vshrl.u32 %v267_v61, 16  ;;  %v294_v12 = vshrl.u32 %v2712_v62, 16  ;;  %v124_v22 = vshll.u32 %v2699_v47, 16 }
  0x9c   :  { %v127_v58 = vsel %vm2706_vm10, 1, %v4458_v0  ;;  %v293_v23 = vand.u32 65535, %v2712_v62  ;;  %v123_v27 = vshrl.u32 %v2649_v51, 16  ;;  %v140_v20 = vmul.u32 %v138_v36, %v2629_v32  ;;  %v2748_v32 = vpop.permute.xlu1 %521 }
  0x9d   :  { %v274_v37 = vmul.u32 %v272_v52, %v2668_v2  ;;  %v129_v45 = vadd.s32 %v127_v58, %v121_v38  ;;  %vm130_vm11 = vc.u32 %v128_v50, %v124_v22  ;;  %v142_v63 = vmul.u32 %v138_v36, %v2632_v33 }
  0x9e   :  { %v144_v61 = vshll.u32 %v141_v55, 16  ;;  %v273_v49 = vmul.u32 %v271_v44, %v2668_v2  ;;  %v131_v43 = vsel %vm130_vm11, 1, %v4458_v0  ;;  %v2743_v59 = vmul.u32 %v271_v44, %v2671_v11 }
  0x9f   :  { %v277_v46 = vshll.u32 %v274_v37, 16  ;;  %v2746_v9 = vmul.u32 %v294_v12, %v2668_v2  ;;  %v133_v62 = vadd.s32 %v131_v43, %v129_v45  ;;  %v146_v51 = vshll.u32 %v142_v63, 16  ;;  %v2753_v30 = vpop.permute.xlu2 %456 }
  0xa0   :  { %vm148_vm12 = vc.u32 %v140_v20, %v144_v61  ;;  %v150_v36 = vadd.s32 %v144_v61, %v140_v20  ;;  %v276_v38 = vmul.u32 %v272_v52, %v2671_v11  ;;  %v279_v44 = vshll.u32 %v2743_v59, 16  ;;  %2240 = vset.pattern.permute.xlu1 %v4468_v10 }
  0xa1   :  { %vm281_vm13 = vc.u32 %v273_v49, %v277_v46  ;;  %v283_v50 = vadd.s32 %v277_v46, %v273_v49  ;;  %v149_v33 = vsel %vm148_vm12, 1, %v4458_v0  ;;  %v134_v22 = vadd.s32 %v133_v62, %v123_v27  ;;  %1500 = vperm.xlu1 %2240, %v2542_v29   ;;  %2241 = vset.pattern.permute.xlu2 %v4468_v10 }
  0xa2   :  { %v151_v58 = vadd.s32 %v149_v33, %v143_v48  ;;  %v125_v43 = vshrl.u32 %v2699_v47, 16  ;;  %v145_v45 = vshrl.u32 %v141_v55, 16  ;;  %vm152_vm14 = vc.u32 %v150_v36, %v146_v51  ;;  %1504 = vperm.xlu2 %2241, %v2626_v31  }
  0xa3   :  { %v282_v46 = vsel %vm281_vm13, 1, %v4458_v0  ;;  %v153_v49 = vsel %vm152_vm14, 1, %v4458_v0  ;;  %vm285_vm15 = vc.u32 %v283_v50, %v279_v44  ;;  %v295_v48 = vmul.u32 %v293_v23, %v2668_v2 }
  0xa4   :  { %v284_v52 = vadd.s32 %v282_v46, %v276_v38  ;;  %v155_v27 = vadd.s32 %v153_v49, %v151_v58  ;;  %v286_v20 = vsel %vm285_vm15, 1, %v4458_v0  ;;  %v297_v55 = vmul.u32 %v293_v23, %v2671_v11 }
  0xa5   :  { %v299_v47 = vshll.u32 %v2746_v9, 16  ;;  %v103_v61 = vsel %vm99_vm4, %v2577_v57, %v102_v16  ;;  %v298_v62 = vmul.u32 %v294_v12, %v2671_v11  ;;  %v2770_v33 = vadd.s32 %v134_v22, %v125_v43 }
  0xa6   :  { %v288_v50 = vadd.s32 %v286_v20, %v284_v52  ;;  %v147_v38 = vshrl.u32 %v142_v63, 16  ;;  %v156_v2 = vadd.s32 %v155_v27, %v145_v45  ;;  %v278_v44 = vshrl.u32 %v274_v37, 16  ;;  %v2785_v63 = vpop.permute.xlu1 %540 }
  0xa7   :  { %vm303_vm0 = vc.u32 %v295_v48, %v299_v47  ;;  %v2772_v58 = vadd.s32 %v150_v36, %v146_v51  ;;  %v301_v46 = vshll.u32 %v297_v55, 16  ;;  %v305_v49 = vadd.s32 %v299_v47, %v295_v48  ;;  %v2798_v45 = vpop.permute.xlu2 %548 }
  0xa8   :  { %v304_v23 = vsel %vm303_vm0, 1, %v4458_v0  ;;  %v104_v5 = vsel %vm98_vm5, %v2704_v56, %v103_v61  ;;  %v157_v57 = vadd.s32 %v156_v2, %v147_v38  ;;  %v289_v16 = vadd.s32 %v288_v50, %v278_v44 }
  0xa9   :  { %v306_v11 = vadd.s32 %v304_v23, %v298_v62  ;;  %v236_v12 = vshrl.u32 %v4460_v41, %v2582_v60  ;;  %v257_v37 = vsel %vm255_vm7, %v2656_v54, 2102212464  ;;  %vm160_vm1 = vc.u32 %v2770_v33, %v2772_v58  ;;  %2242 = vset.pattern.permute.xlu1 %v4472_v8 }
  0xaa   :  { %vm307_vm2 = vc.u32 %v305_v49, %v301_v46  ;;  %v161_v51 = vadd.s32 1, %v157_v57  ;;  %v280_v40 = vshrl.u32 %v2743_v59, 16  ;;  %v158_v36 = vmul.u32 %v2594_v3, %v104_v5  ;;  %1520 = vperm.xlu1 %2242, %v2626_v31   ;;  %2244 = vset.pattern.permute.xlu2 %v4464_v1 }
  0xab   :  { %v308_v56 = vsel %vm307_vm2, 1, %v4458_v0  ;;  %v256_v60 = vsel %vm252_vm6, %v236_v12, %v2651_v34  ;;  %v300_v54 = vshrl.u32 %v2746_v9, 16  ;;  %v258_v43 = vsel %vm254_vm8, %v2654_v53, %v257_v37  ;;  %1552 = vperm.xlu2 %2244, %v2626_v31  }
  0xac   :  { %v310_v22 = vadd.s32 %v308_v56, %v306_v11  ;;  %v162_v5 = vsel %vm160_vm1, %v161_v51, %v157_v57  ;;  %v290_v3 = vadd.s32 %v289_v16, %v280_v40  ;;  %v302_v59 = vshrl.u32 %v297_v55, 16 }
  0xad   :  { %v163_v34 = vadd.s32 %v162_v5, %v158_v36  ;;  %v309_v48 = vadd.s32 %v305_v49, %v301_v46  ;;  %v259_v9 = vsel %vm253_vm9, %v256_v60, %v258_v43  ;;  %v159_v56 = vadd.s32 %v2772_v58, %v2770_v33 }
  0xae   :  { %v311_v52 = vadd.s32 %v310_v22, %v300_v54  ;;  %v313_v61 = vmul.u32 %v2608_v21, %v259_v9  ;;  %v2809_v38 = vpop.permute.xlu1 %562  ;;  %vm67_vm8 = vcmp.lt.s32.totalorder %v2523_v17, 0  ;;  %vm2841_vm9 = vcmp.le.f32.partialorder %v65_v25, 0.7853982 }
  0xaf   :  { %v164_v27 = vadd.s32 536870912, %v163_v34  ;;  %vm315_vm3 = vc.u32 %v290_v3, %v309_v48  ;;  %v2814_v2 = vpop.permute.xlu2 %572  ;;  %vm222_vm10 = vcmp.lt.s32.totalorder %v2526_v18, 0  ;;  %vm208_vm15 = vweird.f32 %v2523_v17 }
  0xb0   :  { %v312_v20 = vadd.s32 %v311_v52, %v302_v59  ;;  %v390_v7 = vlaneseq }
  0xb1   :  { %v2805_v53 = vshrl.u32 %v164_v27, 30 }
  0xb2   :  { %v316_v47 = vadd.s32 1, %v312_v20  ;;  %2243 = vset.pattern.permute.xlu1 %v4464_v1 }
  0xb3   :  { %v166_v62 = vshll.u32 %v2805_v53, 30  ;;  %1548 = vperm.xlu1 %2243, %v2542_v29   ;;  %2246 = vset.pattern.permute.xlu2 %v4466_v4 }
  0xb4   :  { %v317_v50 = vsel %vm315_vm3, %v316_v47, %v312_v20  ;;  %v314_v47 = vadd.s32 %v309_v48, %v290_v3  ;;  %1584 = vperm.xlu2 %2246, %v2626_v31   ;;  %vm363_vm3 = vweird.f32 %v2526_v18 }
  0xb5   :  { %v318_v55 = vadd.s32 %v317_v50, %v313_v61  ;;  %v167_v42 = vsub.s32 %v163_v34, %v166_v62 }
  0xb6   :  { %v2821_v12 = vpop.permute.xlu1 %576 }
  0xb7   :  { %v319_v44 = vadd.s32 536870912, %v318_v55  ;;  %vm168_vm4 = vcmp.lt.s32.totalorder %v167_v42, 0  ;;  %v169_v21 = vsub.s32 0, %v167_v42  ;;  %v2826_v40 = vpop.permute.xlu2 %590 }
  0xb9   :  { %v2817_v46 = vshrl.u32 %v319_v44, 30  ;;  %v170_v23 = vsel %vm168_vm4, %v169_v21, %v167_v42 }
  0xba   :  { %v171_v49 = vclz %v170_v23 }
  0xbb   :  { %v321_v57 = vshll.u32 %v2817_v46, 30  ;;  %2245 = vset.pattern.permute.xlu1 %v4466_v4 }
  0xbc   :  { %v2141_v16 = vadd.s32 4294967294, %v171_v49  ;;  %1580 = vperm.xlu1 %2245, %v2542_v29   ;;  %2248 = vset.pattern.permute.xlu2 %v4462_v6 }
  0xbd   :  { %v322_v11 = vsub.s32 %v318_v55, %v321_v57 }
  0xbe   :  { %vm2142_vm5 = vcmp.lt.s32.totalorder %v2141_v16, 0  ;;  %v2833_v58 = vpop.permute.xlu1 %608 }
  0xbf   :  { %vm323_vm6 = vcmp.lt.s32.totalorder %v322_v11, 0  ;;  %v324_v37 = vsub.s32 0, %v322_v11  ;;  %v174_v51 = vsel %vm2142_vm5, 0, %v2141_v16  ;;  %v2836_v21 = vpop.permute.xlu2 %612 }
  0xc0   :  { %v175_v36 = vsub.s32 32, %v174_v51  ;;  %v179_v60 = vsub.s32 4294967266, %v174_v51  ;;  %v176_v43 = vshll.u32 %v167_v42, %v174_v51 }
  0xc1   :  { %v325_v54 = vsel %vm323_vm6, %v324_v37, %v322_v11 }
  0xc2   :  { %v326_v22 = vclz %v325_v54  ;;  %v177_v5 = vshrl.u32 %v159_v56, %v175_v36  ;;  %v180_v34 = vadd.s32 127, %v179_v60 }
  0xc4   :  { %v2144_v59 = vadd.s32 4294967294, %v326_v22  ;;  %v178_v52 = vor.u32 %v177_v5, %v176_v43  ;;  %v181_v9 = vshll.u32 %v180_v34, 23  ;;  %2247 = vset.pattern.permute.xlu1 %v4462_v6  ;;  %v2979_v6 = vld [vmem:[%s4441_s8 + $0x8] sm:$0xff] }
  0xc6   :  { %vm2145_vm7 = vcmp.lt.s32.totalorder %v2144_v59, 0  ;;  %v182_v27 = vor.u32 4788187, %v181_v9  ;;  %v185_v50 = vcvt.s32.f32 %v178_v52  ;;  %v2851_v22 = vpop.permute.xlu1 %626 }
  0xc7   :  { %v329_v20 = vsel %vm2145_vm7, 0, %v2144_v59  ;;  %v2855_v9 = vpop.permute.xlu2 %630 }
  0xc8   :  { %v330_v61 = vsub.s32 32, %v329_v20  ;;  %v334_v33 = vsub.s32 4294967266, %v329_v20  ;;  %v183_v62 = vand.u32 2147483647, %v182_v27  ;;  %v331_v55 = vshll.u32 %v322_v11, %v329_v20 }
  0xc9   :  { %v189_v11 = vsub.s32 4, %v2805_v53  ;;  %v4565_v20 = vand.u32 2147483647, %v2526_v18 }
  0xca   :  { %v332_v42 = vshrl.u32 %v314_v47, %v330_v61  ;;  %v335_v44 = vadd.s32 127, %v334_v33  ;;  %v186_v23 = vmul.f32 %v185_v50, %v183_v62  ;;  %v344_v62 = vsub.s32 4, %v2817_v46 }
  0xcb   :  { %v190_v25 = vsel %vm67_vm8, %v189_v11, %v2805_v53  ;;  %vm2861_vm11 = vcmp.le.f32.partialorder %v4565_v20, 0.7853982 }
  0xcc   :  { %v333_v49 = vor.u32 %v332_v42, %v331_v55  ;;  %v336_v57 = vshll.u32 %v335_v44, 23  ;;  %v187_v16 = vxor.u32 2147483648, %v186_v23  ;;  %v192_v27 = vsel %vm2841_vm9, 0, %v190_v25 }
  0xcd   :  { %v345_v48 = vsel %vm222_vm10, %v344_v62, %v2817_v46 }
  0xce   :  { %v337_v3 = vor.u32 4788187, %v336_v57  ;;  %v188_v37 = vsel %vm67_vm8, %v187_v16, %v186_v23  ;;  %v340_v36 = vcvt.s32.f32 %v333_v49  ;;  %v209_v23 = vadd.s32 3, %v192_v27 }
  0xcf   :  { %v191_v51 = vsel %vm2841_vm9, %v2523_v17, %v188_v37 }
  0xd0   :  { %v338_v56 = vand.u32 2147483647, %v337_v3  ;;  %v193_v60 = vmul.f32 %v191_v51, %v191_v51  ;;  %v210_v25 = vand.u32 3, %v209_v23 }
  0xd2   :  { %v341_v54 = vmul.f32 %v340_v36, %v338_v56  ;;  %v194_v43 = vmul.f32 -0.001358992, %v193_v60  ;;  %v201_v5 = vmul.f32 -0.00019511016, %v193_v60  ;;  %vm212_vm12 = vcmp.eq.s32.totalorder %v210_v25, 0 }
  0xd3   :  { %vm215_vm13 = vcmp.eq.s32.totalorder %v210_v25, 2  ;;  %vm211_vm14 = vcmp.lt.s32.totalorder %v210_v25, 2 }
  0xd4   :  { %v342_v34 = vxor.u32 2147483648, %v341_v54  ;;  %v195_v59 = vadd.f32 0.041655596, %v194_v43  ;;  %v202_v52 = vadd.f32 0.008332121, %v201_v5  ;;  %v347_v43 = vsel %vm2861_vm11, 0, %v345_v48 }
  0xd6   :  { %v343_v53 = vsel %vm222_vm10, %v342_v34, %v341_v54  ;;  %v196_v61 = vmul.f32 %v195_v59, %v193_v60  ;;  %v203_v33 = vmul.f32 %v202_v52, %v193_v60  ;;  %v2874_v54 = vpop.permute.xlu1 %648  ;;  %v379_v59 = vpop.permute.xlu0 %378 }
  0xd7   :  { %v346_v50 = vsel %vm2861_vm11, %v2526_v18, %v343_v53 }
  0xd8   :  { %v348_v55 = vmul.f32 %v346_v50, %v346_v50  ;;  %v197_v42 = vadd.f32 -0.4999988, %v196_v61  ;;  %v204_v44 = vadd.f32 -0.16666654, %v203_v33  ;;  %v364_v61 = vadd.s32 3, %v347_v43 }
  0xda   :  { %v349_v49 = vmul.f32 -0.001358992, %v348_v55  ;;  %v356_v57 = vmul.f32 -0.00019511016, %v348_v55  ;;  %v198_v16 = vmul.f32 %v197_v42, %v193_v60  ;;  %v205_v3 = vmul.f32 %v204_v44, %v193_v60  ;;  %v2878_v60 = vpop.permute.xlu2 %662 }
  0xdc   :  { %v350_v37 = vadd.f32 0.041655596, %v349_v49  ;;  %v357_v11 = vadd.f32 0.008332121, %v356_v57  ;;  %v199_v56 = vadd.f32 1.0, %v198_v16  ;;  %v206_v36 = vadd.f32 1.0, %v205_v3 }
  0xdd   :  { %v365_v57 = vand.u32 3, %v364_v61 }
  0xde   :  { %v351_v5 = vmul.f32 %v350_v37, %v348_v55  ;;  %v358_v34 = vmul.f32 %v357_v11, %v348_v55  ;;  %v207_v52 = vmul.f32 %v206_v36, %v191_v51  ;;  %v216_v27 = vxor.u32 2147483648, %v199_v56  ;;  %v2881_v37 = vpop.permute.xlu1 %666 }
  0xdf   :  { %vm367_vm0 = vcmp.eq.s32.totalorder %v365_v57, 0  ;;  %vm370_vm1 = vcmp.eq.s32.totalorder %v365_v57, 2  ;;  %vm366_vm2 = vcmp.lt.s32.totalorder %v365_v57, 2 }
  0xe0   :  { %v352_v20 = vadd.f32 -0.4999988, %v351_v5  ;;  %v359_v53 = vadd.f32 -0.16666654, %v358_v34  ;;  %v213_v46 = vxor.u32 2147483648, %v207_v52  ;;  %v217_v44 = vsel %vm215_vm13, %v216_v27, %v207_v52 }
  0xe2   :  { %v353_v33 = vmul.f32 %v352_v20, %v348_v55  ;;  %v360_v62 = vmul.f32 %v359_v53, %v348_v55  ;;  %v214_v42 = vsel %vm212_vm12, %v199_v56, %v213_v46  ;;  %v465_v55 = vpop.permute.xlu0 %464  ;;  %v2883_v25 = vpop.permute.xlu2 %680 }
  0xe3   :  { %v218_v47 = vsel %vm211_vm14, %v214_v42, %v217_v44 }
  0xe4   :  { %v354_v23 = vadd.f32 1.0, %v353_v33  ;;  %v361_v49 = vadd.f32 1.0, %v360_v62  ;;  %v219_v51 = vsel %vm208_vm15, nan, %v218_v47  ;;  %v4572_v33 = vmov 1  }
  0xe5   :  { %v375_v48 = vmul.f32 %v219_v51, %v219_v51 }
  0xe6   :  { %v362_v16 = vmul.f32 %v361_v49, %v346_v50  ;;  %v371_v3 = vxor.u32 2147483648, %v354_v23 }
  0xe7   :  { %v381_v36 = vmul.f32 %v379_v59, %v375_v48 }
  0xe8   :  { %v368_v11 = vxor.u32 2147483648, %v362_v16  ;;  %v372_v17 = vsel %vm370_vm1, %v371_v3, %v362_v16 }
  0xe9   :  { %v383_v43 = vadd.f32 %v381_v36, %v2511_v14  ;;  %v2893_v14 = vpop.permute.xlu1 %699 }
  0xea   :  { %v369_v56 = vsel %vm367_vm0, %v354_v23, %v368_v11  ;;  %v2897_v53 = vpop.permute.xlu2 %704  ;;  %v2937_v23 = vpop.permute.xlu0 %684 }
  0xeb   :  { %v373_v5 = vsel %vm366_vm2, %v369_v56, %v372_v17  ;;  %v2887_v34 = vmul.f32 %v465_v55, %v383_v43  ;;  %425 = vrot.lane.b32.xlu0 %v383_v43, %s2378_s6  ;;  %406 = vrot.lane.b32.xlu2 %v383_v43, %s2379_s28 }
  0xec   :  { %v374_v50 = vsel %vm363_vm3, nan, %v373_v5  ;;  %386 = vrot.lane.b32.xlu1 %v383_v43, %s2380_s29 }
  0xed   :  { %v376_v52 = vmul.f32 %v374_v50, %v374_v50 }
  0xef   :  { %v382_v27 = vmul.f32 %v379_v59, %v376_v52  ;;  %v4569_v59 = vmov 8  }
  0xf1   :  { %v384_v20 = vadd.f32 %v382_v27, %v2516_v15  ;;  %v2902_v46 = vpop.permute.xlu1 %712 }
  0xf2   :  { %4568 = vst [vmem:[#allocation8_spill] sm:$0xff] %v2902_v46  ;;  %v2908_v15 = vpop.permute.xlu2 %716  ;;  %v2945_v57 = vpop.permute.xlu0 %594 }
  0xf3   :  { %v2895_v18 = vmul.f32 %v465_v55, %v384_v20  ;;  %444 = vrot.lane.b32.xlu0 %v383_v43, %s2381_s30  ;;  %1616 = vperm.xlu2 %2248, %v2626_v31   ;;  %4570 = vst [vmem:[#allocation9_spill] sm:$0xff] %v2908_v15 }
  0xf4   :  { %388 = vrot.lane.b32.xlu1 %v384_v20, %s2380_s29 }
  0xf9   :  { %v2913_v61 = vpop.permute.xlu1 %728 }
  0xfa   :  { %4571 = vst [vmem:[#allocation10_spill] sm:$0xff] %v2913_v61  ;;  %v2954_v48 = vpop.permute.xlu0 %724 }
  0xfb   :  { %1660 = vperm.xlu0 %2234, %v2504_v13   ;;  %2250 = vset.pattern.permute.xlu2 %v4569_v59  ;;  %v2917_v13 = vpop.permute.xlu2 %736  ;;  %4583 = vst [vmem:[#allocation21_spill] sm:$0xff] %v2954_v48 }
  0xfc   :  { %408 = vrot.lane.b32.xlu1 %v384_v20, %s2379_s28  ;;  %1648 = vperm.xlu2 %2250, %v2626_v31   ;;  %4573 = vst [vmem:[#allocation11_spill] sm:$0xff] %v2917_v13 }
 0x101   :  { %v2922_v31 = vpop.permute.xlu1 %740 }
 0x102   :  { %4574 = vst [vmem:[#allocation12_spill] sm:$0xff] %v2922_v31  ;;  %v2960_v55 = vpop.permute.xlu0 %557 }
 0x103   :  { %492 = vrot.lane.b32.xlu0 %v384_v20, %s2382_s10  ;;  %v2924_v62 = vpop.permute.xlu2 %1372 }
 0x104   :  { %427 = vrot.lane.b32.xlu1 %v384_v20, %s2378_s6  ;;  %473 = vrot.lane.b32.xlu2 %v384_v20, %s2383_s11  ;;  %4575 = vst [vmem:[#allocation13_spill] sm:$0xff] %v2924_v62 }
 0x105   :  { %2255 = vset.pattern.permute.xlu0 %v4572_v33  ;;  %2252 = vset.pattern.permute.xlu2 %v4458_v0 }
 0x109   :  { %v2929_v42 = vpop.permute.xlu1 %1412 }
 0x10a   :  { %4576 = vst [vmem:[#allocation14_spill] sm:$0xff] %v2929_v42 }
 0x10b   :  { %511 = vrot.lane.b32.xlu0 %v384_v20, %s2384_s12  ;;  %v2931_v44 = vpop.permute.xlu2 %1440 }
 0x10c   :  { %446 = vrot.lane.b32.xlu1 %v384_v20, %s2381_s30  ;;  %490 = vrot.lane.b32.xlu2 %v383_v43, %s2382_s10  ;;  %4577 = vst [vmem:[#allocation15_spill] sm:$0xff] %v2931_v44 }
 0x111   :  { %v2935_v47 = vpop.permute.xlu1 %1436 }
 0x112   :  { %4578 = vst [vmem:[#allocation16_spill] sm:$0xff] %v2935_v47 }
 0x113   :  { %530 = vrot.lane.b32.xlu0 %v384_v20, %s2385_s13  ;;  %v2939_v49 = vpop.permute.xlu2 %1472 }
 0x114   :  { %471 = vrot.lane.b32.xlu1 %v383_v43, %s2383_s11  ;;  %509 = vrot.lane.b32.xlu2 %v383_v43, %s2384_s12  ;;  %4579 = vst [vmem:[#allocation17_spill] sm:$0xff] %v2939_v49 }
 0x119   :  { %v2943_v51 = vpop.permute.xlu1 %1468 }
 0x11a   :  { %4580 = vst [vmem:[#allocation18_spill] sm:$0xff] %v2943_v51 }
 0x11b   :  { %v2948_v16 = vpop.permute.xlu2 %1504  ;;  %1694 = vperm.xlu0 %2255, %v2979_v6  }
 0x11c   :  { %528 = vrot.lane.b32.xlu2 %v383_v43, %s2385_s13  ;;  %1612 = vperm.xlu1 %2247, %v2542_v29   ;;  %4581 = vst [vmem:[#allocation19_spill] sm:$0xff] %v2948_v16  ;;  %v2966_v43 = vpop.permute.xlu0 %1407 }
 0x11d   :  { %4588 = vst [vmem:[#allocation26_spill] sm:$0xff] %v2966_v43 }
 0x121   :  { %v2951_v3 = vpop.permute.xlu1 %1500 }
 0x122   :  { %4582 = vst [vmem:[#allocation20_spill] sm:$0xff] %v2951_v3 }
 0x123   :  { %v2956_v11 = vpop.permute.xlu2 %1552 }
 0x124   :  { %2249 = vset.pattern.permute.xlu1 %v4569_v59  ;;  %4584 = vst [vmem:[#allocation22_spill] sm:$0xff] %v2956_v11  ;;  %v2968_v50 = vpop.permute.xlu0 %644  ;;  %v2990_v11 = vand.u32 127, %v390_v7 }
 0x125   :  { %1644 = vperm.xlu1 %2249, %v2542_v29  }
 0x126   :  { %vm410_vm4 = vcmp.lt.s32.totalorder %v2990_v11, 16  ;;  %vm392_vm5 = vcmp.lt.s32.totalorder %v2990_v11, 17  ;;  %vm429_vm6 = vcmp.lt.s32.totalorder %v2990_v11, 15  ;;  %vm4535_vm7 = vcmp.lt.s32.totalorder %v2990_v11, 1 }
 0x127   :  { %vm4533_vm8 = vcmp.lt.s32.totalorder %v2990_v11, 113  ;;  %vm4532_vm9 = vcmp.lt.s32.totalorder %v2990_v11, 112  ;;  %vm4534_vm10 = vcmp.lt.s32.totalorder %v2990_v11, 127  ;;  %vm4531_vm11 = vcmp.lt.s32.totalorder %v2990_v11, 111 }
 0x129   :  { %v2958_v36 = vpop.permute.xlu1 %1520 }
 0x12a   :  { %4585 = vst [vmem:[#allocation23_spill] sm:$0xff] %v2958_v36 }
 0x12b   :  { %v2962_v56 = vpop.permute.xlu2 %1584 }
 0x12c   :  { %4586 = vst [vmem:[#allocation24_spill] sm:$0xff] %v2962_v56  ;;  %v4594_v56 = vmov 2  }
 0x12d   :  { %2251 = vset.pattern.permute.xlu1 %v4464_v1 }
 0x12e   :  { %1664 = vperm.xlu1 %2251, %v2534_v24  }
 0x131   :  { %v2964_v17 = vpop.permute.xlu1 %1548 }
 0x132   :  { %4587 = vst [vmem:[#allocation25_spill] sm:$0xff] %v2964_v17  ;;  %v2998_v17 = vld [vmem:[%s4434_s1 + $0x8] sm:$0xff] }
 0x133   :  { %v3014_v16 = vperm.slane %v2998_v17, 1  ;;  %v3021_v47 = vperm.slane %v2998_v17, 0  ;;  %v3050_v46 = vperm.slane %v2998_v17, 3 }
 0x135   :  { %4596 = vst [vmem:[#allocation32_spill] sm:$0xff] %v3014_v16 }
 0x136   :  { %2253 = vset.pattern.permute.xlu1 %v4458_v0  ;;  %4597 = vst [vmem:[#allocation33_spill] sm:$0xff] %v3021_v47 }
 0x137   :  { %1680 = vperm.xlu1 %2253, %v2979_v6   ;;  %4601 = vst [vmem:[#allocation37_spill] sm:$0xff] %v3050_v46 }
 0x139   :  { %v2970_v52 = vpop.permute.xlu1 %1580 }
 0x13a   :  { %4589 = vst [vmem:[#allocation27_spill] sm:$0xff] %v2970_v52  ;;  %v49_v52 = vld [vmem:[%s4434_s1] sm:$0xff] }
 0x13b   :  { %v3018_v51 = vperm.slane %v49_v52, 0  ;;  %v3031_v62 = vperm.slane %v49_v52, 2  ;;  %v3047_v15 = vperm.slane %v49_v52, 3 }
 0x13d   :  { %4598 = vst [vmem:[#allocation34_spill] sm:$0xff] %v3031_v62 }
 0x13e   :  { %4600 = vst [vmem:[#allocation36_spill] sm:$0xff] %v3047_v15 }
 0x13f   :  { %2257 = vset.pattern.permute.xlu1 %v4594_v56 }
 0x145   :  { %v407_v5 = vpop.permute.xlu2 %406 }
 0x14d   :  { %v2972_v27 = vpop.permute.xlu2 %1616 }
 0x14e   :  { %4590 = vst [vmem:[#allocation28_spill] sm:$0xff] %v2972_v27  ;;  %v4593_v27 = vmov 4  }
 0x14f   :  { %2256 = vset.pattern.permute.xlu0 %v4593_v27 }
 0x150   :  { %1376 = vperm.xlu0 %2256, %v2534_v24   ;;  %v3011_v24 = vperm.slane %v49_v52, 1 }
 0x152   :  { %4595 = vst [vmem:[#allocation31_spill] sm:$0xff] %v3011_v24 }
 0x156   :  { %v2974_v41 = vpop.permute.xlu2 %1648 }
 0x157   :  { %4591 = vst [vmem:[#allocation29_spill] sm:$0xff] %v2974_v41 }
 0x158   :  { %1516 = vperm.xlu0 %2256, %v2542_v29   ;;  %v3034_v29 = vperm.slane %v2998_v17, 2 }
 0x15a   :  { %4599 = vst [vmem:[#allocation35_spill] sm:$0xff] %v3034_v29 }
 0x15d   :  { %v426_v20 = vpop.permute.xlu0 %425 }
 0x15e   :  { %v387_v0 = vpop.permute.xlu1 %386  ;;  %v2983_v10 = vpop.permute.xlu2 %473 }
 0x165   :  { %v445_v1 = vpop.permute.xlu0 %444 }
 0x166   :  { %v389_v4 = vpop.permute.xlu1 %388  ;;  %v3000_v36 = vpop.permute.xlu2 %490 }
 0x167   :  { %v393_v44 = vsel %vm392_vm5, %v387_v0, %v389_v4  ;;  %v394_v42 = vsel %vm392_vm5, %v389_v4, %v387_v0 }
 0x168   :  { %v398_v48 = vmul.f32 %v3021_v47, %v393_v44 }
 0x16d   :  { %v2985_v8 = vpop.permute.xlu0 %1660 }
 0x16e   :  { %4592 = vst [vmem:[#allocation30_spill] sm:$0xff] %v2985_v8  ;;  %v409_v41 = vpop.permute.xlu1 %408  ;;  %v3006_v8 = vld [vmem:[%s4441_s8] sm:$0xff] }
 0x16f   :  { %1675 = vperm.xlu2 %2252, %v3006_v8   ;;  %1708 = vperm.xlu1 %2257, %v3006_v8   ;;  %v411_v49 = vsel %vm410_vm4, %v407_v5, %v409_v41  ;;  %v412_v43 = vsel %vm410_vm4, %v409_v41, %v407_v5  ;;  %v397_v5 = vmul.f32 %v3018_v51, %v394_v42 }
 0x170   :  { %v415_v61 = vmul.f32 %v3011_v24, %v412_v43  ;;  %v416_v41 = vmul.f32 %v3014_v16, %v411_v49  ;;  %v4602_v43 = vmov 3   ;;  %v510_v49 = vpop.permute.xlu2 %509  ;;  %1744 = vperm.xlu0 %2256, %v3006_v8   ;;  %v4625_v24 = vmov 0  }
 0x172   :  { %v421_v42 = vmul.f32 %v2621_v28, %v415_v61  ;;  %v422_v44 = vmul.f32 %v2621_v28, %v416_v41 }
 0x175   :  { %v493_v7 = vpop.permute.xlu0 %492 }
 0x176   :  { %v428_v3 = vpop.permute.xlu1 %427 }
 0x177   :  { %v430_v31 = vsel %vm429_vm6, %v426_v20, %v428_v3  ;;  %v431_v13 = vsel %vm429_vm6, %v428_v3, %v426_v20  ;;  %2254 = vset.pattern.permute.xlu2 %v4572_v33  ;;  %2259 = vset.pattern.permute.xlu1 %v4602_v43 }
 0x178   :  { %v434_v0 = vmul.f32 %v3031_v62, %v431_v13  ;;  %v435_v4 = vmul.f32 %v3034_v29, %v430_v31  ;;  %1690 = vperm.xlu2 %2254, %v3006_v8   ;;  %v404_v13 = vmul.f32 %v2548_v35, %v397_v5  ;;  %v405_v31 = vmul.f32 %v2548_v35, %v398_v48 }
 0x179   :  { %1726 = vperm.xlu1 %2259, %v3006_v8   ;;  %v3070_v5 = vperm.slane %v49_v52, 6  ;;  %v3073_v35 = vperm.slane %v2998_v17, 6 }
 0x17a   :  { %v440_v28 = vmul.f32 %v2716_v26, %v434_v0  ;;  %v441_v61 = vmul.f32 %v2716_v26, %v435_v4  ;;  %v424_v48 = vadd.f32 %v422_v44, %v405_v31  ;;  %v3078_v26 = vperm.slane %v49_v52, 7 }
 0x17b   :  { %4603 = vst [vmem:[#allocation38_spill] sm:$0xff] %v3070_v5  ;;  %v3084_v4 = vperm.slane %v2998_v17, 5 }
 0x17c   :  { %4604 = vst [vmem:[#allocation39_spill] sm:$0xff] %v3073_v35 }
 0x17d   :  { %v512_v3 = vpop.permute.xlu0 %511  ;;  %4605 = vst [vmem:[#allocation40_spill] sm:$0xff] %v3078_v26 }
 0x17e   :  { %v447_v20 = vpop.permute.xlu1 %446  ;;  %4607 = vst [vmem:[#allocation42_spill] sm:$0xff] %v3084_v4 }
 0x17f   :  { %v449_v29 = vsel %vm4535_vm7, %v445_v1, %v447_v20  ;;  %v450_v33 = vsel %vm4535_vm7, %v447_v20, %v445_v1  ;;  %v423_v1 = vadd.f32 %v421_v42, %v404_v13  ;;  %v496_v42 = vsel %vm4533_vm8, %v493_v7, %v3000_v36 }
 0x180   :  { %v453_v41 = vmul.f32 %v3047_v15, %v450_v33  ;;  %v454_v62 = vmul.f32 %v3050_v46, %v449_v29  ;;  %v3081_v29 = vperm.slane %v49_v52, 5  ;;  %v495_v33 = vsel %vm4533_vm8, %v3000_v36, %v493_v7  ;;  %2258 = vset.pattern.permute.xlu2 %v4594_v56  ;;  %v2302_v56 = vld [vmem:[%s4434_s1 + $0x10] ss:$0 sm:$0xff] }
 0x181   :  { %v442_v44 = vadd.f32 %v440_v28, %v423_v1  ;;  %v443_v13 = vadd.f32 %v441_v61, %v424_v48  ;;  %v515_v52 = vsel %vm4532_vm9, %v512_v3, %v510_v49  ;;  %v499_v36 = vmul.f32 %v3070_v5, %v495_v33  ;;  %1712 = vperm.xlu2 %2258, %v2979_v6   ;;  %v2303_v61 = vld [vmem:[%s4434_s1 + $0x18] ss:$0 sm:$0xff] }
 0x182   :  { %v459_v20 = vmul.f32 %v2753_v30, %v453_v41  ;;  %v460_v0 = vmul.f32 %v2753_v30, %v454_v62  ;;  %4606 = vst [vmem:[#allocation41_spill] sm:$0xff] %v3081_v29  ;;  %v3093_v30 = vperm.slane %v2998_v17, 7  ;;  %v514_v62 = vsel %vm4532_vm9, %v510_v49, %v512_v3  ;;  %v529_v49 = vpop.permute.xlu2 %528  ;;  %2261 = vset.pattern.permute.xlu1 %v4593_v27 }
 0x183   :  { %v500_v7 = vmul.f32 %v3073_v35, %v496_v42  ;;  %v518_v28 = vmul.f32 %v3078_v26, %v514_v62  ;;  %1748 = vperm.xlu1 %2261, %v2979_v6  }
 0x184   :  { %4608 = vst [vmem:[#allocation43_spill] sm:$0xff] %v3093_v30  ;;  %v461_v31 = vadd.f32 %v459_v20, %v442_v44  ;;  %v462_v41 = vadd.f32 %v460_v0, %v443_v13  ;;  %v505_v13 = vmul.f32 %v2690_v39, %v499_v36 }
 0x185   :  { %v531_v46 = vpop.permute.xlu0 %530  ;;  %v506_v62 = vmul.f32 %v2690_v39, %v500_v7  ;;  %v4610_v39 = vmov 5  }
 0x186   :  { %v472_v15 = vpop.permute.xlu1 %471  ;;  %v533_v20 = vsel %vm4531_vm11, %v529_v49, %v531_v46  ;;  %v534_v0 = vsel %vm4531_vm11, %v531_v46, %v529_v49  ;;  %v470_v33 = vadd.f32 %v2895_v18, %v462_v41  ;;  %v469_v42 = vadd.f32 %v2887_v34, %v461_v31 }
 0x187   :  { %v476_v17 = vsel %vm4534_vm10, %v472_v15, %v2983_v10  ;;  %v477_v3 = vsel %vm4534_vm10, %v2983_v10, %v472_v15  ;;  %v4609_v10 = vmov 6   ;;  %v519_v15 = vmul.f32 %v3093_v30, %v515_v52 }
 0x188   :  { %v480_v1 = vmul.f32 %v3081_v29, %v476_v17  ;;  %v481_v48 = vmul.f32 %v3084_v4, %v477_v3  ;;  %2265 = vset.pattern.permute.xlu0 %v4609_v10  ;;  %v537_v52 = vmul.f32 %v2302_v56, %v533_v20  ;;  %v538_v17 = vmul.f32 %v2303_v61, %v534_v0 }
 0x189   :  { %1784 = vperm.xlu0 %2265, %v2979_v6   ;;  %v524_v49 = vmul.f32 %v2748_v32, %v518_v28  ;;  %v525_v26 = vmul.f32 %v2748_v32, %v519_v15  ;;  %2260 = vset.pattern.permute.xlu2 %v4602_v43  ;;  %v2386_v43 = vmov 9  }
 0x18a   :  { %v486_v27 = vmul.f32 %v2601_v19, %v480_v1  ;;  %v487_v44 = vmul.f32 %v2601_v19, %v481_v48  ;;  %v543_v34 = vmul.f32 %v2785_v63, %v537_v52  ;;  %v544_v19 = vmul.f32 %v2785_v63, %v538_v17  ;;  %1730 = vperm.xlu2 %2260, %v2979_v6  }
 0x18b   :  { %2263 = vset.pattern.permute.xlu1 %v4610_v39 }
 0x18c   :  { %v488_v3 = vadd.f32 %v486_v27, %v469_v42  ;;  %v489_v46 = vadd.f32 %v487_v44, %v470_v33  ;;  %1766 = vperm.xlu1 %2263, %v2979_v6   ;;  %v4611_v44 = vmov 7  }
 0x18e   :  { %v507_v30 = vadd.f32 %v505_v13, %v488_v3  ;;  %v508_v18 = vadd.f32 %v506_v62, %v489_v46 }
 0x190   :  { %v526_v31 = vadd.f32 %v524_v49, %v507_v30  ;;  %v527_v41 = vadd.f32 %v525_v26, %v508_v18 }
 0x191   :  { %2270 = vset.pattern.permute.xlu0 %v2386_v43 }
 0x192   :  { %v545_v36 = vadd.f32 %v543_v34, %v526_v31  ;;  %v546_v7 = vadd.f32 %v544_v19, %v527_v41  ;;  %1834 = vperm.xlu0 %2270, %v3006_v8   ;;  %2262 = vset.pattern.permute.xlu2 %v4610_v39  ;;  %v2387_v39 = vmov 11  }
 0x193   :  { %1762 = vperm.xlu2 %2262, %v3006_v8  }
 0x194   :  { %v3143_v32 = vadd.f32 %v2798_v45, %v545_v36  ;;  %v3146_v28 = vadd.f32 %v2798_v45, %v546_v7  ;;  %2266 = vset.pattern.permute.xlu1 %v4611_v44 }
 0x195   :  { %1798 = vperm.xlu1 %2266, %v3006_v8  }
 0x196   :  { %v565_v63 = vperm.slane %v3143_v32, 0  ;;  %v566_v26 = vperm.slane %v3146_v28, 0  ;;  %v579_v30 = vperm.slane %v3143_v32, 1  ;;  %v580_v56 = vperm.slane %v3146_v28, 1 }
 0x197   :  { %v597_v61 = vperm.slane %v3143_v32, 2  ;;  %v598_v1 = vperm.slane %v3146_v28, 2  ;;  %v615_v45 = vperm.slane %v3143_v32, 3  ;;  %v616_v0 = vperm.slane %v3146_v28, 3 }
 0x198   :  { %v567_v48 = vmul.f32 %v565_v63, %v2960_v55  ;;  %v568_v15 = vmul.f32 %v566_v26, %v2960_v55  ;;  %v569_v20 = vmul.f32 %v565_v63, %v2809_v38  ;;  %v581_v33 = vmul.f32 %v579_v30, %v2814_v2 }
 0x199   :  { %v582_v42 = vmul.f32 %v580_v56, %v2814_v2  ;;  %v583_v27 = vmul.f32 %v579_v30, %v2821_v12  ;;  %v599_v13 = vmul.f32 %v597_v61, %v2826_v40  ;;  %v600_v55 = vmul.f32 %v598_v1, %v2826_v40 }
 0x19a   :  { %v585_v62 = vadd.f32 %v581_v33, %v567_v48  ;;  %v601_v3 = vmul.f32 %v597_v61, %v2945_v57  ;;  %v617_v46 = vmul.f32 %v615_v45, %v2833_v58  ;;  %v618_v2 = vmul.f32 %v616_v0, %v2833_v58  ;;  %2275 = vset.pattern.permute.xlu0 %v2387_v39 }
 0x19b   :  { %v586_v52 = vadd.f32 %v582_v42, %v568_v15  ;;  %v587_v17 = vadd.f32 %v583_v27, %v569_v20  ;;  %v619_v49 = vmul.f32 %v615_v45, %v2836_v21  ;;  %v633_v40 = vperm.slane %v3143_v32, 4  ;;  %1874 = vperm.xlu0 %2275, %v2979_v6   ;;  %2264 = vset.pattern.permute.xlu2 %v4609_v10 }
 0x19c   :  { %v603_v18 = vadd.f32 %v599_v13, %v585_v62  ;;  %v4514_v31 = vperm.slane %v3146_v28, 4  ;;  %v651_v41 = vperm.slane %v3143_v32, 5  ;;  %v4513_v30 = vperm.slane %v3146_v28, 5  ;;  %1780 = vperm.xlu2 %2264, %v3006_v8  }
 0x19d   :  { %v604_v34 = vadd.f32 %v600_v55, %v586_v52  ;;  %v605_v19 = vadd.f32 %v601_v3, %v587_v17  ;;  %v635_v58 = vmul.f32 %v633_v40, %v2851_v22  ;;  %v637_v45 = vmul.f32 %v633_v40, %v2855_v9  ;;  %2268 = vset.pattern.permute.xlu1 %v4569_v59 }
 0x19e   :  { %v621_v36 = vadd.f32 %v617_v46, %v603_v18  ;;  %v636_v61 = vmul.f32 %v4514_v31, %v2851_v22  ;;  %v653_v48 = vmul.f32 %v651_v41, %v2968_v50  ;;  %v654_v15 = vmul.f32 %v4513_v30, %v2968_v50  ;;  %1816 = vperm.xlu1 %2268, %v3006_v8  }
 0x19f   :  { %v622_v7 = vadd.f32 %v618_v2, %v604_v34  ;;  %v623_v63 = vadd.f32 %v619_v49, %v605_v19  ;;  %v655_v27 = vmul.f32 %v651_v41, %v2874_v54  ;;  %v669_v22 = vperm.slane %v3143_v32, 6 }
 0x1a0   :  { %v639_v20 = vadd.f32 %v635_v58, %v621_v36  ;;  %v4512_v13 = vperm.slane %v3146_v28, 6  ;;  %v687_v10 = vperm.slane %v3143_v32, 7  ;;  %v4511_v52 = vperm.slane %v3146_v28, 7 }
 0x1a1   :  { %v640_v33 = vadd.f32 %v636_v61, %v622_v7  ;;  %v641_v42 = vadd.f32 %v637_v45, %v623_v63  ;;  %v671_v17 = vmul.f32 %v669_v22, %v2878_v60  ;;  %v673_v46 = vmul.f32 %v669_v22, %v2881_v37  ;;  %v4613_v45 = vld [vmem:[#allocation9_spill] sm:$0xff]  ;;  %v4617_v22 = vld [vmem:[#allocation12_spill] sm:$0xff] }
 0x1a2   :  { %v657_v55 = vadd.f32 %v653_v48, %v639_v20  ;;  %v672_v3 = vmul.f32 %v4512_v13, %v2878_v60  ;;  %v689_v18 = vmul.f32 %v687_v10, %v2883_v25  ;;  %v690_v32 = vmul.f32 %v4511_v52, %v2883_v25  ;;  %v4612_v25 = vld [vmem:[#allocation8_spill] sm:$0xff] }
 0x1a3   :  { %v658_v62 = vadd.f32 %v654_v15, %v640_v33  ;;  %v659_v50 = vadd.f32 %v655_v27, %v641_v42  ;;  %v691_v19 = vmul.f32 %v687_v10, %v2937_v23  ;;  %v4615_v33 = vld [vmem:[#allocation10_spill] sm:$0xff] }
 0x1a4   :  { %v675_v2 = vadd.f32 %v671_v17, %v657_v55  ;;  %2267 = vset.pattern.permute.xlu2 %v4611_v44  ;;  %v4614_v44 = vld [vmem:[#allocation21_spill] sm:$0xff] }
 0x1a5   :  { %v676_v49 = vadd.f32 %v672_v3, %v658_v62  ;;  %v677_v34 = vadd.f32 %v673_v46, %v659_v50  ;;  %1802 = vperm.xlu2 %2267, %v2979_v6   ;;  %v2388_v3 = vmov 10   ;;  %v570_v46 = vmul.f32 %v566_v26, %v2809_v38 }
 0x1a6   :  { %v693_v40 = vadd.f32 %v689_v18, %v675_v2  ;;  %2271 = vset.pattern.permute.xlu1 %v2386_v43  ;;  %v4616_v43 = vld [vmem:[#allocation11_spill] sm:$0xff] }
 0x1a7   :  { %v694_v41 = vadd.f32 %v690_v32, %v676_v49  ;;  %v695_v36 = vadd.f32 %v691_v19, %v677_v34  ;;  %1838 = vperm.xlu1 %2271, %v2979_v6   ;;  %v584_v49 = vmul.f32 %v580_v56, %v2821_v12  ;;  %v602_v12 = vmul.f32 %v598_v1, %v2945_v57 }
 0x1a8   :  { %v707_v60 = vadd.f32 %v2893_v14, %v693_v40 }
 0x1a9   :  { %v708_v7 = vadd.f32 %v2893_v14, %v694_v41  ;;  %v709_v63 = vadd.f32 %v2897_v53, %v695_v36  ;;  %v588_v36 = vadd.f32 %v584_v49, %v570_v46  ;;  %v4619_v49 = vmov 2475754826  }
 0x1aa   :  { %v719_v58 = vmul.f32 %v4612_v25, %v707_v60 }
 0x1ab   :  { %v720_v61 = vmul.f32 %v4612_v25, %v708_v7  ;;  %v721_v48 = vmul.f32 %v4613_v45, %v709_v63 }
 0x1ac   :  { %v3227_v15 = vadd.f32 %v4614_v44, %v719_v58 }
 0x1ad   :  { %v3230_v20 = vadd.f32 %v4614_v44, %v720_v61  ;;  %v3233_v14 = vadd.f32 %v4615_v33, %v721_v48  ;;  %2269 = vset.pattern.permute.xlu2 %v4569_v59  ;;  %v4516_v48 = vmov 12   ;;  %v3274_v44 = vadd.f32 %v602_v12, %v588_v36 }
 0x1ae   :  { %v3237_v42 = vmul.f32 %v4616_v43, %v3227_v15  ;;  %1820 = vperm.xlu2 %2269, %v2979_v6  }
 0x1af   :  { %v3241_v27 = vmul.f32 %v4616_v43, %v3230_v20  ;;  %v3245_v10 = vmul.f32 %v4617_v22, %v3233_v14  ;;  %2273 = vset.pattern.permute.xlu1 %v2388_v3  ;;  %v3279_v43 = vmul.f32 %v616_v0, %v2836_v21 }
 0x1b0   :  { %v4510_v55 = vand.u32 2147483647, %v3237_v42  ;;  %v750_v62 = vand.u32 2139095040, %v3237_v42  ;;  %1856 = vperm.xlu1 %2273, %v2979_v6  }
 0x1b1   :  { %v4509_v50 = vand.u32 2147483647, %v3241_v27  ;;  %v905_v17 = vand.u32 2139095040, %v3241_v27  ;;  %v1060_v34 = vand.u32 2139095040, %v3245_v10 }
 0x1b2   :  { %v751_v2 = vshrl.u32 %v750_v62, 23  ;;  %v754_v59 = vand.u32 8388607, %v4510_v55 }
 0x1b3   :  { %v906_v18 = vshrl.u32 %v905_v17, 23  ;;  %v909_v32 = vand.u32 8388607, %v4509_v50  ;;  %v1061_v7 = vshrl.u32 %v1060_v34, 23 }
 0x1b4   :  { %v2146_v19 = vadd.s32 4294967169, %v751_v2  ;;  %v755_v40 = vor.u32 8388608, %v754_v59  ;;  %v4618_v2 = vmov 683565275  }
 0x1b5   :  { %v2149_v41 = vadd.s32 4294967169, %v906_v18  ;;  %v910_v38 = vor.u32 8388608, %v909_v32  ;;  %v3281_v62 = vadd.s32 4294967169, %v1061_v7  ;;  %v4620_v32 = vmov 2131351028  }
 0x1b6   :  { %v757_v26 = vadd.s32 1, %v2146_v19  ;;  %v3265_v63 = vshll.u32 %v755_v40, 8  ;;  %2272 = vset.pattern.permute.xlu2 %v2388_v3  ;;  %v4621_v40 = vmov 2102212464   ;;  %v4623_v7 = vmov 1326507024  }
 0x1b7   :  { %v912_v60 = vadd.s32 1, %v2149_v41  ;;  %v3270_v25 = vshll.u32 %v910_v38, 8  ;;  %1852 = vperm.xlu2 %2272, %v3006_v8  }
 0x1b8   :  { %vm758_vm12 = vcmp.gt.s32.totalorder %v757_v26, 0  ;;  %2276 = vset.pattern.permute.xlu1 %v4516_v48  ;;  %v796_v1 = vand.u32 65535, %v3265_v63  ;;  %v797_v17 = vshrl.u32 %v3265_v63, 16 }
 0x1b9   :  { %v759_v56 = vsel %vm758_vm12, %v757_v26, 0  ;;  %vm913_vm13 = vcmp.gt.s32.totalorder %v912_v60, 0  ;;  %1888 = vperm.xlu1 %2276, %v3006_v8   ;;  %v3293_v21 = vand.u32 65535, %v3270_v25  ;;  %v4622_v26 = vmov 920167782  }
 0x1ba   :  { %v761_v58 = vand.u32 31, %v759_v56  ;;  %v914_v61 = vsel %vm913_vm13, %v912_v60, 0  ;;  %v3288_v46 = vshrl.u32 %v759_v56, 5 }
 0x1bb   :  { %v3286_v3 = vand.u32 31, %v914_v61 }
 0x1bc   :  { %v762_v57 = vsub.s32 32, %v761_v58  ;;  %v764_v59 = vshll.u32 %v4618_v2, %v761_v58  ;;  %v767_v18 = vshll.u32 %v4619_v49, %v761_v58  ;;  %v770_v19 = vshll.u32 %v4620_v32, %v761_v58 }
 0x1bd   :  { %v773_v38 = vshll.u32 %v4621_v40, %v761_v58  ;;  %v776_v60 = vshll.u32 %v4622_v26, %v761_v58  ;;  %v3304_v52 = vsub.s32 32, %v3286_v3  ;;  %vm779_vm14 = vcmp.lt.s32.totalorder %v3288_v46, 1 }
 0x1be   :  { %v765_v0 = vshrl.u32 %v4619_v49, %v762_v57  ;;  %v768_v34 = vshrl.u32 %v4620_v32, %v762_v57  ;;  %v771_v41 = vshrl.u32 %v4621_v40, %v762_v57  ;;  %v774_v36 = vshrl.u32 %v4622_v26, %v762_v57 }
 0x1bf   :  { %v777_v12 = vshrl.u32 %v4623_v7, %v762_v57  ;;  %vm780_vm15 = vcmp.lt.s32.totalorder %v3288_v46, 2  ;;  %2274 = vset.pattern.permute.xlu2 %v2387_v39  ;;  %v763_v31 = vshrl.u32 %v4618_v2, %v762_v57  ;;  %vm782_vm0 = vcmp.lt.s32.totalorder %v3288_v46, 4 }
 0x1c0   :  { %v766_v56 = vor.u32 %v765_v0, %v764_v59  ;;  %v769_v50 = vor.u32 %v768_v34, %v767_v18  ;;  %v772_v55 = vor.u32 %v771_v41, %v770_v19  ;;  %v775_v13 = vor.u32 %v774_v36, %v773_v38  ;;  %1870 = vperm.xlu2 %2274, %v3006_v8  }
 0x1c1   :  { %v778_v30 = vor.u32 %v777_v12, %v776_v60  ;;  %vm781_vm1 = vcmp.lt.s32.totalorder %v3288_v46, 3  ;;  %v919_v34 = vshll.u32 %v4618_v2, %v3286_v3  ;;  %v4515_v39 = vmov 13  }
 0x1c2   :  { %v787_v58 = vsel %vm779_vm14, %v766_v56, %v769_v50  ;;  %v791_v59 = vsel %vm779_vm14, %v769_v50, %v772_v55  ;;  %v788_v18 = vsel %vm782_vm0, %v775_v13, 920167782  ;;  %2278 = vset.pattern.permute.xlu1 %v4515_v39  ;;  %v784_v57 = vsel %vm782_vm0, %v772_v55, 2102212464 }
 0x1c3   :  { %v792_v0 = vsel %vm782_vm0, %v778_v30, 1326507024  ;;  %v789_v19 = vsel %vm781_vm1, %v772_v55, %v788_v18  ;;  %v920_v38 = vshrl.u32 %v4619_v49, %v3304_v52  ;;  %1906 = vperm.xlu1 %2278, %v3006_v8   ;;  %v922_v60 = vshll.u32 %v4619_v49, %v3286_v3 }
 0x1c4   :  { %v793_v41 = vsel %vm781_vm1, %v775_v13, %v792_v0  ;;  %v790_v30 = vsel %vm780_vm15, %v787_v58, %v789_v19  ;;  %v923_v55 = vshrl.u32 %v4620_v32, %v3304_v52  ;;  %v783_v39 = vsel %vm779_vm14, %v763_v31, %v766_v56 }
 0x1c5   :  { %v794_v36 = vsel %vm780_vm15, %v791_v59, %v793_v41  ;;  %v820_v13 = vand.u32 65535, %v790_v30  ;;  %v821_v0 = vshrl.u32 %v790_v30, 16  ;;  %v785_v8 = vsel %vm781_vm1, %v769_v50, %v784_v57 }
 0x1c6   :  { %v798_v12 = vand.u32 65535, %v794_v36  ;;  %v799_v18 = vshrl.u32 %v794_v36, 16  ;;  %v3339_v58 = vshrl.u32 %v914_v61, 5  ;;  %v3341_v19 = vor.u32 %v920_v38, %v919_v34 }
 0x1c7   :  { %v3343_v48 = vor.u32 %v923_v55, %v922_v60  ;;  %v926_v5 = vshrl.u32 %v4621_v40, %v3304_v52  ;;  %v823_v35 = vmul.u32 %v821_v0, %v796_v1  ;;  %v824_v30 = vmul.u32 %v820_v13, %v797_v17 }
 0x1c8   :  { %v801_v59 = vmul.u32 %v799_v18, %v796_v1  ;;  %v802_v41 = vmul.u32 %v798_v12, %v797_v17  ;;  %v800_v36 = vmul.u32 %v798_v12, %v796_v1  ;;  %v925_v31 = vshll.u32 %v4620_v32, %v3286_v3 }
 0x1c9   :  { %v803_v56 = vmul.u32 %v799_v18, %v797_v17  ;;  %v822_v50 = vmul.u32 %v820_v13, %v796_v1  ;;  %v825_v61 = vmul.u32 %v821_v0, %v797_v17  ;;  %v4624_v57 = vmov 12  }
 0x1ca   :  { %v804_v29 = vshll.u32 %v801_v59, 16  ;;  %2277 = vset.pattern.permute.xlu2 %v4624_v57  ;;  %v805_v34 = vshrl.u32 %v801_v59, 16  ;;  %v806_v38 = vshll.u32 %v802_v41, 16  ;;  %v807_v4 = vshrl.u32 %v802_v41, 16 }
 0x1cb   :  { %v826_v60 = vshll.u32 %v823_v35, 16  ;;  %1892 = vperm.xlu2 %2277, %v2979_v6   ;;  %v828_v12 = vshll.u32 %v824_v30, 16  ;;  %v3351_v16 = vor.u32 %v926_v5, %v925_v31  ;;  %v929_v1 = vshrl.u32 %v4622_v26, %v3304_v52 }
 0x1cc   :  { %vm808_vm2 = vc.u32 %v800_v36, %v804_v29  ;;  %v810_v55 = vadd.s32 %v804_v29, %v800_v36  ;;  %v928_v0 = vshll.u32 %v4621_v40, %v3286_v3  ;;  %v931_v5 = vshll.u32 %v4622_v26, %v3286_v3 }
 0x1cd   :  { %v809_v47 = vsel %vm808_vm2, 1, %v4625_v24  ;;  %vm830_vm3 = vc.u32 %v822_v50, %v826_v60  ;;  %v832_v18 = vadd.s32 %v826_v60, %v822_v50  ;;  %v829_v50 = vshrl.u32 %v824_v30, 16 }
 0x1ce   :  { %v811_v17 = vadd.s32 %v809_v47, %v803_v56  ;;  %vm812_vm12 = vc.u32 %v810_v55, %v806_v38  ;;  %v831_v13 = vsel %vm830_vm3, 1, %v4625_v24  ;;  %v930_v31 = vor.u32 %v929_v1, %v928_v0 }
 0x1cf   :  { %v813_v59 = vsel %vm812_vm12, 1, %v4625_v24  ;;  %v833_v29 = vadd.s32 %v831_v13, %v825_v61  ;;  %vm834_vm13 = vc.u32 %v832_v18, %v828_v12  ;;  %v932_v47 = vshrl.u32 %v4623_v7, %v3304_v52 }
 0x1d0   :  { %v815_v41 = vadd.s32 %v813_v59, %v811_v17  ;;  %v835_v36 = vsel %vm834_vm13, 1, %v4625_v24  ;;  %v827_v56 = vshrl.u32 %v823_v35, 16  ;;  %v3365_v57 = vadd.s32 %v832_v18, %v828_v12 }
 0x1d1   :  { %v837_v38 = vadd.s32 %v835_v36, %v833_v29  ;;  %v933_v55 = vor.u32 %v932_v47, %v931_v5  ;;  %vm934_vm14 = vcmp.lt.s32.totalorder %v3339_v58, 1  ;;  %vm937_vm0 = vcmp.lt.s32.totalorder %v3339_v58, 4 }
 0x1d2   :  { %v816_v60 = vadd.s32 %v815_v41, %v805_v34  ;;  %vm936_vm1 = vcmp.lt.s32.totalorder %v3339_v58, 3  ;;  %v942_v3 = vsel %vm934_vm14, %v3341_v19, %v3343_v48  ;;  %v943_v35 = vsel %vm937_vm0, %v930_v31, 920167782 }
 0x1d3   :  { %v838_v61 = vadd.s32 %v837_v38, %v827_v56  ;;  %vm935_vm2 = vcmp.lt.s32.totalorder %v3339_v58, 2  ;;  %v944_v34 = vsel %vm936_vm1, %v3351_v16, %v943_v35  ;;  %v946_v12 = vsel %vm934_vm14, %v3343_v48, %v3351_v16 }
 0x1d4   :  { %v3376_v30 = vadd.s32 %v816_v60, %v807_v4  ;;  %v4626_v18 = vmov 13   ;;  %v786_v1 = vsel %vm780_vm15, %v783_v39, %v785_v8  ;;  %v945_v4 = vsel %vm935_vm2, %v942_v3, %v944_v34 }
 0x1d5   :  { %2279 = vset.pattern.permute.xlu2 %v4626_v18  ;;  %v839_v17 = vadd.s32 %v838_v61, %v829_v50  ;;  %v947_v13 = vsel %vm937_vm0, %v933_v55, 1326507024  ;;  %v952_v59 = vshrl.u32 %v3270_v25, 16  ;;  %v975_v29 = vand.u32 65535, %v945_v4 }
 0x1d6   :  { %1910 = vperm.xlu2 %2279, %v2979_v6   ;;  %vm842_vm3 = vc.u32 %v3376_v30, %v3365_v57  ;;  %v948_v0 = vsel %vm936_vm1, %v930_v31, %v947_v13  ;;  %v976_v8 = vshrl.u32 %v945_v4, 16  ;;  %v1067_v5 = vadd.s32 1, %v3281_v62 }
 0x1d7   :  { %v843_v46 = vadd.s32 1, %v839_v17  ;;  %v949_v39 = vsel %vm935_vm2, %v946_v12, %v948_v0  ;;  %v840_v41 = vmul.u32 %v3265_v63, %v786_v1  ;;  %v624_v47 = vadd.f32 %v3279_v43, %v3274_v44 }
 0x1d8   :  { %v953_v36 = vand.u32 65535, %v949_v39  ;;  %v954_v6 = vshrl.u32 %v949_v39, 16  ;;  %v978_v31 = vmul.u32 %v976_v8, %v3293_v21  ;;  %v979_v50 = vmul.u32 %v975_v29, %v952_v59 }
 0x1d9   :  { %v844_v56 = vsel %vm842_vm3, %v843_v46, %v839_v17  ;;  %v4627_v38 = vperm.slane %v3146_v28, 4  ;;  %v977_v62 = vmul.u32 %v975_v29, %v3293_v21  ;;  %v980_v63 = vmul.u32 %v976_v8, %v952_v59 }
 0x1da   :  { %v845_v55 = vadd.s32 %v844_v56, %v840_v41  ;;  %v956_v61 = vmul.u32 %v954_v6, %v3293_v21  ;;  %v957_v3 = vmul.u32 %v953_v36, %v952_v59  ;;  %v981_v35 = vshll.u32 %v978_v31, 16 }
 0x1db   :  { %v638_v60 = vmul.f32 %v4627_v38, %v2855_v9  ;;  %vm1068_vm15 = vcmp.gt.s32.totalorder %v1067_v5, 0  ;;  %v955_v44 = vmul.u32 %v953_v36, %v3293_v21  ;;  %v958_v43 = vmul.u32 %v954_v6, %v952_v59 }
 0x1dc   :  { %v846_v34 = vadd.s32 536870912, %v845_v55  ;;  %v959_v12 = vshll.u32 %v956_v61, 16  ;;  %v961_v18 = vshll.u32 %v957_v3, 16  ;;  %v983_v1 = vshll.u32 %v979_v50, 16 }
 0x1dd   :  { %vm985_vm12 = vc.u32 %v977_v62, %v981_v35  ;;  %v987_v17 = vadd.s32 %v981_v35, %v977_v62  ;;  %v642_v0 = vadd.f32 %v638_v60, %v624_v47  ;;  %v939_v21 = vsel %vm937_vm0, %v3351_v16, 2102212464 }
 0x1de   :  { %v3412_v4 = vshrl.u32 %v846_v34, 30  ;;  %vm963_vm13 = vc.u32 %v955_v44, %v959_v12  ;;  %v965_v9 = vadd.s32 %v959_v12, %v955_v44  ;;  %v986_v13 = vsel %vm985_vm12, 1, %v4625_v24 }
 0x1df   :  { %v964_v29 = vsel %vm963_vm13, 1, %v4625_v24  ;;  %v988_v46 = vadd.s32 %v986_v13, %v980_v63  ;;  %vm989_vm3 = vc.u32 %v987_v17, %v983_v1  ;;  %v918_v8 = vshrl.u32 %v4618_v2, %v3304_v52 }
 0x1e0   :  { %v848_v39 = vshll.u32 %v3412_v4, 30  ;;  %v966_v59 = vadd.s32 %v964_v29, %v958_v43  ;;  %vm967_vm11 = vc.u32 %v965_v9, %v961_v18  ;;  %v990_v36 = vsel %vm989_vm3, 1, %v4625_v24 }
 0x1e1   :  { %v968_v41 = vsel %vm967_vm11, 1, %v4625_v24  ;;  %v1069_v6 = vsel %vm1068_vm15, %v1067_v5, 0  ;;  %v960_v56 = vshrl.u32 %v956_v61, 16  ;;  %v992_v60 = vadd.s32 %v990_v36, %v988_v46 }
 0x1e2   :  { %v3425_v47 = vsub.s32 %v845_v55, %v848_v39  ;;  %v970_v38 = vadd.s32 %v968_v41, %v966_v59  ;;  %v938_v16 = vsel %vm934_vm14, %v918_v8, %v3341_v19  ;;  %v940_v62 = vsel %vm936_vm1, %v3343_v48, %v939_v21 }
 0x1e3   :  { %v982_v52 = vshrl.u32 %v978_v31, 16  ;;  %v1071_v63 = vand.u32 31, %v1069_v6  ;;  %v962_v5 = vshrl.u32 %v957_v3, 16  ;;  %v4628_v61 = vperm.slane %v3146_v28, 5 }
 0x1e4   :  { %vm850_vm11 = vcmp.lt.s32.totalorder %v3425_v47, 0  ;;  %v851_v35 = vsub.s32 0, %v3425_v47  ;;  %v971_v55 = vadd.s32 %v970_v38, %v960_v56  ;;  %v984_v44 = vshrl.u32 %v979_v50, 16 }
 0x1e5   :  { %v656_v34 = vmul.f32 %v4628_v61, %v2874_v54  ;;  %v993_v43 = vadd.s32 %v992_v60, %v982_v52  ;;  %v1057_v48 = vand.u32 2147483647, %v3245_v10  ;;  %v3442_v31 = vsub.s32 32, %v1071_v63 }
 0x1e6   :  { %v852_v19 = vsel %vm850_vm11, %v851_v35, %v3425_v47  ;;  %v3439_v12 = vadd.s32 %v971_v55, %v962_v5  ;;  %v941_v9 = vsel %vm935_vm2, %v938_v16, %v940_v62  ;;  %v3446_v3 = vadd.s32 %v987_v17, %v983_v1 }
 0x1e7   :  { %v853_v18 = vclz %v852_v19  ;;  %v994_v13 = vadd.s32 %v993_v43, %v984_v44  ;;  %v660_v29 = vadd.f32 %v656_v34, %v642_v0  ;;  %v4629_v54 = vperm.slane %v3146_v28, 6 }
 0x1e8   :  { %vm997_vm14 = vc.u32 %v3439_v12, %v3446_v3  ;;  %v995_v21 = vmul.u32 %v3270_v25, %v941_v9  ;;  %v1064_v59 = vand.u32 8388607, %v1057_v48  ;;  %v3456_v58 = vshrl.u32 %v1069_v6, 5 }
 0x1e9   :  { %v674_v50 = vmul.f32 %v4629_v54, %v2881_v37  ;;  %v2147_v46 = vadd.s32 4294967294, %v853_v18  ;;  %v998_v39 = vadd.s32 1, %v994_v13  ;;  %v1084_v1 = vshrl.u32 %v4622_v26, %v3442_v31 }
 0x1ea   :  { %v1078_v0 = vshrl.u32 %v4620_v32, %v3442_v31  ;;  %v1081_v37 = vshrl.u32 %v4621_v40, %v3442_v31  ;;  %v1083_v8 = vshll.u32 %v4621_v40, %v1071_v63  ;;  %v1075_v25 = vshrl.u32 %v4619_v49, %v3442_v31 }
 0x1eb   :  { %v999_v17 = vsel %vm997_vm14, %v998_v39, %v994_v13  ;;  %vm2148_vm0 = vcmp.lt.s32.totalorder %v2147_v46, 0  ;;  %v1087_v36 = vshrl.u32 %v4623_v7, %v3442_v31  ;;  %v1077_v6 = vshll.u32 %v4619_v49, %v1071_v63 }
 0x1ec   :  { %v1000_v41 = vadd.s32 %v999_v17, %v995_v21  ;;  %v1080_v56 = vshll.u32 %v4620_v32, %v1071_v63  ;;  %v1085_v38 = vor.u32 %v1084_v1, %v1083_v8  ;;  %v678_v60 = vadd.f32 %v674_v50, %v660_v29 }
 0x1ed   :  { %v1074_v62 = vshll.u32 %v4618_v2, %v1071_v63  ;;  %v1086_v52 = vshll.u32 %v4622_v26, %v1071_v63  ;;  %v3473_v35 = vsel %vm2148_vm0, 0, %v2147_v46  ;;  %v1065_v5 = vor.u32 8388608, %v1064_v59 }
 0x1ee   :  { %v1001_v16 = vadd.s32 536870912, %v1000_v41  ;;  %v3475_v55 = vor.u32 %v1078_v0, %v1077_v6  ;;  %v3477_v61 = vor.u32 %v1081_v37, %v1080_v56  ;;  %vm1092_vm1 = vcmp.lt.s32.totalorder %v3456_v58, 4 }
 0x1ef   :  { %v3481_v44 = vor.u32 %v1075_v25, %v1074_v62  ;;  %v1088_v43 = vor.u32 %v1087_v36, %v1086_v52  ;;  %v4630_v19 = vperm.slane %v3146_v28, 7  ;;  %v1098_v63 = vsel %vm1092_vm1, %v1085_v38, 920167782 }
 0x1f0   :  { %v3479_v34 = vshrl.u32 %v1001_v16, 30  ;;  %v861_v9 = vsub.s32 4294967266, %v3473_v35  ;;  %vm1089_vm2 = vcmp.lt.s32.totalorder %v3456_v58, 1  ;;  %vm1091_vm15 = vcmp.lt.s32.totalorder %v3456_v58, 3 }
 0x1f1   :  { %v692_v18 = vmul.f32 %v4630_v19, %v2937_v23  ;;  %v1101_v54 = vsel %vm1089_vm2, %v3475_v55, %v3477_v61  ;;  %v3497_v50 = vshll.u32 %v1065_v5, 8  ;;  %v1097_v28 = vsel %vm1089_vm2, %v3481_v44, %v3475_v55 }
 0x1f2   :  { %v1003_v13 = vshll.u32 %v3479_v34, 30  ;;  %v1099_v46 = vsel %vm1091_vm15, %v3477_v61, %v1098_v63  ;;  %v1102_v39 = vsel %vm1092_vm1, %v1088_v43, 1326507024  ;;  %vm1090_vm12 = vcmp.lt.s32.totalorder %v3456_v58, 2 }
 0x1f3   :  { %v696_v29 = vadd.f32 %v692_v18, %v678_v60  ;;  %v1103_v21 = vsel %vm1091_vm15, %v1085_v38, %v1102_v39  ;;  %v862_v59 = vadd.s32 127, %v861_v9  ;;  %v1100_v0 = vsel %vm1090_vm12, %v1097_v28, %v1099_v46 }
 0x1f4   :  { %v3499_v23 = vsub.s32 %v1000_v41, %v1003_v13  ;;  %v1104_v17 = vsel %vm1090_vm12, %v1101_v54, %v1103_v21  ;;  %v1106_v37 = vand.u32 65535, %v3497_v50  ;;  %v857_v36 = vsub.s32 32, %v3473_v35 }
 0x1f5   :  { %v1108_v8 = vand.u32 65535, %v1104_v17  ;;  %v1109_v41 = vshrl.u32 %v1104_v17, 16  ;;  %v710_v25 = vadd.f32 %v2897_v53, %v696_v29  ;;  %v1107_v56 = vshrl.u32 %v3497_v50, 16 }
 0x1f6   :  { %vm1005_vm13 = vcmp.lt.s32.totalorder %v3499_v23, 0  ;;  %v1006_v1 = vsub.s32 0, %v3499_v23  ;;  %v841_v16 = vadd.s32 %v3365_v57, %v3376_v30  ;;  %v863_v62 = vshll.u32 %v862_v59, 23 }
 0x1f7   :  { %v1111_v60 = vmul.u32 %v1109_v41, %v1106_v37  ;;  %v1112_v52 = vmul.u32 %v1108_v8, %v1107_v56  ;;  %v1131_v5 = vshrl.u32 %v1100_v0, 16  ;;  %v1110_v19 = vmul.u32 %v1108_v8, %v1106_v37 }
 0x1f8   :  { %v1007_v6 = vsel %vm1005_vm13, %v1006_v1, %v3499_v23  ;;  %v1130_v63 = vand.u32 65535, %v1100_v0  ;;  %v722_v53 = vmul.f32 %v4613_v45, %v710_v25  ;;  %v859_v9 = vshrl.u32 %v841_v16, %v857_v36 }
 0x1f9   :  { %v1008_v38 = vclz %v1007_v6  ;;  %v1114_v18 = vshll.u32 %v1111_v60, 16  ;;  %v1113_v13 = vmul.u32 %v1109_v41, %v1107_v56  ;;  %v1116_v28 = vshll.u32 %v1112_v52, 16 }
 0x1fa   :  { %v1133_v39 = vmul.u32 %v1131_v5, %v1106_v37  ;;  %v858_v57 = vshll.u32 %v3425_v47, %v3473_v35  ;;  %v864_v30 = vor.u32 4788187, %v863_v62  ;;  %v1134_v21 = vmul.u32 %v1130_v63, %v1107_v56 }
 0x1fb   :  { %v2150_v43 = vadd.s32 4294967294, %v1008_v38  ;;  %vm1118_vm11 = vc.u32 %v1110_v19, %v1114_v18  ;;  %v1120_v29 = vadd.s32 %v1114_v18, %v1110_v19  ;;  %v3531_v45 = vadd.f32 %v4615_v33, %v722_v53 }
 0x1fc   :  { %v1119_v46 = vsel %vm1118_vm11, 1, %v4625_v24  ;;  %v1136_v17 = vshll.u32 %v1133_v39, 16  ;;  %v860_v0 = vor.u32 %v859_v9, %v858_v57  ;;  %v1132_v25 = vmul.u32 %v1130_v63, %v1106_v37 }
 0x1fd   :  { %vm2151_vm3 = vcmp.lt.s32.totalorder %v2150_v43, 0  ;;  %v1121_v1 = vadd.s32 %v1119_v46, %v1113_v13  ;;  %vm1122_vm14 = vc.u32 %v1120_v29, %v1116_v28  ;;  %v865_v36 = vand.u32 2147483647, %v864_v30 }
 0x1fe   :  { %v1011_v54 = vsel %vm2151_vm3, 0, %v2150_v43  ;;  %v1123_v8 = vsel %vm1122_vm14, 1, %v4625_v24  ;;  %v1115_v6 = vshrl.u32 %v1111_v60, 16  ;;  %v1135_v38 = vmul.u32 %v1131_v5, %v1107_v56 }
 0x1ff   :  { %v1016_v59 = vsub.s32 4294967266, %v1011_v54  ;;  %v1125_v41 = vadd.s32 %v1123_v8, %v1121_v1  ;;  %v1138_v43 = vshll.u32 %v1134_v21, 16  ;;  %vm1140_vm0 = vc.u32 %v1132_v25, %v1136_v17 }
 0x200   :  { %v1142_v47 = vadd.s32 %v1136_v17, %v1132_v25  ;;  %v3536_v35 = vmul.f32 %v4617_v22, %v3531_v45  ;;  %v867_v62 = vcvt.s32.f32 %v860_v0  ;;  %v1141_v33 = vsel %vm1140_vm0, 1, %v4625_v24 }
 0x201   :  { %v1017_v16 = vadd.s32 127, %v1016_v59  ;;  %v1126_v19 = vadd.s32 %v1125_v41, %v1115_v6  ;;  %v1012_v18 = vsub.s32 32, %v1011_v54  ;;  %v1094_v37 = vsel %vm1092_vm1, %v3477_v61, 2102212464 }
 0x202   :  { %v1143_v63 = vadd.s32 %v1141_v33, %v1135_v38  ;;  %vm1144_vm13 = vc.u32 %v1142_v47, %v1138_v43  ;;  %v868_v56 = vmul.f32 %v867_v62, %v865_v36  ;;  %v1073_v60 = vshrl.u32 %v4618_v2, %v3442_v31 }
 0x203   :  { %v1117_v5 = vshrl.u32 %v1112_v52, 16  ;;  %v1145_v53 = vsel %vm1144_vm13, 1, %v4625_v24  ;;  %v996_v22 = vadd.s32 %v3446_v3, %v3439_v12  ;;  %v1018_v9 = vshll.u32 %v1017_v16, 23 }
 0x204   :  { %v1137_v13 = vshrl.u32 %v1133_v39, 16  ;;  %v1147_v29 = vadd.s32 %v1145_v53, %v1143_v63  ;;  %v1093_v28 = vsel %vm1089_vm2, %v1073_v60, %v3481_v44  ;;  %v1095_v61 = vsel %vm1091_vm15, %v3475_v55, %v1094_v37 }
 0x205   :  { %v3553_v46 = vadd.s32 %v1126_v19, %v1117_v5  ;;  %v1014_v31 = vshrl.u32 %v996_v22, %v1012_v18  ;;  %v1139_v52 = vshrl.u32 %v1134_v21, 16  ;;  %v869_v30 = vxor.u32 2147483648, %v868_v56 }
 0x206   :  { %v1148_v57 = vadd.s32 %v1147_v29, %v1137_v13  ;;  %v3555_v59 = vadd.s32 %v1142_v47, %v1138_v43  ;;  %v1215_v12 = vand.u32 2139095040, %v3536_v35  ;;  %v1013_v3 = vshll.u32 %v3499_v23, %v1011_v54 }
 0x207   :  { %v1019_v39 = vor.u32 4788187, %v1018_v9  ;;  %v1096_v44 = vsel %vm1090_vm12, %v1093_v28, %v1095_v61  ;;  %vm749_vm2 = vcmp.lt.s32.totalorder %v3237_v42, 0  ;;  %v4631_v58 = vand.u32 2147483647, %v3237_v42 }
 0x208   :  { %v1149_v1 = vadd.s32 %v1148_v57, %v1139_v52  ;;  %vm1152_vm1 = vc.u32 %v3553_v46, %v3555_v59  ;;  %v1216_v55 = vshrl.u32 %v1215_v12, 23  ;;  %v1015_v21 = vor.u32 %v1014_v31, %v1013_v3 }
 0x209   :  { %v870_v0 = vsel %vm749_vm2, %v869_v30, %v868_v56  ;;  %v1150_v8 = vmul.u32 %v3497_v50, %v1096_v44  ;;  %v1020_v23 = vand.u32 2147483647, %v1019_v39  ;;  %vm3569_vm15 = vcmp.le.f32.partialorder %v4631_v58, 0.7853982 }
 0x20a   :  { %v1153_v17 = vadd.s32 1, %v1149_v1  ;;  %v2155_v41 = vadd.s32 4294967169, %v1216_v55  ;;  %v3576_v38 = vsel %vm3569_vm15, %v3237_v42, %v870_v0  ;;  %v1022_v16 = vcvt.s32.f32 %v1015_v21 }
 0x20b   :  { %v3580_v62 = vmul.f32 %v3576_v38, %v3576_v38  ;;  %v1212_v18 = vand.u32 2147483647, %v3536_v35  ;;  %v4634_v22 = vand.u32 2147483647, %v3241_v27  ;;  %vm904_vm11 = vcmp.lt.s32.totalorder %v3241_v27, 0 }
 0x20c   :  { %v1154_v54 = vsel %vm1152_vm1, %v1153_v17, %v1149_v1  ;;  %v1222_v6 = vadd.s32 1, %v2155_v41  ;;  %v1023_v50 = vmul.f32 %v1022_v16, %v1020_v23  ;;  %v871_v29 = vsub.s32 4, %v3412_v4 }
 0x20d   :  { %v1155_v36 = vadd.s32 %v1154_v54, %v1150_v8  ;;  %v876_v60 = vmul.f32 -0.001358992, %v3580_v62  ;;  %v1219_v53 = vand.u32 8388607, %v1212_v18  ;;  %vm3593_vm3 = vcmp.le.f32.partialorder %v4634_v22, 0.7853982 }
 0x20e   :  { %vm1223_vm12 = vcmp.gt.s32.totalorder %v1222_v6, 0  ;;  %v1024_v63 = vxor.u32 2147483648, %v1023_v50  ;;  %v883_v28 = vmul.f32 -0.00019511016, %v3580_v62  ;;  %vm3666_vm9 = vcmp.le.f32.partialorder %v1057_v48, 0.7853982 }
 0x20f   :  { %v1156_v43 = vadd.s32 536870912, %v1155_v36  ;;  %v1224_v47 = vsel %vm1223_vm12, %v1222_v6, 0  ;;  %v877_v52 = vadd.f32 0.041655596, %v876_v60  ;;  %v1220_v39 = vor.u32 8388608, %v1219_v53 }
 0x210   :  { %v1226_v33 = vand.u32 31, %v1224_v47  ;;  %v1025_v61 = vsel %vm904_vm11, %v1024_v63, %v1023_v50  ;;  %v3616_v21 = vshrl.u32 %v1224_v47, 5  ;;  %v884_v8 = vadd.f32 0.008332121, %v883_v28 }
 0x211   :  { %v3582_v19 = vshrl.u32 %v1156_v43, 30  ;;  %v3614_v55 = vsel %vm3593_vm3, %v3241_v27, %v1025_v61 }
 0x212   :  { %v3586_v56 = vsub.s32 32, %v1226_v33  ;;  %v1229_v44 = vshll.u32 %v4618_v2, %v1226_v33  ;;  %v1232_v17 = vshll.u32 %v4619_v49, %v1226_v33  ;;  %v1238_v0 = vshll.u32 %v4621_v40, %v1226_v33 }
 0x213   :  { %v1158_v37 = vshll.u32 %v3582_v19, 30  ;;  %v1235_v54 = vshll.u32 %v4620_v32, %v1226_v33  ;;  %v1241_v6 = vshll.u32 %v4622_v26, %v1226_v33  ;;  %v3628_v43 = vmul.f32 %v3614_v55, %v3614_v55 }
 0x214   :  { %v1230_v31 = vshrl.u32 %v4619_v49, %v3586_v56  ;;  %v1233_v30 = vshrl.u32 %v4620_v32, %v3586_v56  ;;  %v1239_v12 = vshrl.u32 %v4622_v26, %v3586_v56  ;;  %v1236_v1 = vshrl.u32 %v4621_v40, %v3586_v56 }
 0x215   :  { %v1159_v5 = vsub.s32 %v1155_v36, %v1158_v37  ;;  %v1242_v16 = vshrl.u32 %v4623_v7, %v3586_v56  ;;  %v1151_v49 = vadd.s32 %v3555_v59, %v3553_v46  ;;  %vm1244_vm13 = vcmp.lt.s32.totalorder %v3616_v21, 1 }
 0x216   :  { %v1231_v23 = vor.u32 %v1230_v31, %v1229_v44  ;;  %v3621_v58 = vor.u32 %v1233_v30, %v1232_v17  ;;  %v1240_v36 = vor.u32 %v1239_v12, %v1238_v0  ;;  %v1237_v40 = vor.u32 %v1236_v1, %v1235_v54 }
 0x217   :  { %vm1160_vm14 = vcmp.lt.s32.totalorder %v1159_v5, 0  ;;  %v1161_v13 = vsub.s32 0, %v1159_v5  ;;  %v1243_v47 = vor.u32 %v1242_v16, %v1241_v6  ;;  %v3633_v32 = vshll.u32 %v1220_v39, 8 }
 0x218   :  { %vm1245_vm1 = vcmp.lt.s32.totalorder %v3616_v21, 2  ;;  %vm1247_vm12 = vcmp.lt.s32.totalorder %v3616_v21, 4  ;;  %v1252_v46 = vsel %vm1244_vm13, %v1231_v23, %v3621_v58  ;;  %v1256_v53 = vsel %vm1244_vm13, %v3621_v58, %v1237_v40 }
 0x219   :  { %v1162_v57 = vsel %vm1160_vm14, %v1161_v13, %v1159_v5  ;;  %vm1246_vm14 = vcmp.lt.s32.totalorder %v3616_v21, 3  ;;  %v1253_v59 = vsel %vm1247_vm12, %v1240_v36, 920167782  ;;  %v1038_v22 = vmul.f32 -0.00019511016, %v3628_v43 }
 0x21a   :  { %v1163_v3 = vclz %v1162_v57  ;;  %v1254_v60 = vsel %vm1246_vm14, %v1237_v40, %v1253_v59  ;;  %v1257_v28 = vsel %vm1247_vm12, %v1243_v47, 1326507024  ;;  %v1261_v12 = vand.u32 65535, %v3633_v32 }
 0x21b   :  { %v1255_v13 = vsel %vm1245_vm1, %v1252_v46, %v1254_v60  ;;  %v1258_v57 = vsel %vm1246_vm14, %v1240_v36, %v1257_v28  ;;  %v885_v44 = vmul.f32 %v884_v8, %v3580_v62  ;;  %v1039_v54 = vadd.f32 0.008332121, %v1038_v22 }
 0x21c   :  { %v2153_v41 = vadd.s32 4294967294, %v1163_v3  ;;  %v1285_v30 = vand.u32 65535, %v1255_v13  ;;  %v1262_v3 = vshrl.u32 %v3633_v32, 16  ;;  %v1286_v39 = vshrl.u32 %v1255_v13, 16 }
 0x21d   :  { %v1228_v36 = vshrl.u32 %v4618_v2, %v3586_v56  ;;  %v1249_v28 = vsel %vm1247_vm12, %v1237_v40, 2102212464  ;;  %vm890_vm12 = vweird.f32 %v3237_v42 }
 0x21e   :  { %vm2154_vm0 = vcmp.lt.s32.totalorder %v2153_v41, 0  ;;  %v1288_v6 = vmul.u32 %v1286_v39, %v1261_v12  ;;  %v1289_v16 = vmul.u32 %v1285_v30, %v1262_v3  ;;  %v1287_v48 = vmul.u32 %v1285_v30, %v1261_v12 }
 0x21f   :  { %v1166_v50 = vsel %vm2154_vm0, 0, %v2153_v41  ;;  %vm1059_vm0 = vcmp.lt.s32.totalorder %v3245_v10, 0  ;;  %v1248_v8 = vsel %vm1244_vm13, %v1228_v36, %v1231_v23  ;;  %v886_v36 = vadd.f32 -0.16666654, %v885_v44 }
 0x220   :  { %v1167_v37 = vsub.s32 32, %v1166_v50  ;;  %v1171_v26 = vsub.s32 4294967266, %v1166_v50  ;;  %v1168_v7 = vshll.u32 %v1159_v5, %v1166_v50  ;;  %v3649_v5 = vmul.f32 %v877_v52, %v3580_v62 }
 0x221   :  { %v1259_v52 = vsel %vm1245_vm1, %v1256_v53, %v1258_v57  ;;  %v1293_v53 = vshll.u32 %v1289_v16, 16 }
 0x222   :  { %v1169_v33 = vshrl.u32 %v1151_v49, %v1167_v37  ;;  %v1172_v63 = vadd.s32 127, %v1171_v26  ;;  %v1263_v0 = vand.u32 65535, %v1259_v52  ;;  %v1264_v41 = vshrl.u32 %v1259_v52, 16 }
 0x223   :  { %v1290_v26 = vmul.u32 %v1286_v39, %v1262_v3 }
 0x224   :  { %v1170_v61 = vor.u32 %v1169_v33, %v1168_v7  ;;  %v1173_v31 = vshll.u32 %v1172_v63, 23  ;;  %v1266_v47 = vmul.u32 %v1264_v41, %v1261_v12  ;;  %v1267_v37 = vmul.u32 %v1263_v0, %v1262_v3 }
 0x225   :  { %v1291_v7 = vshll.u32 %v1288_v6, 16  ;;  %v1265_v59 = vmul.u32 %v1263_v0, %v1261_v12  ;;  %v1268_v33 = vmul.u32 %v1264_v41, %v1262_v3  ;;  %v1292_v3 = vshrl.u32 %v1288_v6, 16 }
 0x226   :  { %v1174_v17 = vor.u32 4788187, %v1173_v31  ;;  %v1177_v50 = vcvt.s32.f32 %v1170_v61  ;;  %v1269_v63 = vshll.u32 %v1266_v47, 16  ;;  %v1271_v60 = vshll.u32 %v1267_v37, 16 }
 0x227   :  { %vm1295_vm8 = vc.u32 %v1287_v48, %v1291_v7  ;;  %v1297_v2 = vadd.s32 %v1291_v7, %v1287_v48  ;;  %v1270_v0 = vshrl.u32 %v1266_v47, 16  ;;  %v1181_v6 = vsub.s32 4, %v3582_v19 }
 0x228   :  { %v1175_v49 = vand.u32 2147483647, %v1174_v17  ;;  %vm1273_vm10 = vc.u32 %v1265_v59, %v1269_v63  ;;  %v1275_v22 = vadd.s32 %v1269_v63, %v1265_v59  ;;  %v1296_v13 = vsel %vm1295_vm8, 1, %v4625_v24 }
 0x229   :  { %v1274_v23 = vsel %vm1273_vm10, 1, %v4625_v24  ;;  %v1298_v61 = vadd.s32 %v1296_v13, %v1290_v26  ;;  %vm1299_vm13 = vc.u32 %v1297_v2, %v1293_v53  ;;  %v1250_v17 = vsel %vm1246_vm14, %v3621_v58, %v1249_v28 }
 0x22a   :  { %v1178_v46 = vmul.f32 %v1177_v50, %v1175_v49  ;;  %v1276_v57 = vadd.s32 %v1274_v23, %v1268_v33  ;;  %vm1277_vm7 = vc.u32 %v1275_v22, %v1271_v60  ;;  %v1300_v30 = vsel %vm1299_vm13, 1, %v4625_v24 }
 0x22b   :  { %v1278_v12 = vsel %vm1277_vm7, 1, %v4625_v24  ;;  %v1302_v39 = vadd.s32 %v1300_v30, %v1298_v61  ;;  %v1031_v49 = vmul.f32 -0.001358992, %v3628_v43  ;;  %v1294_v50 = vshrl.u32 %v1289_v16, 16 }
 0x22c   :  { %v1179_v56 = vxor.u32 2147483648, %v1178_v46  ;;  %v1280_v41 = vadd.s32 %v1278_v12, %v1276_v57  ;;  %v1040_v33 = vmul.f32 %v1039_v54, %v3628_v43  ;;  %v1251_v63 = vsel %vm1245_vm1, %v1248_v8, %v1250_v17 }
 0x22d   :  { %v1303_v48 = vadd.s32 %v1302_v39, %v1292_v3  ;;  %v3695_v44 = vadd.s32 %v1297_v2, %v1293_v53  ;;  %v872_v16 = vsel %vm749_vm2, %v871_v29, %v3412_v4  ;;  %v887_v54 = vmul.f32 %v886_v36, %v3580_v62 }
 0x22e   :  { %v1180_v31 = vsel %vm1059_vm0, %v1179_v56, %v1178_v46  ;;  %v1272_v46 = vshrl.u32 %v1267_v37, 16  ;;  %v1281_v59 = vadd.s32 %v1280_v41, %v1270_v0  ;;  %v1305_v21 = vmul.u32 %v3633_v32, %v1251_v63 }
 0x22f   :  { %v1183_v52 = vsel %vm3666_vm9, %v3245_v10, %v1180_v31  ;;  %v1304_v60 = vadd.s32 %v1303_v48, %v1294_v50  ;;  %v879_v8 = vadd.f32 -0.4999988, %v3649_v5  ;;  %v1026_v53 = vsub.s32 4, %v3479_v34 }
 0x230   :  { %v1185_v40 = vmul.f32 %v1183_v52, %v1183_v52  ;;  %v3693_v56 = vadd.s32 %v1281_v59, %v1272_v46  ;;  %v1032_v2 = vadd.f32 0.041655596, %v1031_v49  ;;  %v1041_v23 = vadd.f32 -0.16666654, %v1040_v33 }
 0x231   :  { %v1308_v37 = vadd.s32 1, %v1304_v60  ;;  %v1182_v4 = vsel %vm1059_vm0, %v1181_v6, %v3582_v19  ;;  %v874_v32 = vsel %vm3569_vm15, 0, %v872_v16  ;;  %v888_v57 = vadd.f32 1.0, %v887_v54 }
 0x232   :  { %v1186_v26 = vmul.f32 -0.001358992, %v1185_v40  ;;  %v1193_v7 = vmul.f32 -0.00019511016, %v1185_v40  ;;  %vm1307_vm7 = vc.u32 %v3693_v56, %v3695_v44  ;;  %v1027_v5 = vsel %vm904_vm11, %v1026_v53, %v3479_v34 }
 0x233   :  { %v1309_v28 = vsel %vm1307_vm7, %v1308_v37, %v1304_v60  ;;  %v1033_v3 = vmul.f32 %v1032_v2, %v3628_v43  ;;  %v1184_v39 = vsel %vm3666_vm9, 0, %v1182_v4  ;;  %v880_v19 = vmul.f32 %v879_v8, %v3580_v62  ;;  %v3740_v2 = vld [vmem:[%s4441_s8] sm:$0xff]  ;;  %v3743_v4 = vpop.permute.xlu1 %1612 }
 0x234   :  { %v1187_v58 = vadd.f32 0.041655596, %v1186_v26  ;;  %v1194_v47 = vadd.f32 0.008332121, %v1193_v7  ;;  %v1310_v61 = vadd.s32 %v1309_v28, %v1305_v21  ;;  %v1042_v17 = vmul.f32 %v1041_v23, %v3628_v43  ;;  %v3729_v21 = vpop.permute.xlu0 %1694 }
 0x235   :  { %v891_v25 = vadd.s32 3, %v874_v32  ;;  %v889_v49 = vmul.f32 %v888_v57, %v3576_v38  ;;  %v1029_v50 = vsel %vm3593_vm3, 0, %v1027_v5  ;;  %v1201_v34 = vadd.s32 3, %v1184_v39  ;;  %v3746_v57 = vpop.permute.xlu2 %1675 }
 0x236   :  { %v1188_v22 = vmul.f32 %v1187_v58, %v1185_v40  ;;  %v1195_v13 = vmul.f32 %v1194_v47, %v1185_v40  ;;  %v1311_v12 = vadd.s32 536870912, %v1310_v61  ;;  %v1034_v26 = vadd.f32 -0.4999988, %v1033_v3 }
 0x237   :  { %v881_v7 = vadd.f32 1.0, %v880_v19  ;;  %v1043_v46 = vadd.f32 1.0, %v1042_v17  ;;  %v892_v59 = vand.u32 3, %v891_v25  ;;  %v1046_v33 = vadd.s32 3, %v1029_v50 }
 0x238   :  { %v1196_v29 = vadd.f32 -0.16666654, %v1195_v13  ;;  %v1189_v31 = vadd.f32 -0.4999988, %v1188_v22  ;;  %v3721_v41 = vshrl.u32 %v1311_v12, 30  ;;  %v895_v63 = vxor.u32 2147483648, %v889_v49 }
 0x239   :  { %v1202_v60 = vand.u32 3, %v1201_v34  ;;  %v1035_v38 = vmul.f32 %v1034_v26, %v3628_v43  ;;  %v898_v9 = vxor.u32 2147483648, %v881_v7  ;;  %v1044_v47 = vmul.f32 %v1043_v46, %v3614_v55  ;;  %v3734_v55 = vld [vmem:[%s4441_s8 + $0x8] sm:$0xff] }
 0x23a   :  { %v1197_v30 = vmul.f32 %v1196_v29, %v1185_v40  ;;  %v1190_v36 = vmul.f32 %v1189_v31, %v1185_v40  ;;  %v1313_v48 = vshll.u32 %v3721_v41, 30  ;;  %vm894_vm9 = vcmp.eq.s32.totalorder %v892_v59, 0 }
 0x23b   :  { %v896_v37 = vsel %vm894_vm9, %v881_v7, %v895_v63  ;;  %v1047_v22 = vand.u32 3, %v1046_v33  ;;  %vm1204_vm10 = vcmp.eq.s32.totalorder %v1202_v60, 0  ;;  %v2391_v13 = vmov 14   ;;  %v3756_v46 = vpop.permute.xlu1 %1644 }
 0x23c   :  { %v1198_v0 = vadd.f32 1.0, %v1197_v30  ;;  %v1314_v62 = vsub.s32 %v1310_v61, %v1313_v48  ;;  %v1191_v6 = vadd.f32 1.0, %v1190_v36  ;;  %2281 = vset.pattern.permute.xlu1 %v2391_v13  ;;  %2280 = vset.pattern.permute.xlu0 %v2391_v13  ;;  %vm897_vm2 = vcmp.eq.s32.totalorder %v892_v59, 2 }
 0x23d   :  { %v1036_v8 = vadd.f32 1.0, %v1035_v38  ;;  %1928 = vperm.xlu1 %2281, %v3734_v55   ;;  %1924 = vperm.xlu0 %2280, %v3740_v2   ;;  %vm893_vm15 = vcmp.lt.s32.totalorder %v892_v59, 2  ;;  %v899_v28 = vsel %vm897_vm2, %v898_v9, %v889_v49  ;;  %v1050_v23 = vxor.u32 2147483648, %v1044_v47  ;;  %v3760_v59 = vpop.permute.xlu2 %1690 }
 0x23e   :  { %v1199_v1 = vmul.f32 %v1198_v0, %v1183_v52  ;;  %vm1315_vm8 = vcmp.lt.s32.totalorder %v1314_v62, 0  ;;  %v1316_v40 = vsub.s32 0, %v1314_v62  ;;  %v1208_v54 = vxor.u32 2147483648, %v1191_v6 }
 0x23f   :  { %vm1207_vm3 = vcmp.eq.s32.totalorder %v1202_v60, 2  ;;  %v900_v29 = vsel %vm893_vm15, %v896_v37, %v899_v28  ;;  %vm1203_vm11 = vcmp.lt.s32.totalorder %v1202_v60, 2  ;;  %vm1049_vm14 = vcmp.eq.s32.totalorder %v1047_v22, 0 }
 0x240   :  { %v1205_v58 = vxor.u32 2147483648, %v1199_v1  ;;  %v1317_v16 = vsel %vm1315_vm8, %v1316_v40, %v1314_v62  ;;  %v1209_v61 = vsel %vm1207_vm3, %v1208_v54, %v1199_v1  ;;  %v1053_v30 = vxor.u32 2147483648, %v1036_v8  ;;  %v4639_v1 = vld [vmem:[#allocation13_spill] sm:$0xff] }
 0x241   :  { %v1318_v52 = vclz %v1317_v16  ;;  %v1306_v12 = vadd.s32 %v3695_v44, %v3693_v56  ;;  %v901_v39 = vsel %vm890_vm12, nan, %v900_v29  ;;  %v1051_v19 = vsel %vm1049_vm14, %v1036_v8, %v1050_v23 }
 0x242   :  { %v1206_v53 = vsel %vm1204_vm10, %v1191_v6, %v1205_v58  ;;  %vm1200_vm0 = vweird.f32 %v3245_v10  ;;  %vm1048_vm13 = vcmp.lt.s32.totalorder %v1047_v22, 2  ;;  %vm1052_vm7 = vcmp.eq.s32.totalorder %v1047_v22, 2  ;;  %v3753_v10 = vpop.permute.xlu0 %1376 }
 0x243   :  { %v2156_v43 = vadd.s32 4294967294, %v1318_v52  ;;  %v1210_v31 = vsel %vm1203_vm11, %v1206_v53, %v1209_v61  ;;  %v1054_v42 = vsel %vm1052_vm7, %v1053_v30, %v1044_v47  ;;  %v1367_v34 = vmul.f32 %v901_v39, %v901_v39 }
 0x244   :  { %v1211_v17 = vsel %vm1200_vm0, nan, %v1210_v31  ;;  %v2392_v48 = vmov 15   ;;  %v1055_v56 = vsel %vm1048_vm13, %v1051_v19, %v1054_v42  ;;  %vm1045_vm8 = vweird.f32 %v3241_v27 }
 0x245   :  { %vm2157_vm1 = vcmp.lt.s32.totalorder %v2156_v43, 0  ;;  %2282 = vset.pattern.permute.xlu2 %v2392_v48  ;;  %2283 = vset.pattern.permute.xlu1 %v2392_v48  ;;  %v1369_v44 = vmul.f32 %v1211_v17, %v1211_v17  ;;  %v1379_v7 = vmul.f32 %v4639_v1, %v1367_v34  ;;  %v1056_v33 = vsel %vm1045_vm8, nan, %v1055_v56  ;;  %v3786_v52 = vpop.permute.xlu2 %1712 }
 0x246   :  { %v1321_v32 = vsel %vm2157_vm1, 0, %v2156_v43  ;;  %1942 = vperm.xlu2 %2282, %v3740_v2   ;;  %1946 = vperm.xlu1 %2283, %v3734_v55   ;;  %v1368_v58 = vmul.f32 %v1056_v33, %v1056_v33  ;;  %vm1214_vm9 = vcmp.lt.s32.totalorder %v3536_v35, 0  ;;  %vm3775_vm10 = vcmp.le.f32.partialorder %v1212_v18, 0.7853982 }
 0x247   :  { %v1322_v5 = vsub.s32 32, %v1321_v32  ;;  %v1326_v3 = vsub.s32 4294967266, %v1321_v32  ;;  %v1323_v0 = vshll.u32 %v1314_v62, %v1321_v32  ;;  %v1381_v62 = vmul.f32 %v3753_v10, %v1369_v44 }
 0x248   :  { %v3763_v60 = vadd.f32 %v1379_v7, %v3227_v15  ;;  %v1336_v47 = vsub.s32 4, %v3721_v41  ;;  %v1380_v54 = vmul.f32 %v4639_v1, %v1368_v58  ;;  %vm1355_vm11 = vweird.f32 %v3536_v35 }
 0x249   :  { %v1324_v25 = vshrl.u32 %v1306_v12, %v1322_v5  ;;  %v1327_v36 = vadd.s32 127, %v1326_v3  ;;  %v3766_v40 = vadd.f32 %v1381_v62, %v3233_v14  ;;  %v3779_v14 = vpop.permute.xlu1 %1664  ;;  %vm4666_vm1 = vcmp.lt.s32.totalorder %v2990_v11, 1 }
 0x24a   :  { %v1337_v18 = vsel %vm1214_vm9, %v1336_v47, %v3721_v41  ;;  %v3790_v8 = vadd.f32 %v1380_v54, %v3230_v20  ;;  %v3880_v47 = vpop.permute.xlu0 %1516  ;;  %vm4670_vm12 = vmmov %vm4666_vm1  ;;  %vm4678_vm0 = vcmp.lt.s32.totalorder %v2990_v11, 113  ;;  %vm4683_vm7 = vcmp.lt.s32.totalorder %v2990_v11, 112 }
 0x24b   :  { %v1325_v49 = vor.u32 %v1324_v25, %v1323_v0  ;;  %v1328_v50 = vshll.u32 %v1327_v36, 23  ;;  %v1339_v28 = vsel %vm3775_vm10, 0, %v1337_v18  ;;  %v2396_v18 = vmov 19   ;;  %vm4673_vm14 = vmmov %vm4666_vm1 }
 0x24c   :  { %v1356_v41 = vadd.s32 3, %v1339_v28  ;;  %vm4681_vm13 = vmmov %vm4678_vm0 }
 0x24d   :  { %v1329_v26 = vor.u32 4788187, %v1328_v50  ;;  %v1332_v63 = vcvt.s32.f32 %v1325_v49  ;;  %v3798_v31 = vpop.permute.xlu2 %1730  ;;  %vm4685_vm8 = vmmov %vm4683_vm7 }
 0x24e   :  { %1391 = vrot.lane.b32.xlu2 %v3766_v40, %s2380_s29  ;;  %1389 = vrot.lane.b32.xlu1 %v3763_v60, %s2380_s29  ;;  %v1357_v39 = vand.u32 3, %v1356_v41  ;;  %v2398_v41 = vmov 22  }
 0x24f   :  { %v1330_v6 = vand.u32 2147483647, %v1329_v26 }
 0x250   :  { %vm1359_vm2 = vcmp.eq.s32.totalorder %v1357_v39, 0  ;;  %vm1362_vm15 = vcmp.eq.s32.totalorder %v1357_v39, 2  ;;  %vm1358_vm3 = vcmp.lt.s32.totalorder %v1357_v39, 2 }
 0x251   :  { %v1333_v38 = vmul.f32 %v1332_v63, %v1330_v6  ;;  %v3796_v61 = vpop.permute.xlu1 %1680 }
 0x253   :  { %v1334_v9 = vxor.u32 2147483648, %v1333_v38 }
 0x255   :  { %v1335_v15 = vsel %vm1214_vm9, %v1334_v9, %v1333_v38  ;;  %v3804_v36 = vpop.permute.xlu2 %1762  ;;  %v2393_v9 = vmov 17  }
 0x256   :  { %v1338_v16 = vsel %vm3775_vm10, %v3536_v35, %v1335_v15  ;;  %1393 = vrot.lane.b32.xlu1 %v3790_v8, %s2380_s29 }
 0x257   :  { %v1340_v37 = vmul.f32 %v1338_v16, %v1338_v16  ;;  %2286 = vset.pattern.permute.xlu1 %v2393_v9 }
 0x259   :  { %v1341_v22 = vmul.f32 -0.001358992, %v1340_v37  ;;  %v1348_v13 = vmul.f32 -0.00019511016, %v1340_v37  ;;  %v3802_v0 = vpop.permute.xlu1 %1708 }
 0x25b   :  { %v1342_v53 = vadd.f32 0.041655596, %v1341_v22  ;;  %v1349_v43 = vadd.f32 0.008332121, %v1348_v13  ;;  %v2395_v22 = vmov 16   ;;  %v3895_v13 = vpop.permute.xlu0 %1744 }
 0x25c   :  { %2284 = vset.pattern.permute.xlu2 %v2395_v22  ;;  %2285 = vset.pattern.permute.xlu0 %v2395_v22 }
 0x25d   :  { %v1343_v23 = vmul.f32 %v1342_v53, %v1340_v37  ;;  %v1350_v29 = vmul.f32 %v1349_v43, %v1340_v37  ;;  %v3819_v35 = vpop.permute.xlu2 %1780 }
 0x25e   :  { %1421 = vrot.lane.b32.xlu1 %v3766_v40, %s2379_s28 }
 0x25f   :  { %v1344_v32 = vadd.f32 -0.4999988, %v1343_v23  ;;  %v1351_v30 = vadd.f32 -0.16666654, %v1350_v29  ;;  %v2397_v23 = vmov 20  }
 0x261   :  { %v1345_v12 = vmul.f32 %v1344_v32, %v1340_v37  ;;  %v1352_v20 = vmul.f32 %v1351_v30, %v1340_v37  ;;  %v3809_v56 = vpop.permute.xlu1 %1726 }
 0x263   :  { %v1346_v5 = vadd.f32 1.0, %v1345_v12  ;;  %v1353_v3 = vadd.f32 1.0, %v1352_v20  ;;  %v3906_v28 = vpop.permute.xlu0 %1784 }
 0x264   :  { %4652 = vst [vmem:[#allocation47_spill] sm:$0xff] %v3906_v28 }
 0x265   :  { %v1354_v19 = vmul.f32 %v1353_v3, %v1338_v16  ;;  %v1363_v17 = vxor.u32 2147483648, %v1346_v5  ;;  %v2394_v16 = vmov 18  }
 0x266   :  { %1453 = vrot.lane.b32.xlu1 %v3766_v40, %s2378_s6 }
 0x267   :  { %v1360_v25 = vxor.u32 2147483648, %v1354_v19  ;;  %v1364_v49 = vsel %vm1362_vm15, %v1363_v17, %v1354_v19  ;;  %v2399_v19 = vmov 23   ;;  %vm4693_vm15 = vmmov %vm4678_vm0 }
 0x269   :  { %v1361_v42 = vsel %vm1359_vm2, %v1346_v5, %v1360_v25  ;;  %v3823_v1 = vpop.permute.xlu1 %1748  ;;  %vm4691_vm2 = vmmov %vm4678_vm0 }
 0x26a   :  { %v1365_v50 = vsel %vm1358_vm3, %v1361_v42, %v1364_v49  ;;  %4642 = vst [vmem:[#allocation8_spill] sm:$0xff] %v3823_v1  ;;  %v57_v49 = vld [vmem:[%s4437_s4 + $0x8] sm:$0xff]  ;;  %v4674_v1 = vld [vmem:[#allocation37_spill] sm:$0xff]  ;;  %vm4694_vm3 = vcmp.lt.s32.totalorder %v2990_v11, 111 }
 0x26b   :  { %v1366_v34 = vsel %vm1355_vm11, nan, %v1365_v50  ;;  %v3914_v30 = vpop.permute.xlu0 %1834  ;;  %vm4695_vm11 = vmmov %vm4694_vm3 }
 0x26c   :  { %v1370_v48 = vmul.f32 %v1366_v34, %v1366_v34  ;;  %v2400_v34 = vmov 21  }
 0x26e   :  { %v1382_v44 = vmul.f32 %v3753_v10, %v1370_v48  ;;  %1485 = vrot.lane.b32.xlu1 %v3766_v40, %s2381_s30 }
 0x270   :  { %v3813_v26 = vadd.f32 %v1382_v44, %v3531_v45  ;;  %v3829_v45 = vpop.permute.xlu2 %1802  ;;  %v4656_v44 = vld [vmem:[#allocation33_spill] sm:$0xff] }
 0x271   :  { %4643 = vst [vmem:[#allocation9_spill] sm:$0xff] %v3829_v45  ;;  %v3833_v10 = vpop.permute.xlu1 %1766 }
 0x272   :  { %1425 = vrot.lane.b32.xlu0 %v3813_v26, %s2379_s28  ;;  %1395 = vrot.lane.b32.xlu2 %v3813_v26, %s2380_s29  ;;  %4644 = vst [vmem:[#allocation21_spill] sm:$0xff] %v3833_v10 }
 0x273   :  { %v3926_v39 = vpop.permute.xlu0 %1874 }
 0x274   :  { %4654 = vst [vmem:[#allocation49_spill] sm:$0xff] %v3926_v39 }
 0x276   :  { %1533 = vrot.lane.b32.xlu1 %v3766_v40, %s2383_s11 }
 0x278   :  { %v3843_v62 = vpop.permute.xlu2 %1820 }
 0x279   :  { %v3841_v7 = vpop.permute.xlu1 %1798  ;;  %4645 = vst [vmem:[#allocation10_spill] sm:$0xff] %v3843_v62  ;;  %v4665_v62 = vld [vmem:[#allocation16_spill] sm:$0xff] }
 0x27a   :  { %1451 = vrot.lane.b32.xlu0 %v3763_v60, %s2378_s6  ;;  %1419 = vrot.lane.b32.xlu2 %v3763_v60, %s2379_s28 }
 0x27e   :  { %1565 = vrot.lane.b32.xlu1 %v3766_v40, %s2382_s10 }
 0x280   :  { %v3853_v6 = vpop.permute.xlu2 %1852 }
 0x281   :  { %v3851_v33 = vpop.permute.xlu1 %1816 }
 0x282   :  { %1457 = vrot.lane.b32.xlu0 %v3813_v26, %s2378_s6  ;;  %1423 = vrot.lane.b32.xlu2 %v3790_v8, %s2379_s28 }
 0x286   :  { %1597 = vrot.lane.b32.xlu1 %v3766_v40, %s2384_s12 }
 0x288   :  { %v3867_v38 = vpop.permute.xlu2 %1870 }
 0x289   :  { %v3861_v63 = vpop.permute.xlu1 %1838 }
 0x28a   :  { %1483 = vrot.lane.b32.xlu0 %v3763_v60, %s2381_s30  ;;  %1455 = vrot.lane.b32.xlu2 %v3790_v8, %s2378_s6  ;;  %4646 = vst [vmem:[#allocation11_spill] sm:$0xff] %v3861_v63 }
 0x28e   :  { %1629 = vrot.lane.b32.xlu1 %v3766_v40, %s2385_s13 }
 0x290   :  { %v3875_v27 = vpop.permute.xlu2 %1892 }
 0x291   :  { %v3869_v58 = vpop.permute.xlu1 %1856  ;;  %4648 = vst [vmem:[#allocation13_spill] sm:$0xff] %v3875_v27 }
 0x292   :  { %1489 = vrot.lane.b32.xlu0 %v3813_v26, %s2381_s30  ;;  %1487 = vrot.lane.b32.xlu2 %v3790_v8, %s2381_s30  ;;  %4647 = vst [vmem:[#allocation12_spill] sm:$0xff] %v3869_v58 }
 0x296   :  { %1978 = vperm.xlu1 %2286, %v3740_v2  }
 0x298   :  { %v3887_v54 = vpop.permute.xlu2 %1910 }
 0x299   :  { %v3878_v15 = vpop.permute.xlu1 %1888  ;;  %4649 = vst [vmem:[#allocation44_spill] sm:$0xff] %v3887_v54  ;;  %v4660_v54 = vld [vmem:[#allocation15_spill] sm:$0xff] }
 0x29a   :  { %1537 = vrot.lane.b32.xlu0 %v3813_v26, %s2383_s11  ;;  %1531 = vrot.lane.b32.xlu2 %v3763_v60, %s2383_s11 }
 0x29e   :  { %2288 = vset.pattern.permute.xlu1 %v2394_v16 }
 0x29f   :  { %1996 = vperm.xlu1 %2288, %v3740_v2  }
 0x2a0   :  { %v3898_v53 = vpop.permute.xlu2 %1942 }
 0x2a1   :  { %v3889_v37 = vpop.permute.xlu1 %1906  ;;  %4650 = vst [vmem:[#allocation45_spill] sm:$0xff] %v3898_v53 }
 0x2a2   :  { %1563 = vrot.lane.b32.xlu0 %v3763_v60, %s2382_s10  ;;  %1535 = vrot.lane.b32.xlu2 %v3790_v8, %s2383_s11 }
 0x2a7   :  { %2291 = vset.pattern.permute.xlu1 %v2396_v18 }
 0x2a8   :  { %2018 = vperm.xlu1 %2291, %v3734_v55   ;;  %v1392_v29 = vpop.permute.xlu2 %1391 }
 0x2aa   :  { %1569 = vrot.lane.b32.xlu0 %v3813_v26, %s2382_s10  ;;  %1567 = vrot.lane.b32.xlu2 %v3790_v8, %s2382_s10 }
 0x2af   :  { %v3904_v43 = vpop.permute.xlu1 %1928  ;;  %v3933_v25 = vpop.permute.xlu0 %1924 }
 0x2b0   :  { %4651 = vst [vmem:[#allocation46_spill] sm:$0xff] %v3904_v43  ;;  %2293 = vset.pattern.permute.xlu1 %v2397_v23 }
 0x2b1   :  { %2036 = vperm.xlu1 %2293, %v3734_v55   ;;  %4655 = vst [vmem:[#allocation50_spill] sm:$0xff] %v3933_v25 }
 0x2b2   :  { %1595 = vrot.lane.b32.xlu0 %v3763_v60, %s2384_s12  ;;  %1599 = vrot.lane.b32.xlu2 %v3790_v8, %s2384_s12 }
 0x2b8   :  { %v3912_v32 = vpop.permute.xlu1 %1946 }
 0x2b9   :  { %4653 = vst [vmem:[#allocation48_spill] sm:$0xff] %v3912_v32  ;;  %2296 = vset.pattern.permute.xlu1 %v2398_v41  ;;  %v4659_v32 = vld [vmem:[#allocation14_spill] sm:$0xff] }
 0x2ba   :  { %1601 = vrot.lane.b32.xlu0 %v3813_v26, %s2384_s12  ;;  %1631 = vrot.lane.b32.xlu2 %v3790_v8, %s2385_s13 }
 0x2bb   :  { %2068 = vperm.xlu1 %2296, %v3740_v2  }
 0x2c0   :  { %v3924_v3 = vpop.permute.xlu1 %1389 }
 0x2c2   :  { %1627 = vrot.lane.b32.xlu0 %v3763_v60, %s2385_s13  ;;  %1960 = vperm.xlu2 %2284, %v3740_v2  }
 0x2c3   :  { %2298 = vset.pattern.permute.xlu1 %v2399_v19 }
 0x2c4   :  { %2086 = vperm.xlu1 %2298, %v3740_v2  }
 0x2c8   :  { %v3931_v17 = vpop.permute.xlu1 %1393 }
 0x2ca   :  { %1633 = vrot.lane.b32.xlu0 %v3813_v26, %s2385_s13  ;;  %2287 = vset.pattern.permute.xlu2 %v2393_v9 }
 0x2cb   :  { %1982 = vperm.xlu2 %2287, %v3734_v55  }
 0x2cc   :  { %v1396_v12 = vpop.permute.xlu2 %1395  ;;  %2301 = vset.pattern.permute.xlu1 %v4625_v24 }
 0x2cd   :  { %v1398_v20 = vsel %vm392_vm5, %v1392_v29, %v1396_v12  ;;  %v1400_v5 = vsel %vm392_vm5, %v1396_v12, %v1392_v29  ;;  %2110 = vperm.xlu1 %2301, %v57_v49   ;;  %v4658_v12 = vld [vmem:[#allocation32_spill] sm:$0xff] }
 0x2ce   :  { %v1403_v48 = vmul.f32 %v1400_v5, %v3018_v51  ;;  %v1404_v9 = vmul.f32 %v1398_v20, %v4656_v44 }
 0x2d0   :  { %v1422_v50 = vpop.permute.xlu1 %1421  ;;  %v1417_v5 = vmul.f32 %v4659_v32, %v1403_v48  ;;  %v1418_v20 = vmul.f32 %v4659_v32, %v1404_v9 }
 0x2d2   :  { %1964 = vperm.xlu0 %2285, %v3734_v55  }
 0x2d3   :  { %2289 = vset.pattern.permute.xlu2 %v2394_v16 }
 0x2d4   :  { %2000 = vperm.xlu2 %2289, %v3734_v55   ;;  %v3938_v42 = vpop.permute.xlu2 %1419 }
 0x2da   :  { %2290 = vset.pattern.permute.xlu0 %v2396_v18 }
 0x2db   :  { %2014 = vperm.xlu0 %2290, %v3740_v2  }
 0x2dc   :  { %2292 = vset.pattern.permute.xlu2 %v2397_v23  ;;  %v4657_v23 = vld [vmem:[#allocation31_spill] sm:$0xff]  ;;  %v1424_v43 = vpop.permute.xlu2 %1423 }
 0x2dd   :  { %2032 = vperm.xlu2 %2292, %v3740_v2  }
 0x2e3   :  { %2295 = vset.pattern.permute.xlu0 %v2400_v34 }
 0x2e4   :  { %v1426_v16 = vpop.permute.xlu0 %1425  ;;  %2054 = vperm.xlu0 %2295, %v3734_v55   ;;  %v1456_v32 = vpop.permute.xlu2 %1455 }
 0x2e5   :  { %v1428_v22 = vsel %vm410_vm4, %v1422_v50, %v1426_v16  ;;  %v1430_v18 = vsel %vm410_vm4, %v1426_v16, %v1422_v50  ;;  %2294 = vset.pattern.permute.xlu2 %v2400_v34  ;;  %v56_v50 = vld [vmem:[%s4437_s4] sm:$0xff]  ;;  %v4661_v16 = vld [vmem:[#allocation34_spill] sm:$0xff] }
 0x2e6   :  { %v1433_v29 = vmul.f32 %v1430_v18, %v4657_v23  ;;  %v1434_v49 = vmul.f32 %v1428_v22, %v4658_v12  ;;  %2050 = vperm.xlu2 %2294, %v3740_v2   ;;  %v1399_v2 = vsel %vm392_vm5, %v3931_v17, %v3924_v3  ;;  %v4662_v18 = vld [vmem:[#allocation35_spill] sm:$0xff] }
 0x2e8   :  { %v1445_v27 = vmul.f32 %v4660_v54, %v1433_v29  ;;  %v1446_v39 = vmul.f32 %v4660_v54, %v1434_v49  ;;  %v1454_v54 = vpop.permute.xlu1 %1453 }
 0x2ea   :  { %v1449_v58 = vadd.f32 %v1445_v27, %v1417_v5  ;;  %v1450_v63 = vadd.f32 %v1446_v39, %v1418_v20  ;;  %v1429_v27 = vsel %vm410_vm4, %v1424_v43, %v3938_v42  ;;  %v1401_v39 = vmul.f32 %v1399_v2, %v3018_v51  ;;  %v4663_v5 = vld [vmem:[#allocation26_spill] sm:$0xff]  ;;  %v4664_v51 = vld [vmem:[#allocation17_spill] sm:$0xff] }
 0x2eb   :  { %v1431_v9 = vmul.f32 %v1429_v27, %v4657_v23 }
 0x2ec   :  { %v1452_v34 = vpop.permute.xlu0 %1451  ;;  %2300 = vset.pattern.permute.xlu0 %v4625_v24  ;;  %v1415_v20 = vmul.f32 %v4663_v5, %v1401_v39  ;;  %v4667_v39 = vld [vmem:[#allocation18_spill] sm:$0xff] }
 0x2ed   :  { %2105 = vperm.xlu0 %2300, %v56_v50   ;;  %v1461_v49 = vsel %vm429_vm6, %v1456_v32, %v1452_v34 }
 0x2ee   :  { %2297 = vset.pattern.permute.xlu2 %v2398_v41  ;;  %v1463_v23 = vmul.f32 %v1461_v49, %v4661_v16 }
 0x2ef   :  { %2072 = vperm.xlu2 %2297, %v3734_v55  }
 0x2f0   :  { %v1475_v28 = vmul.f32 %v4667_v39, %v1463_v23 }
 0x2f4   :  { %v1458_v48 = vpop.permute.xlu0 %1457 }
 0x2f5   :  { %v1460_v24 = vsel %vm429_vm6, %v1454_v54, %v1458_v48  ;;  %v1462_v41 = vsel %vm429_vm6, %v1458_v48, %v1454_v54  ;;  %v1443_v54 = vmul.f32 %v4665_v62, %v1431_v9  ;;  %v1523_v9 = vmul.f32 %v3880_v47, %v3763_v60 }
 0x2f6   :  { %v1465_v22 = vmul.f32 %v1462_v41, %v4661_v16  ;;  %v1466_v29 = vmul.f32 %v1460_v24, %v4662_v18  ;;  %v1488_v41 = vpop.permute.xlu2 %1487 }
 0x2f7   :  { %2299 = vset.pattern.permute.xlu2 %v2399_v19  ;;  %v1447_v24 = vadd.f32 %v1443_v54, %v1415_v20 }
 0x2f8   :  { %v1477_v50 = vmul.f32 %v4664_v51, %v1465_v22  ;;  %v1478_v2 = vmul.f32 %v4664_v51, %v1466_v29  ;;  %2090 = vperm.xlu2 %2299, %v3734_v55   ;;  %v4668_v22 = vld [vmem:[#allocation36_spill] sm:$0xff] }
 0x2f9   :  { %v1479_v29 = vadd.f32 %v1475_v28, %v1447_v24  ;;  %v4669_v51 = vld [vmem:[#allocation20_spill] sm:$0xff] }
 0x2fa   :  { %v1481_v27 = vadd.f32 %v1477_v50, %v1449_v58  ;;  %v3985_v48 = vadd.f32 %v1478_v2, %v1450_v63  ;;  %v1486_v58 = vpop.permute.xlu1 %1485  ;;  %v4671_v2 = vld [vmem:[#allocation19_spill] sm:$0xff] }
 0x2fc   :  { %v1484_v45 = vpop.permute.xlu0 %1483 }
 0x2fd   :  { %v1493_v19 = vsel %vm4666_vm1, %v1488_v41, %v1484_v45 }
 0x2fe   :  { %v1495_v10 = vmul.f32 %v1493_v19, %v4668_v22  ;;  %v4672_v19 = vld [vmem:[#allocation23_spill] sm:$0xff]  ;;  %v1532_v24 = vpop.permute.xlu2 %1531 }
 0x2ff   :  { %v1525_v28 = vmul.f32 %v4672_v19, %v3766_v40 }
 0x300   :  { %v1507_v55 = vmul.f32 %v4669_v51, %v1495_v10 }
 0x302   :  { %v1511_v16 = vadd.f32 %v1507_v55, %v1479_v29  ;;  %v1534_v60 = vpop.permute.xlu1 %1533 }
 0x304   :  { %v1490_v63 = vpop.permute.xlu0 %1489  ;;  %v1527_v49 = vadd.f32 %v1523_v9, %v1511_v16  ;;  %v1397_v9 = vsel %vm392_vm5, %v3924_v3, %v3931_v17 }
 0x305   :  { %v1494_v20 = vsel %vm4670_vm12, %v1490_v63, %v1486_v58  ;;  %v1402_v40 = vmul.f32 %v1397_v9, %v4656_v44 }
 0x306   :  { %v1497_v50 = vmul.f32 %v1494_v20, %v4668_v22  ;;  %v1536_v55 = vpop.permute.xlu2 %1535 }
 0x308   :  { %v1509_v54 = vmul.f32 %v4671_v2, %v1497_v50 }
 0x30a   :  { %v1513_v23 = vadd.f32 %v1509_v54, %v1481_v27  ;;  %v1427_v27 = vsel %vm410_vm4, %v3938_v42, %v1424_v43  ;;  %v1566_v22 = vpop.permute.xlu1 %1565  ;;  %v1459_v54 = vsel %vm429_vm6, %v1452_v34, %v1456_v32  ;;  %vm4675_vm4 = vcmp.lt.s32.totalorder %v2990_v11, 127  ;;  %vm4677_vm6 = vmmov %vm4666_vm1 }
 0x30b   :  { %v1432_v20 = vmul.f32 %v1427_v27, %v4658_v12  ;;  %v1464_v17 = vmul.f32 %v1459_v54, %v4662_v18  ;;  %v1541_v44 = vsel %vm4675_vm4, %v1536_v55, %v1532_v24  ;;  %vm4676_vm5 = vmmov %vm4675_vm4 }
 0x30c   :  { %v1538_v10 = vpop.permute.xlu0 %1537  ;;  %v4000_v53 = vadd.f32 %v1525_v28, %v1513_v23  ;;  %v1491_v23 = vsel %vm4673_vm14, %v1484_v45, %v1488_v41  ;;  %v1416_v28 = vmul.f32 %v4663_v5, %v1402_v40  ;;  %v1539_v45 = vsel %vm4676_vm5, %v1532_v24, %v1536_v55  ;;  %v4679_v5 = vld [vmem:[#allocation42_spill] sm:$0xff]  ;;  %v4680_v40 = vld [vmem:[#allocation41_spill] sm:$0xff]  ;;  %vm4687_vm9 = vmmov %vm4675_vm4 }
 0x30d   :  { %v1444_v3 = vmul.f32 %v4665_v62, %v1432_v20  ;;  %v1496_v43 = vmul.f32 %v1491_v23, %v4674_v1  ;;  %v1476_v9 = vmul.f32 %v4667_v39, %v1464_v17  ;;  %v1492_v62 = vsel %vm4677_vm6, %v1486_v58, %v1490_v63  ;;  %v4682_v23 = vld [vmem:[#allocation39_spill] sm:$0xff]  ;;  %v4684_v63 = vld [vmem:[#allocation25_spill] sm:$0xff]  ;;  %vm4690_vm10 = vmmov %vm4675_vm4 }
 0x30e   :  { %v1568_v50 = vpop.permute.xlu2 %1567  ;;  %v1544_v41 = vmul.f32 %v1541_v44, %v4679_v5  ;;  %v1543_v20 = vmul.f32 %v1539_v45, %v4680_v40  ;;  %v1498_v54 = vmul.f32 %v1492_v62, %v4674_v1  ;;  %v1540_v44 = vsel %vm4687_vm9, %v1534_v60, %v1538_v10  ;;  %v4689_v45 = vld [vmem:[#allocation43_spill] sm:$0xff]  ;;  %vm4696_vm1 = vmmov %vm4683_vm7 }
 0x30f   :  { %v1448_v25 = vadd.f32 %v1444_v3, %v1416_v28  ;;  %v1508_v34 = vmul.f32 %v4669_v51, %v1496_v43  ;;  %v4686_v43 = vld [vmem:[#allocation38_spill] sm:$0xff]  ;;  %vm4697_vm12 = vmmov %vm4696_vm1 }
 0x310   :  { %v1556_v28 = vmul.f32 %v4684_v63, %v1544_v41  ;;  %v1555_v1 = vmul.f32 %v4684_v63, %v1543_v20  ;;  %v1510_v17 = vmul.f32 %v4671_v2, %v1498_v54  ;;  %v1545_v54 = vmul.f32 %v1540_v44, %v4680_v40  ;;  %v2306_v40 = vld [vmem:[%s4434_s1 + $0x10] ss:$0 sm:$0xff]  ;;  %vm4702_vm14 = vmmov %vm4694_vm3 }
 0x311   :  { %v1480_v18 = vadd.f32 %v1476_v9, %v1448_v25  ;;  %v1524_v25 = vmul.f32 %v3880_v47, %v3790_v8  ;;  %v4688_v9 = vld [vmem:[#allocation27_spill] sm:$0xff]  ;;  %v1542_v8 = vsel %vm4690_vm10, %v1538_v10, %v1534_v60  ;;  %vm4703_vm4 = vmmov %vm4694_vm3 }
 0x312   :  { %v1598_v12 = vpop.permute.xlu1 %1597  ;;  %v1514_v20 = vadd.f32 %v1510_v17, %v3985_v48 }
 0x313   :  { %v1512_v39 = vadd.f32 %v1508_v34, %v1480_v18 }
 0x314   :  { %v1564_v29 = vpop.permute.xlu0 %1563 }
 0x315   :  { %v1573_v32 = vsel %vm4678_vm0, %v1568_v50, %v1564_v29  ;;  %v1571_v51 = vsel %vm4681_vm13, %v1564_v29, %v1568_v50  ;;  %v1528_v50 = vadd.f32 %v1524_v25, %v1512_v39 }
 0x316   :  { %v1600_v27 = vpop.permute.xlu2 %1599  ;;  %v1576_v24 = vmul.f32 %v1573_v32, %v4682_v23  ;;  %v1575_v29 = vmul.f32 %v1571_v51, %v4686_v43  ;;  %v1546_v51 = vmul.f32 %v1542_v8, %v4679_v5 }
 0x317   :  { %v1560_v2 = vadd.f32 %v1556_v28, %v1528_v50 }
 0x318   :  { %v1588_v34 = vmul.f32 %v4688_v9, %v1576_v24  ;;  %v1587_v39 = vmul.f32 %v4688_v9, %v1575_v29 }
 0x31a   :  { %v1630_v18 = vpop.permute.xlu1 %1629  ;;  %v1592_v10 = vadd.f32 %v1588_v34, %v1560_v2 }
 0x31c   :  { %v1570_v16 = vpop.permute.xlu0 %1569 }
 0x31d   :  { %v1572_v47 = vsel %vm4691_vm2, %v1566_v22, %v1570_v16  ;;  %v1574_v41 = vsel %vm4693_vm15, %v1570_v16, %v1566_v22 }
 0x31e   :  { %v1577_v60 = vmul.f32 %v1572_v47, %v4686_v43  ;;  %v1632_v24 = vpop.permute.xlu2 %1631  ;;  %v1578_v63 = vmul.f32 %v1574_v41, %v4682_v23  ;;  %v4699_v47 = vld [vmem:[#allocation24_spill] sm:$0xff] }
 0x324   :  { %v1596_v42 = vpop.permute.xlu0 %1595 }
 0x325   :  { %v1605_v58 = vsel %vm4683_vm7, %v1600_v27, %v1596_v42  ;;  %v1603_v3 = vsel %vm4685_vm8, %v1596_v42, %v1600_v27  ;;  %v4692_v42 = vld [vmem:[#allocation40_spill] sm:$0xff]  ;;  %v1559_v27 = vadd.f32 %v1555_v1, %v1527_v49  ;;  %v4698_v1 = vld [vmem:[#allocation22_spill] sm:$0xff] }
 0x326   :  { %v1608_v62 = vmul.f32 %v1605_v58, %v4689_v45  ;;  %v1607_v32 = vmul.f32 %v1603_v3, %v4692_v42  ;;  %v1526_v3 = vmul.f32 %v4672_v19, %v3813_v26  ;;  %v1557_v17 = vmul.f32 %v4698_v1, %v1545_v54  ;;  %v4700_v54 = vld [vmem:[#allocation30_spill] sm:$0xff] }
 0x327   :  { %v1591_v43 = vadd.f32 %v1587_v39, %v1559_v27  ;;  %v1558_v29 = vmul.f32 %v4698_v1, %v1546_v51  ;;  %v1590_v26 = vmul.f32 %v4699_v47, %v1578_v63  ;;  %v4701_v51 = vld [vmem:[#allocation28_spill] sm:$0xff]  ;;  %v1961_v63 = vpop.permute.xlu2 %1960 }
 0x328   :  { %v1620_v58 = vmul.f32 %v3743_v4, %v1608_v62  ;;  %v1619_v16 = vmul.f32 %v3743_v4, %v1607_v32  ;;  %v2307_v4 = vld [vmem:[%s4434_s1 + $0x18] ss:$0 sm:$0xff]  ;;  %v1979_v62 = vpop.permute.xlu1 %1978  ;;  %v1530_v8 = vadd.f32 %v1526_v3, %v1514_v20  ;;  %v1589_v32 = vmul.f32 %v4699_v47, %v1577_v60 }
 0x329   :  { %v1561_v41 = vadd.f32 %v1557_v17, %v4000_v53 }
 0x32a   :  { %v1624_v50 = vadd.f32 %v1620_v58, %v1592_v10  ;;  %v1623_v44 = vadd.f32 %v1619_v16, %v1591_v43  ;;  %v1562_v27 = vadd.f32 %v1558_v29, %v1530_v8 }
 0x32b   :  { %v1593_v60 = vadd.f32 %v1589_v32, %v1561_v41 }
 0x32c   :  { %v1602_v55 = vpop.permute.xlu0 %1601 }
 0x32d   :  { %v1604_v22 = vsel %vm4696_vm1, %v1598_v12, %v1602_v55  ;;  %v1606_v5 = vsel %vm4697_vm12, %v1602_v55, %v1598_v12 }
 0x32e   :  { %v1609_v9 = vmul.f32 %v1604_v22, %v4692_v42  ;;  %v1610_v34 = vmul.f32 %v1606_v5, %v4689_v45 }
 0x330   :  { %v1621_v10 = vmul.f32 %v4701_v51, %v1609_v9  ;;  %v1622_v42 = vmul.f32 %v4701_v51, %v1610_v34  ;;  %v1997_v9 = vpop.permute.xlu1 %1996  ;;  %v4128_v34 = vld [vmem:[%s4433_s0 + $0x8] sm:$0xff] }
 0x331   :  { %v4552_v8 = vperm.slane %v4128_v34, 1 }
 0x332   :  { %v1625_v5 = vadd.f32 %v1621_v10, %v1593_v60 }
 0x334   :  { %v1628_v25 = vpop.permute.xlu0 %1627 }
 0x335   :  { %v1635_v48 = vsel %vm4694_vm3, %v1628_v25, %v1632_v24  ;;  %v1637_v49 = vsel %vm4695_vm11, %v1632_v24, %v1628_v25  ;;  %v1594_v24 = vadd.f32 %v1590_v26, %v1562_v27  ;;  %v4550_v27 = vperm.slane %v4128_v34, 2 }
 0x336   :  { %v1639_v28 = vmul.f32 %v2306_v40, %v1635_v48  ;;  %v1640_v23 = vmul.f32 %v2307_v4, %v1637_v49 }
 0x338   :  { %v1651_v12 = vmul.f32 %v3756_v46, %v1639_v28  ;;  %v1652_v55 = vmul.f32 %v3756_v46, %v1640_v23  ;;  %v1626_v28 = vadd.f32 %v1622_v42, %v1594_v24  ;;  %v4704_v23 = vld [vmem:[#allocation29_spill] sm:$0xff]  ;;  %v4161_v24 = vmul.f32 %v4552_v8, %v1979_v62 }
 0x33a   :  { %v1656_v19 = vadd.f32 %v1652_v55, %v1624_v50  ;;  %v1655_v2 = vadd.f32 %v1651_v12, %v1623_v44 }
 0x33c   :  { %v4090_v39 = vadd.f32 %v4700_v54, %v1656_v19  ;;  %v1634_v46 = vpop.permute.xlu0 %1633  ;;  %v4101_v25 = vadd.f32 %v4700_v54, %v1655_v2  ;;  %v4554_v2 = vperm.slane %v4128_v34, 0 }
 0x33d   :  { %v1636_v45 = vsel %vm4702_vm14, %v1630_v18, %v1634_v46  ;;  %v1638_v20 = vsel %vm4703_vm4, %v1634_v46, %v1630_v18 }
 0x33e   :  { %v1684_v58 = vperm.slane %v4090_v39, 0  ;;  %v1698_v53 = vperm.slane %v4090_v39, 1  ;;  %v1641_v16 = vmul.f32 %v2306_v40, %v1636_v45  ;;  %v1642_v48 = vmul.f32 %v2307_v4, %v1638_v20  ;;  %v4116_v40 = vld [vmem:[%s4433_s0] sm:$0xff] }
 0x33f   :  { %v1716_v49 = vperm.slane %v4090_v39, 2  ;;  %v1734_v18 = vperm.slane %v4090_v39, 3  ;;  %v4553_v4 = vperm.slane %v4116_v40, 1  ;;  %v1752_v29 = vperm.slane %v4090_v39, 4 }
 0x340   :  { %v1686_v22 = vmul.f32 %v1684_v58, %v3746_v57  ;;  %v1700_v11 = vmul.f32 %v1698_v53, %v3760_v59  ;;  %v1653_v3 = vmul.f32 %v4704_v23, %v1641_v16  ;;  %v1654_v1 = vmul.f32 %v4704_v23, %v1642_v48 }
 0x341   :  { %v1718_v43 = vmul.f32 %v1716_v49, %v3802_v0  ;;  %v1683_v50 = vperm.slane %v4101_v25, 0  ;;  %v1697_v12 = vperm.slane %v4101_v25, 1  ;;  %v1736_v32 = vmul.f32 %v1734_v18, %v3809_v56 }
 0x342   :  { %v1704_v17 = vadd.f32 %v1700_v11, %v1686_v22  ;;  %v1657_v55 = vadd.f32 %v1653_v3, %v1625_v5  ;;  %v1658_v44 = vadd.f32 %v1654_v1, %v1626_v28  ;;  %v1770_v26 = vperm.slane %v4090_v39, 5 }
 0x343   :  { %v4555_v19 = vperm.slane %v4116_v40, 0  ;;  %v4551_v41 = vperm.slane %v4116_v40, 2  ;;  %v1754_v51 = vmul.f32 %v1752_v29, %v3895_v13  ;;  %v1788_v10 = vperm.slane %v4090_v39, 6 }
 0x344   :  { %v1722_v47 = vadd.f32 %v1718_v43, %v1704_v17  ;;  %v4140_v54 = vadd.f32 %v3779_v14, %v1658_v44  ;;  %v4148_v42 = vmul.f32 %v4553_v4, %v1979_v62  ;;  %v4151_v45 = vadd.f32 %v3779_v14, %v1657_v55 }
 0x345   :  { %v1685_v20 = vmul.f32 %v1683_v50, %v3746_v57  ;;  %v1699_v60 = vmul.f32 %v1697_v12, %v3760_v59  ;;  %v1772_v48 = vmul.f32 %v1770_v26, %v3804_v36  ;;  %v1806_v14 = vperm.slane %v4090_v39, 7  ;;  %v4175_v59 = vpop.permute.xlu2 %1982 }
 0x346   :  { %v1740_v46 = vadd.f32 %v1736_v32, %v1722_v47  ;;  %v4169_v22 = vmul.f32 %v4555_v19, %v1961_v63  ;;  %v4173_v57 = vmul.f32 %v4554_v2, %v1961_v63  ;;  %v1715_v62 = vperm.slane %v4101_v25, 2  ;;  %v4231_v32 = vpop.permute.xlu0 %1964 }
 0x347   :  { %v4180_v11 = vmul.f32 %v4551_v41, %v1997_v9  ;;  %v1790_v28 = vmul.f32 %v1788_v10, %v3819_v35  ;;  %v1824_v23 = vperm.slane %v4140_v54, 0  ;;  %v4188_v3 = vmul.f32 %v4550_v27, %v1997_v9 }
 0x348   :  { %v1758_v16 = vadd.f32 %v1754_v51, %v1740_v46  ;;  %v1823_v63 = vperm.slane %v4151_v45, 0  ;;  %v1703_v1 = vadd.f32 %v1699_v60, %v1685_v20  ;;  %v1733_v17 = vperm.slane %v4101_v25, 3  ;;  %v4202_v60 = vpop.permute.xlu1 %2018 }
 0x349   :  { %v1808_v44 = vmul.f32 %v1806_v14, %v3841_v7  ;;  %v4560_v47 = vperm.slane %v4140_v54, 1  ;;  %v1841_v46 = vperm.slane %v4151_v45, 1  ;;  %v4558_v9 = vperm.slane %v4151_v45, 2 }
 0x34a   :  { %v1776_v5 = vadd.f32 %v1772_v48, %v1758_v16  ;;  %v1717_v51 = vmul.f32 %v1715_v62, %v3802_v0  ;;  %v1751_v20 = vperm.slane %v4101_v25, 4  ;;  %v1826_v48 = vmul.f32 %v1824_v23, %v3851_v33 }
 0x34b   :  { %v1825_v27 = vmul.f32 %v1823_v63, %v3851_v33  ;;  %v4557_v41 = vperm.slane %v4140_v54, 3  ;;  %v1735_v8 = vmul.f32 %v1733_v17, %v3809_v56  ;;  %v1769_v2 = vperm.slane %v4101_v25, 5 }
 0x34c   :  { %v1794_v55 = vadd.f32 %v1790_v28, %v1776_v5  ;;  %v4556_v5 = vperm.slane %v4140_v54, 2  ;;  %v1877_v28 = vperm.slane %v4151_v45, 3  ;;  %v1721_v0 = vadd.f32 %v1717_v51, %v1703_v1 }
 0x34d   :  { %v1843_v19 = vmul.f32 %v1841_v46, %v3914_v30  ;;  %v1753_v33 = vmul.f32 %v1751_v20, %v3895_v13  ;;  %v1787_v1 = vperm.slane %v4101_v25, 6  ;;  %v1861_v56 = vmul.f32 %v4558_v9, %v3853_v6 }
 0x34e   :  { %v1812_v16 = vadd.f32 %v1808_v44, %v1794_v55  ;;  %v1844_v55 = vmul.f32 %v4560_v47, %v3914_v30  ;;  %v4559_v44 = vperm.slane %v4140_v54, 4  ;;  %v1739_v43 = vadd.f32 %v1735_v8, %v1721_v0  ;;  %v4238_v0 = vpop.permute.xlu2 %2000 }
 0x34f   :  { %v1880_v30 = vmul.f32 %v4557_v41, %v3867_v38  ;;  %v1914_v13 = vperm.slane %v4140_v54, 5  ;;  %v1688_v41 = vmul.f32 %v1684_v58, %v3796_v61 }
 0x350   :  { %v1830_v4 = vadd.f32 %v1826_v48, %v1812_v16  ;;  %v1862_v16 = vmul.f32 %v4556_v5, %v3853_v6  ;;  %v1805_v48 = vperm.slane %v4101_v25, 7  ;;  %v1757_v8 = vadd.f32 %v1753_v33, %v1739_v43  ;;  %v4262_v25 = vpop.permute.xlu1 %2036 }
 0x351   :  { %v1898_v6 = vmul.f32 %v4559_v44, %v3878_v15  ;;  %v1687_v5 = vmul.f32 %v1683_v50, %v3796_v61  ;;  %v1789_v43 = vmul.f32 %v1787_v1, %v3819_v35  ;;  %v1702_v33 = vmul.f32 %v1698_v53, %v3729_v21 }
 0x352   :  { %v1848_v51 = vadd.f32 %v1844_v55, %v1830_v4  ;;  %v1771_v4 = vmul.f32 %v1769_v2, %v3804_v36  ;;  %v1701_v36 = vmul.f32 %v1697_v12, %v3729_v21  ;;  %v1807_v50 = vmul.f32 %v1805_v48, %v3841_v7 }
 0x353   :  { %v1719_v44 = vmul.f32 %v1715_v62, %v3786_v52  ;;  %v1706_v58 = vadd.f32 %v1702_v33, %v1688_v41  ;;  %v1720_v35 = vmul.f32 %v1716_v49, %v3786_v52  ;;  %v1916_v21 = vmul.f32 %v1914_v13, %v3889_v37 }
 0x354   :  { %v1866_v55 = vadd.f32 %v1862_v16, %v1848_v51  ;;  %v1775_v9 = vadd.f32 %v1771_v4, %v1757_v8  ;;  %v1932_v16 = vperm.slane %v4140_v54, 6  ;;  %v1705_v61 = vadd.f32 %v1701_v36, %v1687_v5  ;;  %v4705_v5 = vld [vmem:[#allocation50_spill] sm:$0xff]  ;;  %v4706_v4 = vld [vmem:[#allocation8_spill] sm:$0xff]  ;;  %v4708_v36 = vld [vmem:[#allocation21_spill] sm:$0xff] }
 0x355   :  { %v1950_v53 = vperm.slane %v4140_v54, 7  ;;  %v1737_v7 = vmul.f32 %v1733_v17, %v3798_v31  ;;  %v1738_v41 = vmul.f32 %v1734_v18, %v3798_v31  ;;  %v1879_v52 = vmul.f32 %v1877_v28, %v3867_v38 }
 0x356   :  { %v1884_v51 = vadd.f32 %v1880_v30, %v1866_v55  ;;  %v1793_v47 = vadd.f32 %v1789_v43, %v1775_v9  ;;  %v1723_v62 = vadd.f32 %v1719_v44, %v1705_v61  ;;  %v1724_v9 = vadd.f32 %v1720_v35, %v1706_v58  ;;  %v4707_v43 = vld [vmem:[#allocation45_spill] sm:$0xff] }
 0x357   :  { %v1934_v8 = vmul.f32 %v1932_v16, %v4705_v5  ;;  %v1755_v55 = vmul.f32 %v1751_v20, %v4706_v4  ;;  %v1756_v44 = vmul.f32 %v1752_v29, %v4706_v4  ;;  %v1895_v31 = vperm.slane %v4151_v45, 4  ;;  %v4289_v20 = vpop.permute.xlu2 %2032 }
 0x358   :  { %v1902_v12 = vadd.f32 %v1898_v6, %v1884_v51  ;;  %v1811_v30 = vadd.f32 %v1807_v50, %v1793_v47  ;;  %v1741_v17 = vadd.f32 %v1737_v7, %v1723_v62  ;;  %v1742_v47 = vadd.f32 %v1738_v41, %v1724_v9  ;;  %v4287_v51 = vpop.permute.xlu0 %2014 }
 0x359   :  { %v1952_v38 = vmul.f32 %v1950_v53, %v4707_v43  ;;  %v1773_v33 = vmul.f32 %v1769_v2, %v4708_v36  ;;  %v1774_v29 = vmul.f32 %v1770_v26, %v4708_v36  ;;  %v1913_v58 = vperm.slane %v4151_v45, 5 }
 0x35a   :  { %v1920_v49 = vadd.f32 %v1916_v21, %v1902_v12  ;;  %v1829_v6 = vadd.f32 %v1825_v27, %v1811_v30  ;;  %v1759_v27 = vadd.f32 %v1755_v55, %v1741_v17  ;;  %v1760_v61 = vadd.f32 %v1756_v44, %v1742_v47  ;;  %v4709_v21 = vld [vmem:[#allocation47_spill] sm:$0xff]  ;;  %v4711_v47 = vld [vmem:[#allocation10_spill] sm:$0xff] }
 0x35b   :  { %v1931_v35 = vperm.slane %v4151_v45, 6  ;;  %v1791_v7 = vmul.f32 %v1787_v1, %v4709_v21  ;;  %v1897_v9 = vmul.f32 %v1895_v31, %v3878_v15  ;;  %v1949_v41 = vperm.slane %v4151_v45, 7 }
 0x35c   :  { %v1938_v18 = vadd.f32 %v1934_v8, %v1920_v49  ;;  %v1847_v50 = vadd.f32 %v1843_v19, %v1829_v6  ;;  %v1777_v2 = vadd.f32 %v1773_v33, %v1759_v27  ;;  %v1778_v62 = vadd.f32 %v1774_v29, %v1760_v61  ;;  %v4710_v49 = vld [vmem:[#allocation9_spill] sm:$0xff]  ;;  %v4714_v27 = vld [vmem:[#allocation12_spill] sm:$0xff] }
 0x35d   :  { %v1792_v19 = vmul.f32 %v1788_v10, %v4709_v21  ;;  %v1809_v8 = vmul.f32 %v1805_v48, %v4710_v49  ;;  %v1810_v1 = vmul.f32 %v1806_v14, %v4710_v49  ;;  %v1915_v17 = vmul.f32 %v1913_v58, %v3889_v37 }
 0x35e   :  { %v1956_v12 = vadd.f32 %v1952_v38, %v1938_v18  ;;  %v1865_v30 = vadd.f32 %v1861_v56, %v1847_v50  ;;  %v1795_v55 = vadd.f32 %v1791_v7, %v1777_v2  ;;  %v4307_v56 = vpop.permute.xlu1 %2068  ;;  %v1933_v10 = vmul.f32 %v1931_v35, %v4705_v5  ;;  %v4712_v5 = vld [vmem:[#allocation11_spill] sm:$0xff] }
 0x35f   :  { %v1796_v6 = vadd.f32 %v1792_v19, %v1778_v62  ;;  %v1828_v39 = vmul.f32 %v1824_v23, %v4711_v47  ;;  %v1951_v14 = vmul.f32 %v1949_v41, %v4707_v43  ;;  %v2040_v37 = vperm.slane %v4128_v34, 4 }
 0x360   :  { %v1974_v26 = vadd.f32 %v4173_v57, %v1956_v12  ;;  %v1883_v4 = vadd.f32 %v1879_v52, %v1865_v30  ;;  %v1827_v57 = vmul.f32 %v1823_v63, %v4711_v47  ;;  %v1813_v52 = vadd.f32 %v1809_v8, %v1795_v55  ;;  %v4337_v21 = vpop.permute.xlu0 %2054 }
 0x361   :  { %v1814_v44 = vadd.f32 %v1810_v1, %v1796_v6  ;;  %v4713_v63 = vperm.slane %v4140_v54, 1  ;;  %v2039_v23 = vperm.slane %v4116_v40, 4  ;;  %v4715_v43 = vperm.slane %v4151_v45, 2 }
 0x362   :  { %v1992_v15 = vadd.f32 %v4161_v24, %v1974_v26  ;;  %v1901_v48 = vadd.f32 %v1897_v9, %v1883_v4  ;;  %v1845_v24 = vmul.f32 %v1841_v46, %v4712_v5  ;;  %v1831_v33 = vadd.f32 %v1827_v57, %v1813_v52  ;;  %v4718_v26 = vld [vmem:[#allocation49_spill] sm:$0xff]  ;;  %v4722_v52 = vld [vmem:[#allocation44_spill] sm:$0xff] }
 0x363   :  { %v1846_v18 = vmul.f32 %v4713_v63, %v4712_v5  ;;  %v1832_v50 = vadd.f32 %v1828_v39, %v1814_v44  ;;  %v1863_v61 = vmul.f32 %v4715_v43, %v4714_v27  ;;  %v4716_v29 = vperm.slane %v4140_v54, 2 }
 0x364   :  { %v1919_v38 = vadd.f32 %v1915_v17, %v1901_v48  ;;  %v2010_v36 = vadd.f32 %v4188_v3, %v1992_v15  ;;  %v2058_v46 = vperm.slane %v4128_v34, 5  ;;  %v1849_v30 = vadd.f32 %v1845_v24, %v1831_v33  ;;  %v2051_v3 = vpop.permute.xlu2 %2050  ;;  %v4720_v15 = vld [vmem:[#allocation13_spill] sm:$0xff] }
 0x365   :  { %v1864_v12 = vmul.f32 %v4716_v29, %v4714_v27  ;;  %v1850_v2 = vadd.f32 %v1846_v18, %v1832_v50  ;;  %v4717_v62 = vperm.slane %v4128_v34, 3  ;;  %v2042_v9 = vmul.f32 %v2040_v37, %v4289_v20 }
 0x366   :  { %v1937_v7 = vadd.f32 %v1933_v10, %v1919_v38  ;;  %v1881_v49 = vmul.f32 %v1877_v28, %v4718_v26  ;;  %v4719_v8 = vperm.slane %v4140_v54, 3  ;;  %v2076_v55 = vperm.slane %v4128_v34, 6 }
 0x367   :  { %v2024_v19 = vmul.f32 %v4717_v62, %v4287_v51  ;;  %v1867_v1 = vadd.f32 %v1863_v61, %v1849_v30  ;;  %v1868_v17 = vadd.f32 %v1864_v12, %v1850_v2  ;;  %v1899_v47 = vmul.f32 %v1895_v31, %v4720_v15  ;;  %v4723_v31 = vld [vmem:[#allocation46_spill] sm:$0xff]  ;;  %v4725_v62 = vld [vmem:[#allocation48_spill] sm:$0xff] }
 0x368   :  { %v1882_v4 = vmul.f32 %v4719_v8, %v4718_v26  ;;  %v1955_v6 = vadd.f32 %v1951_v14, %v1937_v7  ;;  %v4721_v57 = vperm.slane %v4140_v54, 4  ;;  %v1917_v44 = vmul.f32 %v1913_v58, %v4722_v52  ;;  %v2087_v14 = vpop.permute.xlu1 %2086 }
 0x369   :  { %v2028_v10 = vadd.f32 %v2024_v19, %v2010_v36  ;;  %v2060_v28 = vmul.f32 %v2058_v46, %v2051_v3  ;;  %v1885_v5 = vadd.f32 %v1881_v49, %v1867_v1  ;;  %v1918_v18 = vmul.f32 %v1914_v13, %v4722_v52 }
 0x36a   :  { %v1900_v48 = vmul.f32 %v4721_v57, %v4720_v15  ;;  %v1973_v39 = vadd.f32 %v4169_v22, %v1955_v6  ;;  %v1886_v24 = vadd.f32 %v1882_v4, %v1868_v17  ;;  %v1935_v38 = vmul.f32 %v1931_v35, %v4723_v31 }
 0x36b   :  { %v2046_v63 = vadd.f32 %v2042_v9, %v2028_v10  ;;  %v2078_v36 = vmul.f32 %v2076_v55, %v4307_v56  ;;  %v2094_v58 = vperm.slane %v4128_v34, 7  ;;  %v1903_v50 = vadd.f32 %v1899_v47, %v1885_v5  ;;  %v2106_v9 = vpop.permute.xlu0 %2105 }
 0x36c   :  { %v1991_v33 = vadd.f32 %v4148_v42, %v1973_v39  ;;  %v1904_v22 = vadd.f32 %v1900_v48, %v1886_v24  ;;  %v1936_v43 = vmul.f32 %v1932_v16, %v4723_v31  ;;  %v2057_v61 = vperm.slane %v4116_v40, 5  ;;  %v2073_v1 = vpop.permute.xlu2 %2072 }
 0x36d   :  { %v2064_v27 = vadd.f32 %v2060_v28, %v2046_v63  ;;  %v4724_v13 = vperm.slane %v4116_v40, 3  ;;  %v2096_v29 = vmul.f32 %v2094_v58, %v2087_v14  ;;  %v1921_v7 = vadd.f32 %v1917_v44, %v1903_v50 }
 0x36e   :  { %v2009_v12 = vadd.f32 %v4180_v11, %v1991_v33  ;;  %v1922_v42 = vadd.f32 %v1918_v18, %v1904_v22  ;;  %v2041_v2 = vmul.f32 %v2039_v23, %v4289_v20  ;;  %v1953_v16 = vmul.f32 %v1949_v41, %v4725_v62 }
 0x36f   :  { %v2023_v35 = vmul.f32 %v4724_v13, %v4287_v51  ;;  %v2082_v30 = vadd.f32 %v2078_v36, %v2064_v27  ;;  %v1954_v51 = vmul.f32 %v1950_v53, %v4725_v62  ;;  %v2075_v19 = vperm.slane %v4116_v40, 6 }
 0x370   :  { %v1939_v26 = vadd.f32 %v1935_v38, %v1921_v7  ;;  %v1940_v11 = vadd.f32 %v1936_v43, %v1922_v42  ;;  %v4726_v4 = vperm.slane %v4116_v40, 0  ;;  %v4727_v20 = vperm.slane %v4128_v34, 0 }
 0x371   :  { %v2027_v49 = vadd.f32 %v2023_v35, %v2009_v12  ;;  %v2100_v8 = vadd.f32 %v2096_v29, %v2082_v30  ;;  %v2059_v41 = vmul.f32 %v2057_v61, %v2051_v3  ;;  %v2093_v54 = vperm.slane %v4116_v40, 7 }
 0x372   :  { %v1971_v6 = vmul.f32 %v4726_v4, %v4231_v32  ;;  %v1972_v45 = vmul.f32 %v4727_v20, %v4231_v32  ;;  %v1957_v53 = vadd.f32 %v1953_v16, %v1939_v26  ;;  %v1958_v17 = vadd.f32 %v1954_v51, %v1940_v11  ;;  %v2111_v51 = vpop.permute.xlu1 %2110 }
 0x373   :  { %v2045_v10 = vadd.f32 %v2041_v2, %v2027_v49  ;;  %v2114_v15 = vadd.f32 %v2106_v9, %v2100_v8  ;;  %v4728_v47 = vperm.slane %v4116_v40, 1  ;;  %v4729_v48 = vperm.slane %v4128_v34, 1 }
 0x374   :  { %v1975_v44 = vadd.f32 %v1971_v6, %v1957_v53  ;;  %v1976_v28 = vadd.f32 %v1972_v45, %v1958_v17  ;;  %v2077_v32 = vmul.f32 %v2075_v19, %v4307_v56  ;;  %v4730_v3 = vperm.slane %v4116_v40, 2  ;;  %v2091_v7 = vpop.permute.xlu2 %2090 }
 0x375   :  { %v1989_v57 = vmul.f32 %v4728_v47, %v4175_v59  ;;  %v1990_v52 = vmul.f32 %v4729_v48, %v4175_v59  ;;  %v2063_v39 = vadd.f32 %v2059_v41, %v2045_v10  ;;  %2118 = vst [vmem:[#allocation5 + $0x8] sm:$0xff] %v2114_v15  ;;  %v4731_v24 = vperm.slane %v4128_v34, 2 }
 0x376   :  { %v2007_v5 = vmul.f32 %v4730_v3, %v4238_v0  ;;  %v2095_v36 = vmul.f32 %v2093_v54, %v2087_v14  ;;  %v4732_v59 = vmov %v4724_v13  ;;  %v4733_v56 = vperm.slane %v4128_v34, 3 }
 0x377   :  { %v2008_v63 = vmul.f32 %v4731_v24, %v4238_v0  ;;  %v1993_v18 = vadd.f32 %v1989_v57, %v1975_v44  ;;  %v1994_v31 = vadd.f32 %v1990_v52, %v1976_v28  ;;  %v2081_v38 = vadd.f32 %v2077_v32, %v2063_v39 }
 0x378   :  { %v2025_v33 = vmul.f32 %v4732_v59, %v4202_v60  ;;  %v2026_v50 = vmul.f32 %v4733_v56, %v4202_v60  ;;  %v2043_v13 = vmul.f32 %v2039_v23, %v4262_v25  ;;  %v2044_v0 = vmul.f32 %v2040_v37, %v4262_v25 }
 0x379   :  { %v2012_v22 = vadd.f32 %v2008_v63, %v1994_v31  ;;  %v2011_v27 = vadd.f32 %v2007_v5, %v1993_v18  ;;  %v2099_v43 = vadd.f32 %v2095_v36, %v2081_v38  ;;  %v2061_v14 = vmul.f32 %v2057_v61, %v4337_v21 }
 0x37a   :  { %v2062_v12 = vmul.f32 %v2058_v46, %v4337_v21  ;;  %v2079_v2 = vmul.f32 %v2075_v19, %v2073_v1  ;;  %v2080_v40 = vmul.f32 %v2076_v55, %v2073_v1  ;;  %v2097_v25 = vmul.f32 %v2093_v54, %v2091_v7 }
 0x37b   :  { %v2030_v35 = vadd.f32 %v2026_v50, %v2012_v22  ;;  %v2029_v29 = vadd.f32 %v2025_v33, %v2011_v27  ;;  %v2113_v60 = vadd.f32 %v2106_v9, %v2099_v43  ;;  %v2098_v37 = vmul.f32 %v2094_v58, %v2091_v7 }
 0x37d   :  { %v2047_v42 = vadd.f32 %v2043_v13, %v2029_v29  ;;  %v2048_v30 = vadd.f32 %v2044_v0, %v2030_v35  ;;  %2117 = vst [vmem:[#allocation5] sm:$0xff] %v2113_v60 }
 0x37f   :  { %v2065_v23 = vadd.f32 %v2061_v14, %v2047_v42  ;;  %v2066_v62 = vadd.f32 %v2062_v12, %v2048_v30 }
 0x381   :  { %v2084_v61 = vadd.f32 %v2080_v40, %v2066_v62  ;;  %v2083_v16 = vadd.f32 %v2079_v2, %v2065_v23 }
 0x383   :  { %v2102_v46 = vadd.f32 %v2098_v37, %v2084_v61  ;;  %v2101_v21 = vadd.f32 %v2097_v25, %v2083_v16 }
 0x385   :  { %v2115_v19 = vadd.f32 %v2111_v51, %v2101_v21  ;;  %v2116_v9 = vadd.f32 %v2111_v51, %v2102_v46 }
 0x387   :  { %2119 = vst [vmem:[#allocation5 + $0x10] sm:$0xff] %v2115_v19 }
 0x388   :  { %2120 = vst [vmem:[#allocation5 + $0x18] sm:$0xff] %v2116_v9 }
 0x389   :  { %2133 = dma.vmem_to_hbm [thread:$0]  %s2126_s5, 512, %s2128_s15, [#allocation4], %s2402_s16, %s2402_s16, %s2379_s28  }
 0x38a   :  { %2360 = dma.done.wait [#allocation4], 512  }
 0x38b   :  { %2361 = vsyncadd [#allocation4], 4294966784 }
 0x38c   :  { %2138 = vsyncpa [#allocation3], 1 }
 0x38d   :  { %2139 = vsyncpa [#allocation4], 1 }

</bundles_post_ra>
